<compile_context>
chip_gen: v7x
topology: tpu7x:2x2x1
jax: 0.10.0
libtpu: 0.0.40
codegen_flags: <defaults>
</compile_context>

<pallas_src>
import functools

import jax
import jax.numpy as jnp
from jax.experimental import pallas as pl
from jax.experimental.pallas import tpu as pltpu

LN_EPS = 1e-5
MXU_DTYPE = jnp.bfloat16          # MXU operand dtype (accumulation stays f32)
NEG_INF = jnp.float32(-1e30)      # finite "masked" value (safer than -inf)

_VMEM_LIMIT = None


def _vmem_limit_bytes():
    """~75% of physical VMEM: 96 MiB on v5e/v6e (128 MiB), 48 MiB on v7x (64 MiB)."""
    try:
        info = pltpu.get_tpu_info()
        cap = int(getattr(info, "vmem_capacity_bytes", 128 * 1024 * 1024))
    except Exception:
        cap = 64 * 1024 * 1024
    return int(min(96 * 1024 * 1024, (cap * 3) // 4))


def _cparams(n_axes):
    global _VMEM_LIMIT
    if _VMEM_LIMIT is None:
        _VMEM_LIMIT = _vmem_limit_bytes()
    return pltpu.CompilerParams(
        dimension_semantics=("parallel",) * n_axes,
        vmem_limit_bytes=_VMEM_LIMIT)


def _round_up(x, m):
    return ((x + m - 1) // m) * m


def _row_tile(n):
    """Row tile for N=B*L grids.  No exact-divisor requirement (grid uses
    pl.cdiv + masked remainder tile); large tiles amortise per-step overhead
    and >=2 steps keeps both v7x TensorCores busy."""
    if n >= 1024:
        return 512
    return max(8, _round_up(pl.cdiv(n, 2), 8))


def _batch_tile(b):
    for t in (4, 2, 1):
        if b % t == 0:
            return t
    return 1


def _layernorm_f32(x, g, b):
    mu = jnp.mean(x, axis=-1, keepdims=True)
    var = jnp.mean(jnp.square(x - mu), axis=-1, keepdims=True)
    return (x - mu) * jax.lax.rsqrt(var + LN_EPS) * g + b


def _causal_bias(L):
    r = jnp.arange(L)
    return jnp.where(r[None, :] <= r[:, None],
                     jnp.float32(0.0), NEG_INF).astype(jnp.float32)


# ------------------------- fused LN1 + QKV projection ------------------------

def _ln_qkv_kernel(x_ref, g_ref, b_ref, w_ref, bias_ref, o_ref):
    x = x_ref[...].astype(jnp.float32)
    h = _layernorm_f32(x, g_ref[...], b_ref[...])
    y = jnp.dot(h.astype(w_ref.dtype), w_ref[...],
                preferred_element_type=jnp.float32)
    o_ref[...] = (y + bias_ref[...]).astype(o_ref.dtype)


def ln_qkv(x, g, b, w, bias):
    # x: (N, D); w: (D, 3D) bf16 (transposed vs. torch, q-scale folded in);
    # returns (N, 3D) in bf16 (halves the qkv intermediate's HBM traffic).
    N, D = x.shape
    Dout = w.shape[1]
    TR = _row_tile(N)
    return pl.pallas_call(
        _ln_qkv_kernel,
        out_shape=jax.ShapeDtypeStruct((N, Dout), MXU_DTYPE),
        grid=(pl.cdiv(N, TR),),
        in_specs=[
            pl.BlockSpec((TR, D), lambda i: (i, 0)),
            pl.BlockSpec((1, D), lambda i: (0, 0)),
            pl.BlockSpec((1, D), lambda i: (0, 0)),
            pl.BlockSpec((D, Dout), lambda i: (0, 0)),   # resident bf16 weight
            pl.BlockSpec((1, Dout), lambda i: (0, 0)),
        ],
        out_specs=pl.BlockSpec((TR, Dout), lambda i: (i, 0)),
        compiler_params=_cparams(1),
    )(x, g.reshape(1, D), b.reshape(1, D), w, bias.reshape(1, Dout))


# ------------- fused multi-head attention + out-proj + residual --------------

def _attn_block_kernel(qkv_ref, xres_ref, bias_ref, wo_ref, bo_ref, o_ref,
                       *, n_heads, d_head):
    Bt, L, _ = qkv_ref.shape
    D = n_heads * d_head
    qkv = qkv_ref[...]                                  # (Bt, L, 3D) bf16
    bias = bias_ref[...]                                # (L, L) f32 causal bias
    wo = wo_ref[...]                                    # (D, D) bf16

    acc = jnp.zeros((Bt, L, D), jnp.float32)
    for h in range(n_heads):                            # static unroll over heads
        lo = h * d_head
        qh = qkv[:, :, lo:lo + d_head]                  # q already pre-scaled
        kh = qkv[:, :, D + lo:D + lo + d_head]
        vh = qkv[:, :, 2 * D + lo:2 * D + lo + d_head]
        s = jax.lax.dot_general(qh, kh, (((2,), (2,)), ((0,), (0,))),
                                preferred_element_type=jnp.float32)   # (Bt,L,L)
        s = s + bias
        s = s - jnp.max(s, axis=-1, keepdims=True)
        p = jnp.exp(s)
        p = p * pl.reciprocal(jnp.sum(p, axis=-1, keepdims=True), approx=True)
        ctx = jax.lax.dot_general(p.astype(MXU_DTYPE), vh,
                                  (((2,), (1,)), ((0,), (0,))),
                                  preferred_element_type=jnp.float32)  # (Bt,L,dh)
        # out-proj accumulation against sublane-aligned W_out row slice
        acc = acc + jax.lax.dot_general(
            ctx.astype(MXU_DTYPE), wo[lo:lo + d_head, :],
            (((2,), (0,)), ((), ())),
            preferred_element_type=jnp.float32)                        # (Bt,L,D)

    y = acc + bo_ref[...]
    o_ref[...] = (xres_ref[...].astype(jnp.float32) + y).astype(o_ref.dtype)


def attn_block(qkv, x_res, causal_bias, w_out, b_out, n_heads):
    # qkv: (B, L, 3D) bf16; x_res: (B, L, D) f32; returns x_res + out_proj(attn).
    B, L, D3 = qkv.shape
    D = D3 // 3
    d_head = D // n_heads
    Bt = _batch_tile(B)
    kern = functools.partial(_attn_block_kernel, n_heads=n_heads, d_head=d_head)
    return pl.pallas_call(
        kern,
        out_shape=jax.ShapeDtypeStruct((B, L, D), x_res.dtype),
        grid=(B // Bt,),
        in_specs=[
            pl.BlockSpec((Bt, L, D3), lambda b: (b, 0, 0)),
            pl.BlockSpec((Bt, L, D), lambda b: (b, 0, 0)),
            pl.BlockSpec((L, L), lambda b: (0, 0)),      # resident causal bias
            pl.BlockSpec((D, D), lambda b: (0, 0)),      # resident bf16 weight
            pl.BlockSpec((1, D), lambda b: (0, 0)),
        ],
        out_specs=pl.BlockSpec((Bt, L, D), lambda b: (b, 0, 0)),
        compiler_params=_cparams(1),
    )(qkv, x_res, causal_bias, w_out, b_out.reshape(1, D))


# ------------------- fused LN2 + MLP (QuickGELU) + residual ------------------

def _ln_mlp_res_kernel(x_ref, g_ref, b_ref, w1_ref, b1_ref, w2_ref, b2_ref,
                       o_ref):
    x = x_ref[...].astype(jnp.float32)
    h = _layernorm_f32(x, g_ref[...], b_ref[...])
    a = jnp.dot(h.astype(w1_ref.dtype), w1_ref[...],
                preferred_element_type=jnp.float32) + b1_ref[...]
    a = a * jax.nn.sigmoid(1.702 * a)                   # QuickGELU (f32, EUP)
    y = jnp.dot(a.astype(w2_ref.dtype), w2_ref[...],
                preferred_element_type=jnp.float32) + b2_ref[...]
    o_ref[...] = (x + y).astype(o_ref.dtype)


def ln_mlp_res(x, g, b, w1, b1, w2, b2):
    # x: (N, D); w1 (D, Dm) / w2 (Dm, D) bf16; returns x + mlp(ln(x)) in f32.
    N, D = x.shape
    Dm = w1.shape[1]
    TR = _row_tile(N)
    return pl.pallas_call(
        _ln_mlp_res_kernel,
        out_shape=jax.ShapeDtypeStruct((N, D), x.dtype),
        grid=(pl.cdiv(N, TR),),
        in_specs=[
            pl.BlockSpec((TR, D), lambda i: (i, 0)),
            pl.BlockSpec((1, D), lambda i: (0, 0)),
            pl.BlockSpec((1, D), lambda i: (0, 0)),
            pl.BlockSpec((D, Dm), lambda i: (0, 0)),     # resident bf16 weight
            pl.BlockSpec((1, Dm), lambda i: (0, 0)),
            pl.BlockSpec((Dm, D), lambda i: (0, 0)),     # resident bf16 weight
            pl.BlockSpec((1, D), lambda i: (0, 0)),
        ],
        out_specs=pl.BlockSpec((TR, D), lambda i: (i, 0)),
        compiler_params=_cparams(1),
    )(x, g.reshape(1, D), b.reshape(1, D),
      w1, b1.reshape(1, Dm), w2, b2.reshape(1, D))


# ------------------ fused ln_final + text_projection (EOT rows) --------------

def _ln_proj_kernel(x_ref, g_ref, b_ref, w_ref, o_ref):
    x = x_ref[...].astype(jnp.float32)
    h = _layernorm_f32(x, g_ref[...], b_ref[...])
    o_ref[...] = jnp.dot(h.astype(w_ref.dtype), w_ref[...],
                         preferred_element_type=jnp.float32).astype(o_ref.dtype)


def ln_proj(x, g, b, w):
    # x: (B, D) gathered EOT rows; w: (D, E) bf16.
    Bn, D = x.shape
    E = w.shape[1]
    return pl.pallas_call(
        _ln_proj_kernel,
        out_shape=jax.ShapeDtypeStruct((Bn, E), x.dtype),
    )(x, g.reshape(1, D), b.reshape(1, D), w)


# ------------------------------ model (JAX glue) -----------------------------

def _resblock(x, p, causal_bias, n_heads):
    # x: (B, L, D) — one CLIP ResidualAttentionBlock with causal mask.
    B, L, D = x.shape
    qkv = ln_qkv(x.reshape(B * L, D), p["ln1_g"], p["ln1_b"],
                 p["attn_w_in"], p["attn_b_in"])                 # (B*L, 3D) bf16
    qkv = qkv.reshape(B, L, 3 * D)                               # free reshape
    x = attn_block(qkv, x, causal_bias, p["attn_w_out"], p["attn_b_out"], n_heads)
    x = ln_mlp_res(x.reshape(B * L, D), p["ln2_g"], p["ln2_b"],
                   p["mlp_w1"], p["mlp_b1"], p["mlp_w2"], p["mlp_b2"])
    return x.reshape(B, L, D)


def text_encoder_forward(params, prompts, tokenized_prompts, text_ctx, *, n_heads):
    """Matches TextEncoder.forward:
       x = prompts + pos_emb; x = transformer.forward_tpg(x, text_ctx, True);
       x = ln_final(x); x = x[arange(B), tokenized.argmax(-1)] @ text_projection
    """
    B, L, D = prompts.shape
    x = prompts + params["pos_emb"][None].astype(prompts.dtype)

    # TODO(synk): transformer.forward_tpg internals are not part of the given
    # snippet; the text_ctx injection is approximated here as replacing tokens
    # 1..1+n_ctx (right after SOT) with text_ctx before the standard
    # causal-masked CLIP residual attention blocks.
    n_ctx = text_ctx.shape[-2]
    x = x.at[:, 1:1 + n_ctx, :].set(text_ctx.astype(x.dtype))

    # (permute(1,0,2) and its inverse are layout-only; x stays (B, L, D))
    causal_bias = _causal_bias(L)
    for blk in params["blocks"]:
        x = _resblock(x, blk, causal_bias, n_heads)

    # Gather EOT rows BEFORE ln_final (LN is per-row; only B rows are consumed),
    # then run fused ln_final + text_projection on just those rows.
    eot_idx = jnp.argmax(tokenized_prompts, axis=-1)             # (B,)
    x_eot = x[jnp.arange(B), eot_idx]                            # (B, D)
    return ln_proj(x_eot, params["lnf_g"], params["lnf_b"], params["text_proj"])


# -------------------------------- parameters ---------------------------------

def init_params(key, *, D, H, layers, L, E, mlp_ratio=4):
    del H  # head count is passed statically to the forward fn
    Dm = mlp_ratio * D

    def nrm(kk, shape, s=0.02):
        return (s * jax.random.normal(kk, shape)).astype(jnp.float32)

    keys = jax.random.split(key, 2 + layers)
    params = {
        "pos_emb": nrm(keys[0], (L, D), s=0.01),
        "text_proj": nrm(keys[1], (D, E), s=D ** -0.5),
        "lnf_g": jnp.ones((D,), jnp.float32),
        "lnf_b": jnp.zeros((D,), jnp.float32),
        "blocks": [],
    }
    for i in range(layers):
        kk = jax.random.split(keys[2 + i], 4)
        params["blocks"].append({
            "ln1_g": jnp.ones((D,), jnp.float32),
            "ln1_b": jnp.zeros((D,), jnp.float32),
            "ln2_g": jnp.ones((D,), jnp.float32),
            "ln2_b": jnp.zeros((D,), jnp.float32),
            "attn_w_in": nrm(kk[0], (D, 3 * D)),
            "attn_b_in": jnp.zeros((3 * D,), jnp.float32),
            "attn_w_out": nrm(kk[1], (D, D)),
            "attn_b_out": jnp.zeros((D,), jnp.float32),
            "mlp_w1": nrm(kk[2], (D, Dm)),
            "mlp_b1": jnp.zeros((Dm,), jnp.float32),
            "mlp_w2": nrm(kk[3], (Dm, D)),
            "mlp_b2": jnp.zeros((D,), jnp.float32),
        })
    return params


def prepare_params(params, *, n_heads):
    """One-time device prep (run OUTSIDE jit):
       * fold the 1/sqrt(d_head) attention scale into the q-columns of the
         QKV projection (exact, removes an (L,L) VPU multiply per head/step),
       * cast the big matmul weights to bf16 once (no per-call f32->bf16
         convert ops, half the weight HBM traffic).  LN/bias params stay f32.
    """
    # TODO(synk): on v7x the projection weights could be stored as fp8 for the
    # MXU (gated on an accuracy check); kept bf16 here for v5e/v6e parity.
    out = dict(params)
    out["text_proj"] = params["text_proj"].astype(MXU_DTYPE)
    blocks = []
    for p in params["blocks"]:
        q = dict(p)
        D = p["attn_w_out"].shape[0]
        d_head = D // n_heads
        scale = jnp.float32(d_head) ** -0.5
        col_scale = jnp.concatenate(
            [jnp.full((D,), scale, jnp.float32), jnp.ones((2 * D,), jnp.float32)])
        q["attn_w_in"] = (p["attn_w_in"] * col_scale[None, :]).astype(MXU_DTYPE)
        q["attn_b_in"] = (p["attn_b_in"] * col_scale).astype(jnp.float32)
        q["attn_w_out"] = p["attn_w_out"].astype(MXU_DTYPE)
        q["mlp_w1"] = p["mlp_w1"].astype(MXU_DTYPE)
        q["mlp_w2"] = p["mlp_w2"].astype(MXU_DTYPE)
        blocks.append(q)
    out["blocks"] = blocks
    return out


# ----------------------------------- main -------------------------------------

if __name__ == "__main__":
    # Small but hardware-friendly demo shapes: N = B*L = 256, D = 128 lanes,
    # H = 4 heads of 32.  (Real CLIP L=77 etc. works via cdiv/masked tiling.)
    B, L, D, H, LAYERS, E, N_CTX = 8, 32, 128, 4, 2, 128, 4

    root = jax.random.PRNGKey(0)
    kp, k1, k2, k3 = jax.random.split(root, 4)

    params = init_params(kp, D=D, H=H, layers=LAYERS, L=L, E=E)
    params = prepare_params(params, n_heads=H)   # fold q-scale + bf16 weights, once
    prompts = 0.02 * jax.random.normal(k1, (B, L, D), jnp.float32)
    text_ctx = 0.02 * jax.random.normal(k2, (B, N_CTX, D), jnp.float32)
    tokenized_prompts = jax.random.randint(k3, (B, L), 0, 49408).astype(jnp.int32)

    fwd = jax.jit(functools.partial(text_encoder_forward, n_heads=H))
    out = fwd(params, prompts, tokenized_prompts, text_ctx)
    out = jax.block_until_ready(out)

    assert out.shape == (B, E), out.shape
    assert bool(jnp.all(jnp.isfinite(out)))
    print("KERNEL_OK")
</pallas_src>

<mosaic_0001>
module attributes {stable_mosaic.version = 11 : i64} {
  func.func @_ln_qkv_kernel(%arg0: i32, %arg1: memref<128x128xf32, #tpu.memory_space<vmem>>, %arg2: memref<1x128xf32, #tpu.memory_space<vmem>>, %arg3: memref<1x128xf32, #tpu.memory_space<vmem>>, %arg4: memref<128x384xbf16, #tpu.memory_space<vmem>>, %arg5: memref<1x384xf32, #tpu.memory_space<vmem>>, %arg6: memref<128x384xbf16, #tpu.memory_space<vmem>>) attributes {dimension_semantics = [#tpu.dimension_semantics<parallel>], iteration_bounds = array<i64: 2>, scalar_prefetch = 0 : i64, scratch_operands = 0 : i64, tpu.core_type = #tpu.core_type<tc>, window_params = [{transform_indices = @transform_0, window_bounds = array<i64: 128, 128>}, {pipeline_mode = #tpu.pipeline_mode<synchronous>, transform_indices = @transform_1, window_bounds = array<i64: 1, 128>}, {pipeline_mode = #tpu.pipeline_mode<synchronous>, transform_indices = @transform_2, window_bounds = array<i64: 1, 128>}, {pipeline_mode = #tpu.pipeline_mode<synchronous>, transform_indices = @transform_3, window_bounds = array<i64: 128, 384>}, {pipeline_mode = #tpu.pipeline_mode<synchronous>, transform_indices = @transform_4, window_bounds = array<i64: 1, 384>}, {transform_indices = @transform_5, window_bounds = array<i64: 128, 384>}]} {
    %c0 = arith.constant 0 : index
    %c0_0 = arith.constant 0 : index
    %0 = vector.load %arg1[%c0, %c0_0] : memref<128x128xf32, #tpu.memory_space<vmem>>, vector<128x128xf32>
    %c0_1 = arith.constant 0 : index
    %c0_2 = arith.constant 0 : index
    %1 = vector.load %arg2[%c0_1, %c0_2] : memref<1x128xf32, #tpu.memory_space<vmem>>, vector<1x128xf32>
    %c0_3 = arith.constant 0 : index
    %c0_4 = arith.constant 0 : index
    %2 = vector.load %arg3[%c0_3, %c0_4] : memref<1x128xf32, #tpu.memory_space<vmem>>, vector<1x128xf32>
    %cst = arith.constant dense<0.000000e+00> : vector<128xf32>
    %3 = vector.multi_reduction <add>, %0, %cst [1] : vector<128x128xf32> to vector<128xf32>
    %4 = vector.shape_cast %3 : vector<128xf32> to vector<128x1xf32>
    %cst_5 = arith.constant 1.280000e+02 : f32
    %5 = vector.broadcast %cst_5 : f32 to vector<128x1xf32>
    %6 = arith.divf %4, %5 : vector<128x1xf32>
    %7 = vector.broadcast %6 : vector<128x1xf32> to vector<128x128xf32>
    %8 = arith.subf %0, %7 : vector<128x128xf32>
    %9 = arith.mulf %8, %8 : vector<128x128xf32>
    %cst_6 = arith.constant dense<0.000000e+00> : vector<128xf32>
    %10 = vector.multi_reduction <add>, %9, %cst_6 [1] : vector<128x128xf32> to vector<128xf32>
    %11 = vector.shape_cast %10 : vector<128xf32> to vector<128x1xf32>
    %cst_7 = arith.constant 1.280000e+02 : f32
    %12 = vector.broadcast %cst_7 : f32 to vector<128x1xf32>
    %13 = arith.divf %11, %12 : vector<128x1xf32>
    %14 = vector.broadcast %6 : vector<128x1xf32> to vector<128x128xf32>
    %15 = arith.subf %0, %14 : vector<128x128xf32>
    %cst_8 = arith.constant 9.99999974E-6 : f32
    %16 = vector.broadcast %cst_8 : f32 to vector<128x1xf32>
    %17 = arith.addf %13, %16 : vector<128x1xf32>
    %18 = math.rsqrt %17 : vector<128x1xf32>
    %19 = vector.broadcast %18 : vector<128x1xf32> to vector<128x128xf32>
    %20 = arith.mulf %15, %19 : vector<128x128xf32>
    %21 = vector.broadcast %1 : vector<1x128xf32> to vector<128x128xf32>
    %22 = arith.mulf %20, %21 : vector<128x128xf32>
    %23 = vector.broadcast %2 : vector<1x128xf32> to vector<128x128xf32>
    %24 = arith.addf %22, %23 : vector<128x128xf32>
    %25 = arith.truncf %24 : vector<128x128xf32> to vector<128x128xbf16>
    %c0_9 = arith.constant 0 : index
    %c0_10 = arith.constant 0 : index
    %26 = vector.load %arg4[%c0_9, %c0_10] : memref<128x384xbf16, #tpu.memory_space<vmem>>, vector<128x384xbf16>
    %cst_11 = arith.constant dense<0.000000e+00> : vector<128x384xf32>
    %27 = tpu.matmul %25, %26, %cst_11 {dimension_numbers = #tpu.dot_dimension_numbers<[1], [0], [0], [1], [0, 0, 1, 1], [], []>} : vector<128x128xbf16>, vector<128x384xbf16>, vector<128x384xf32> -> vector<128x384xf32>
    %c0_12 = arith.constant 0 : index
    %c0_13 = arith.constant 0 : index
    %28 = vector.load %arg5[%c0_12, %c0_13] : memref<1x384xf32, #tpu.memory_space<vmem>>, vector<1x384xf32>
    %29 = vector.broadcast %28 : vector<1x384xf32> to vector<128x384xf32>
    %30 = arith.addf %27, %29 : vector<128x384xf32>
    %31 = arith.truncf %30 : vector<128x384xf32> to vector<128x384xbf16>
    %c0_14 = arith.constant 0 : index
    %c0_15 = arith.constant 0 : index
    %32 = vector.load %arg6[%c0_14, %c0_15] : memref<128x384xbf16, #tpu.memory_space<vmem>>, vector<128x384xbf16>
    tpu.vector_store %arg6[%c0_14, %c0_15], %31 {strides = array<i32>} : memref<128x384xbf16, #tpu.memory_space<vmem>>, vector<128x384xbf16>,
    return
  }
  func.func @transform_0(%arg0: i32) -> (i32, i32) {
    %c0_i32 = arith.constant 0 : i32
    %c0_i32_0 = arith.constant 0 : i32
    return %arg0, %c0_i32 : i32, i32
  }
  func.func @transform_1(%arg0: i32) -> (i32, i32) {
    %c0_i32 = arith.constant 0 : i32
    %c0_i32_0 = arith.constant 0 : i32
    %c0_i32_1 = arith.constant 0 : i32
    return %c0_i32, %c0_i32_0 : i32, i32
  }
  func.func @transform_2(%arg0: i32) -> (i32, i32) {
    %c0_i32 = arith.constant 0 : i32
    %c0_i32_0 = arith.constant 0 : i32
    %c0_i32_1 = arith.constant 0 : i32
    return %c0_i32, %c0_i32_0 : i32, i32
  }
  func.func @transform_3(%arg0: i32) -> (i32, i32) {
    %c0_i32 = arith.constant 0 : i32
    %c0_i32_0 = arith.constant 0 : i32
    %c0_i32_1 = arith.constant 0 : i32
    return %c0_i32, %c0_i32_0 : i32, i32
  }
  func.func @transform_4(%arg0: i32) -> (i32, i32) {
    %c0_i32 = arith.constant 0 : i32
    %c0_i32_0 = arith.constant 0 : i32
    %c0_i32_1 = arith.constant 0 : i32
    return %c0_i32, %c0_i32_0 : i32, i32
  }
  func.func @transform_5(%arg0: i32) -> (i32, i32) {
    %c0_i32 = arith.constant 0 : i32
    %c0_i32_0 = arith.constant 0 : i32
    return %arg0, %c0_i32 : i32, i32
  }
}

module attributes {stable_mosaic.version = 11 : i64} {
  func.func @_attn_block_kernel(%arg0: i32, %arg1: memref<4x32x384xbf16, #tpu.memory_space<vmem>>, %arg2: memref<4x32x128xf32, #tpu.memory_space<vmem>>, %arg3: memref<32x32xf32, #tpu.memory_space<vmem>>, %arg4: memref<128x128xbf16, #tpu.memory_space<vmem>>, %arg5: memref<1x128xf32, #tpu.memory_space<vmem>>, %arg6: memref<4x32x128xf32, #tpu.memory_space<vmem>>) attributes {dimension_semantics = [#tpu.dimension_semantics<parallel>], iteration_bounds = array<i64: 2>, scalar_prefetch = 0 : i64, scratch_operands = 0 : i64, tpu.core_type = #tpu.core_type<tc>, window_params = [{transform_indices = @transform_0, window_bounds = array<i64: 4, 32, 384>}, {transform_indices = @transform_1, window_bounds = array<i64: 4, 32, 128>}, {pipeline_mode = #tpu.pipeline_mode<synchronous>, transform_indices = @transform_2, window_bounds = array<i64: 32, 32>}, {pipeline_mode = #tpu.pipeline_mode<synchronous>, transform_indices = @transform_3, window_bounds = array<i64: 128, 128>}, {pipeline_mode = #tpu.pipeline_mode<synchronous>, transform_indices = @transform_4, window_bounds = array<i64: 1, 128>}, {transform_indices = @transform_5, window_bounds = array<i64: 4, 32, 128>}]} {
    %c0 = arith.constant 0 : index
    %c0_0 = arith.constant 0 : index
    %c0_1 = arith.constant 0 : index
    %0 = vector.load %arg1[%c0, %c0_0, %c0_1] : memref<4x32x384xbf16, #tpu.memory_space<vmem>>, vector<4x32x384xbf16>
    %c0_2 = arith.constant 0 : index
    %c0_3 = arith.constant 0 : index
    %1 = vector.load %arg3[%c0_2, %c0_3] : memref<32x32xf32, #tpu.memory_space<vmem>>, vector<32x32xf32>
    %c0_4 = arith.constant 0 : index
    %c0_5 = arith.constant 0 : index
    %2 = vector.load %arg4[%c0_4, %c0_5] : memref<128x128xbf16, #tpu.memory_space<vmem>>, vector<128x128xbf16>
    %cst = arith.constant 0.000000e+00 : f32
    %3 = vector.broadcast %cst : f32 to vector<4x32x128xf32>
    %4 = vector.extract_strided_slice %0 {offsets = [0, 0, 0], sizes = [4, 32, 32], strides = [1, 1, 1]} : vector<4x32x384xbf16> to vector<4x32x32xbf16>
    %5 = vector.extract_strided_slice %0 {offsets = [0, 0, 128], sizes = [4, 32, 32], strides = [1, 1, 1]} : vector<4x32x384xbf16> to vector<4x32x32xbf16>
    %6 = vector.extract_strided_slice %0 {offsets = [0, 0, 256], sizes = [4, 32, 32], strides = [1, 1, 1]} : vector<4x32x384xbf16> to vector<4x32x32xbf16>
    %cst_6 = arith.constant dense<0.000000e+00> : vector<4x32x32xf32>
    %7 = tpu.matmul %4, %5, %cst_6 {dimension_numbers = #tpu.dot_dimension_numbers<[2], [2], [1], [1], [0, 0, 0, 1, 1, 1], [0], [0]>} : vector<4x32x32xbf16>, vector<4x32x32xbf16>, vector<4x32x32xf32> -> vector<4x32x32xf32>
    %8 = vector.shape_cast %1 : vector<32x32xf32> to vector<1x32x32xf32>
    %9 = vector.broadcast %8 : vector<1x32x32xf32> to vector<4x32x32xf32>
    %10 = arith.addf %7, %9 : vector<4x32x32xf32>
    %cst_7 = arith.constant dense<0xFF800000> : vector<4x32xf32>
    %11 = vector.multi_reduction <maximumf>, %10, %cst_7 [2] : vector<4x32x32xf32> to vector<4x32xf32>
    %12 = vector.shape_cast %11 : vector<4x32xf32> to vector<4x32x1xf32>
    %13 = vector.broadcast %12 : vector<4x32x1xf32> to vector<4x32x32xf32>
    %14 = arith.subf %10, %13 : vector<4x32x32xf32>
    %15 = math.exp %14 : vector<4x32x32xf32>
    %cst_8 = arith.constant dense<0.000000e+00> : vector<4x32xf32>
    %16 = vector.multi_reduction <add>, %15, %cst_8 [2] : vector<4x32x32xf32> to vector<4x32xf32>
    %17 = vector.shape_cast %16 : vector<4x32xf32> to vector<4x32x1xf32>
    %18 = tpu.reciprocal %17 {approx = true} : vector<4x32x1xf32> -> vector<4x32x1xf32>
    %19 = vector.broadcast %18 : vector<4x32x1xf32> to vector<4x32x32xf32>
    %20 = arith.mulf %15, %19 : vector<4x32x32xf32>
    %21 = arith.truncf %20 : vector<4x32x32xf32> to vector<4x32x32xbf16>
    %cst_9 = arith.constant dense<0.000000e+00> : vector<4x32x32xf32>
    %22 = tpu.matmul %21, %6, %cst_9 {dimension_numbers = #tpu.dot_dimension_numbers<[2], [1], [1], [2], [0, 0, 0, 1, 1, 2], [0], [0]>} : vector<4x32x32xbf16>, vector<4x32x32xbf16>, vector<4x32x32xf32> -> vector<4x32x32xf32>
    %23 = arith.truncf %22 : vector<4x32x32xf32> to vector<4x32x32xbf16>
    %24 = vector.extract_strided_slice %2 {offsets = [0, 0], sizes = [32, 128], strides = [1, 1]} : vector<128x128xbf16> to vector<32x128xbf16>
    %cst_10 = arith.constant dense<0.000000e+00> : vector<4x32x128xf32>
    %25 = tpu.matmul %23, %24, %cst_10 {dimension_numbers = #tpu.dot_dimension_numbers<[2], [0], [0, 1], [1], [0, 0, 0, 1, 1, 1], [], []>} : vector<4x32x32xbf16>, vector<32x128xbf16>, vector<4x32x128xf32> -> vector<4x32x128xf32>
    %26 = arith.addf %3, %25 : vector<4x32x128xf32>
    %27 = vector.extract_strided_slice %0 {offsets = [0, 0, 32], sizes = [4, 32, 32], strides = [1, 1, 1]} : vector<4x32x384xbf16> to vector<4x32x32xbf16>
    %28 = vector.extract_strided_slice %0 {offsets = [0, 0, 160], sizes = [4, 32, 32], strides = [1, 1, 1]} : vector<4x32x384xbf16> to vector<4x32x32xbf16>
    %29 = vector.extract_strided_slice %0 {offsets = [0, 0, 288], sizes = [4, 32, 32], strides = [1, 1, 1]} : vector<4x32x384xbf16> to vector<4x32x32xbf16>
    %cst_11 = arith.constant dense<0.000000e+00> : vector<4x32x32xf32>
    %30 = tpu.matmul %27, %28, %cst_11 {dimension_numbers = #tpu.dot_dimension_numbers<[2], [2], [1], [1], [0, 0, 0, 1, 1, 1], [0], [0]>} : vector<4x32x32xbf16>, vector<4x32x32xbf16>, vector<4x32x32xf32> -> vector<4x32x32xf32>
    %31 = vector.shape_cast %1 : vector<32x32xf32> to vector<1x32x32xf32>
    %32 = vector.broadcast %31 : vector<1x32x32xf32> to vector<4x32x32xf32>
    %33 = arith.addf %30, %32 : vector<4x32x32xf32>
    %cst_12 = arith.constant dense<0xFF800000> : vector<4x32xf32>
    %34 = vector.multi_reduction <maximumf>, %33, %cst_12 [2] : vector<4x32x32xf32> to vector<4x32xf32>
    %35 = vector.shape_cast %34 : vector<4x32xf32> to vector<4x32x1xf32>
    %36 = vector.broadcast %35 : vector<4x32x1xf32> to vector<4x32x32xf32>
    %37 = arith.subf %33, %36 : vector<4x32x32xf32>
    %38 = math.exp %37 : vector<4x32x32xf32>
    %cst_13 = arith.constant dense<0.000000e+00> : vector<4x32xf32>
    %39 = vector.multi_reduction <add>, %38, %cst_13 [2] : vector<4x32x32xf32> to vector<4x32xf32>
    %40 = vector.shape_cast %39 : vector<4x32xf32> to vector<4x32x1xf32>
    %41 = tpu.reciprocal %40 {approx = true} : vector<4x32x1xf32> -> vector<4x32x1xf32>
    %42 = vector.broadcast %41 : vector<4x32x1xf32> to vector<4x32x32xf32>
    %43 = arith.mulf %38, %42 : vector<4x32x32xf32>
    %44 = arith.truncf %43 : vector<4x32x32xf32> to vector<4x32x32xbf16>
    %cst_14 = arith.constant dense<0.000000e+00> : vector<4x32x32xf32>
    %45 = tpu.matmul %44, %29, %cst_14 {dimension_numbers = #tpu.dot_dimension_numbers<[2], [1], [1], [2], [0, 0, 0, 1, 1, 2], [0], [0]>} : vector<4x32x32xbf16>, vector<4x32x32xbf16>, vector<4x32x32xf32> -> vector<4x32x32xf32>
    %46 = arith.truncf %45 : vector<4x32x32xf32> to vector<4x32x32xbf16>
    %47 = vector.extract_strided_slice %2 {offsets = [32, 0], sizes = [32, 128], strides = [1, 1]} : vector<128x128xbf16> to vector<32x128xbf16>
    %cst_15 = arith.constant dense<0.000000e+00> : vector<4x32x128xf32>
    %48 = tpu.matmul %46, %47, %cst_15 {dimension_numbers = #tpu.dot_dimension_numbers<[2], [0], [0, 1], [1], [0, 0, 0, 1, 1, 1], [], []>} : vector<4x32x32xbf16>, vector<32x128xbf16>, vector<4x32x128xf32> -> vector<4x32x128xf32>
    %49 = arith.addf %26, %48 : vector<4x32x128xf32>
    %50 = vector.extract_strided_slice %0 {offsets = [0, 0, 64], sizes = [4, 32, 32], strides = [1, 1, 1]} : vector<4x32x384xbf16> to vector<4x32x32xbf16>
    %51 = vector.extract_strided_slice %0 {offsets = [0, 0, 192], sizes = [4, 32, 32], strides = [1, 1, 1]} : vector<4x32x384xbf16> to vector<4x32x32xbf16>
    %52 = vector.extract_strided_slice %0 {offsets = [0, 0, 320], sizes = [4, 32, 32], strides = [1, 1, 1]} : vector<4x32x384xbf16> to vector<4x32x32xbf16>
    %cst_16 = arith.constant dense<0.000000e+00> : vector<4x32x32xf32>
    %53 = tpu.matmul %50, %51, %cst_16 {dimension_numbers = #tpu.dot_dimension_numbers<[2], [2], [1], [1], [0, 0, 0, 1, 1, 1], [0], [0]>} : vector<4x32x32xbf16>, vector<4x32x32xbf16>, vector<4x32x32xf32> -> vector<4x32x32xf32>
    %54 = vector.shape_cast %1 : vector<32x32xf32> to vector<1x32x32xf32>
    %55 = vector.broadcast %54 : vector<1x32x32xf32> to vector<4x32x32xf32>
    %56 = arith.addf %53, %55 : vector<4x32x32xf32>
    %cst_17 = arith.constant dense<0xFF800000> : vector<4x32xf32>
    %57 = vector.multi_reduction <maximumf>, %56, %cst_17 [2] : vector<4x32x32xf32> to vector<4x32xf32>
    %58 = vector.shape_cast %57 : vector<4x32xf32> to vector<4x32x1xf32>
    %59 = vector.broadcast %58 : vector<4x32x1xf32> to vector<4x32x32xf32>
    %60 = arith.subf %56, %59 : vector<4x32x32xf32>
    %61 = math.exp %60 : vector<4x32x32xf32>
    %cst_18 = arith.constant dense<0.000000e+00> : vector<4x32xf32>
    %62 = vector.multi_reduction <add>, %61, %cst_18 [2] : vector<4x32x32xf32> to vector<4x32xf32>
    %63 = vector.shape_cast %62 : vector<4x32xf32> to vector<4x32x1xf32>
    %64 = tpu.reciprocal %63 {approx = true} : vector<4x32x1xf32> -> vector<4x32x1xf32>
    %65 = vector.broadcast %64 : vector<4x32x1xf32> to vector<4x32x32xf32>
    %66 = arith.mulf %61, %65 : vector<4x32x32xf32>
    %67 = arith.truncf %66 : vector<4x32x32xf32> to vector<4x32x32xbf16>
    %cst_19 = arith.constant dense<0.000000e+00> : vector<4x32x32xf32>
    %68 = tpu.matmul %67, %52, %cst_19 {dimension_numbers = #tpu.dot_dimension_numbers<[2], [1], [1], [2], [0, 0, 0, 1, 1, 2], [0], [0]>} : vector<4x32x32xbf16>, vector<4x32x32xbf16>, vector<4x32x32xf32> -> vector<4x32x32xf32>
    %69 = arith.truncf %68 : vector<4x32x32xf32> to vector<4x32x32xbf16>
    %70 = vector.extract_strided_slice %2 {offsets = [64, 0], sizes = [32, 128], strides = [1, 1]} : vector<128x128xbf16> to vector<32x128xbf16>
    %cst_20 = arith.constant dense<0.000000e+00> : vector<4x32x128xf32>
    %71 = tpu.matmul %69, %70, %cst_20 {dimension_numbers = #tpu.dot_dimension_numbers<[2], [0], [0, 1], [1], [0, 0, 0, 1, 1, 1], [], []>} : vector<4x32x32xbf16>, vector<32x128xbf16>, vector<4x32x128xf32> -> vector<4x32x128xf32>
    %72 = arith.addf %49, %71 : vector<4x32x128xf32>
    %73 = vector.extract_strided_slice %0 {offsets = [0, 0, 96], sizes = [4, 32, 32], strides = [1, 1, 1]} : vector<4x32x384xbf16> to vector<4x32x32xbf16>
    %74 = vector.extract_strided_slice %0 {offsets = [0, 0, 224], sizes = [4, 32, 32], strides = [1, 1, 1]} : vector<4x32x384xbf16> to vector<4x32x32xbf16>
    %75 = vector.extract_strided_slice %0 {offsets = [0, 0, 352], sizes = [4, 32, 32], strides = [1, 1, 1]} : vector<4x32x384xbf16> to vector<4x32x32xbf16>
    %cst_21 = arith.constant dense<0.000000e+00> : vector<4x32x32xf32>
    %76 = tpu.matmul %73, %74, %cst_21 {dimension_numbers = #tpu.dot_dimension_numbers<[2], [2], [1], [1], [0, 0, 0, 1, 1, 1], [0], [0]>} : vector<4x32x32xbf16>, vector<4x32x32xbf16>, vector<4x32x32xf32> -> vector<4x32x32xf32>
    %77 = vector.shape_cast %1 : vector<32x32xf32> to vector<1x32x32xf32>
    %78 = vector.broadcast %77 : vector<1x32x32xf32> to vector<4x32x32xf32>
    %79 = arith.addf %76, %78 : vector<4x32x32xf32>
    %cst_22 = arith.constant dense<0xFF800000> : vector<4x32xf32>
    %80 = vector.multi_reduction <maximumf>, %79, %cst_22 [2] : vector<4x32x32xf32> to vector<4x32xf32>
    %81 = vector.shape_cast %80 : vector<4x32xf32> to vector<4x32x1xf32>
    %82 = vector.broadcast %81 : vector<4x32x1xf32> to vector<4x32x32xf32>
    %83 = arith.subf %79, %82 : vector<4x32x32xf32>
    %84 = math.exp %83 : vector<4x32x32xf32>
    %cst_23 = arith.constant dense<0.000000e+00> : vector<4x32xf32>
    %85 = vector.multi_reduction <add>, %84, %cst_23 [2] : vector<4x32x32xf32> to vector<4x32xf32>
    %86 = vector.shape_cast %85 : vector<4x32xf32> to vector<4x32x1xf32>
    %87 = tpu.reciprocal %86 {approx = true} : vector<4x32x1xf32> -> vector<4x32x1xf32>
    %88 = vector.broadcast %87 : vector<4x32x1xf32> to vector<4x32x32xf32>
    %89 = arith.mulf %84, %88 : vector<4x32x32xf32>
    %90 = arith.truncf %89 : vector<4x32x32xf32> to vector<4x32x32xbf16>
    %cst_24 = arith.constant dense<0.000000e+00> : vector<4x32x32xf32>
    %91 = tpu.matmul %90, %75, %cst_24 {dimension_numbers = #tpu.dot_dimension_numbers<[2], [1], [1], [2], [0, 0, 0, 1, 1, 2], [0], [0]>} : vector<4x32x32xbf16>, vector<4x32x32xbf16>, vector<4x32x32xf32> -> vector<4x32x32xf32>
    %92 = arith.truncf %91 : vector<4x32x32xf32> to vector<4x32x32xbf16>
    %93 = vector.extract_strided_slice %2 {offsets = [96, 0], sizes = [32, 128], strides = [1, 1]} : vector<128x128xbf16> to vector<32x128xbf16>
    %cst_25 = arith.constant dense<0.000000e+00> : vector<4x32x128xf32>
    %94 = tpu.matmul %92, %93, %cst_25 {dimension_numbers = #tpu.dot_dimension_numbers<[2], [0], [0, 1], [1], [0, 0, 0, 1, 1, 1], [], []>} : vector<4x32x32xbf16>, vector<32x128xbf16>, vector<4x32x128xf32> -> vector<4x32x128xf32>
    %95 = arith.addf %72, %94 : vector<4x32x128xf32>
    %c0_26 = arith.constant 0 : index
    %c0_27 = arith.constant 0 : index
    %96 = vector.load %arg5[%c0_26, %c0_27] : memref<1x128xf32, #tpu.memory_space<vmem>>, vector<1x128xf32>
    %97 = vector.shape_cast %96 : vector<1x128xf32> to vector<1x1x128xf32>
    %98 = vector.broadcast %97 : vector<1x1x128xf32> to vector<4x32x128xf32>
    %99 = arith.addf %95, %98 : vector<4x32x128xf32>
    %c0_28 = arith.constant 0 : index
    %c0_29 = arith.constant 0 : index
    %c0_30 = arith.constant 0 : index
    %100 = vector.load %arg2[%c0_28, %c0_29, %c0_30] : memref<4x32x128xf32, #tpu.memory_space<vmem>>, vector<4x32x128xf32>
    %101 = arith.addf %100, %99 : vector<4x32x128xf32>
    %c0_31 = arith.constant 0 : index
    %c0_32 = arith.constant 0 : index
    %c0_33 = arith.constant 0 : index
    %102 = vector.load %arg6[%c0_31, %c0_32, %c0_33] : memref<4x32x128xf32, #tpu.memory_space<vmem>>, vector<4x32x128xf32>
    tpu.vector_store %arg6[%c0_31, %c0_32, %c0_33], %101 {strides = array<i32>} : memref<4x32x128xf32, #tpu.memory_space<vmem>>, vector<4x32x128xf32>,
    return
  }
  func.func @transform_0(%arg0: i32) -> (i32, i32, i32) {
    %c0_i32 = arith.constant 0 : i32
    %c0_i32_0 = arith.constant 0 : i32
    %c0_i32_1 = arith.constant 0 : i32
    return %arg0, %c0_i32, %c0_i32_0 : i32, i32, i32
  }
  func.func @transform_1(%arg0: i32) -> (i32, i32, i32) {
    %c0_i32 = arith.constant 0 : i32
    %c0_i32_0 = arith.constant 0 : i32
    %c0_i32_1 = arith.constant 0 : i32
    return %arg0, %c0_i32, %c0_i32_0 : i32, i32, i32
  }
  func.func @transform_2(%arg0: i32) -> (i32, i32) {
    %c0_i32 = arith.constant 0 : i32
    %c0_i32_0 = arith.constant 0 : i32
    %c0_i32_1 = arith.constant 0 : i32
    return %c0_i32, %c0_i32_0 : i32, i32
  }
  func.func @transform_3(%arg0: i32) -> (i32, i32) {
    %c0_i32 = arith.constant 0 : i32
    %c0_i32_0 = arith.constant 0 : i32
    %c0_i32_1 = arith.constant 0 : i32
    return %c0_i32, %c0_i32_0 : i32, i32
  }
  func.func @transform_4(%arg0: i32) -> (i32, i32) {
    %c0_i32 = arith.constant 0 : i32
    %c0_i32_0 = arith.constant 0 : i32
    %c0_i32_1 = arith.constant 0 : i32
    return %c0_i32, %c0_i32_0 : i32, i32
  }
  func.func @transform_5(%arg0: i32) -> (i32, i32, i32) {
    %c0_i32 = arith.constant 0 : i32
    %c0_i32_0 = arith.constant 0 : i32
    %c0_i32_1 = arith.constant 0 : i32
    return %arg0, %c0_i32, %c0_i32_0 : i32, i32, i32
  }
}

module attributes {stable_mosaic.version = 11 : i64} {
  func.func @_ln_mlp_res_kernel(%arg0: i32, %arg1: memref<128x128xf32, #tpu.memory_space<vmem>>, %arg2: memref<1x128xf32, #tpu.memory_space<vmem>>, %arg3: memref<1x128xf32, #tpu.memory_space<vmem>>, %arg4: memref<128x512xbf16, #tpu.memory_space<vmem>>, %arg5: memref<1x512xf32, #tpu.memory_space<vmem>>, %arg6: memref<512x128xbf16, #tpu.memory_space<vmem>>, %arg7: memref<1x128xf32, #tpu.memory_space<vmem>>, %arg8: memref<128x128xf32, #tpu.memory_space<vmem>>) attributes {dimension_semantics = [#tpu.dimension_semantics<parallel>], iteration_bounds = array<i64: 2>, scalar_prefetch = 0 : i64, scratch_operands = 0 : i64, tpu.core_type = #tpu.core_type<tc>, window_params = [{transform_indices = @transform_0, window_bounds = array<i64: 128, 128>}, {pipeline_mode = #tpu.pipeline_mode<synchronous>, transform_indices = @transform_1, window_bounds = array<i64: 1, 128>}, {pipeline_mode = #tpu.pipeline_mode<synchronous>, transform_indices = @transform_2, window_bounds = array<i64: 1, 128>}, {pipeline_mode = #tpu.pipeline_mode<synchronous>, transform_indices = @transform_3, window_bounds = array<i64: 128, 512>}, {pipeline_mode = #tpu.pipeline_mode<synchronous>, transform_indices = @transform_4, window_bounds = array<i64: 1, 512>}, {pipeline_mode = #tpu.pipeline_mode<synchronous>, transform_indices = @transform_5, window_bounds = array<i64: 512, 128>}, {pipeline_mode = #tpu.pipeline_mode<synchronous>, transform_indices = @transform_6, window_bounds = array<i64: 1, 128>}, {transform_indices = @transform_7, window_bounds = array<i64: 128, 128>}]} {
    %c0 = arith.constant 0 : index
    %c0_0 = arith.constant 0 : index
    %0 = vector.load %arg1[%c0, %c0_0] : memref<128x128xf32, #tpu.memory_space<vmem>>, vector<128x128xf32>
    %c0_1 = arith.constant 0 : index
    %c0_2 = arith.constant 0 : index
    %1 = vector.load %arg2[%c0_1, %c0_2] : memref<1x128xf32, #tpu.memory_space<vmem>>, vector<1x128xf32>
    %c0_3 = arith.constant 0 : index
    %c0_4 = arith.constant 0 : index
    %2 = vector.load %arg3[%c0_3, %c0_4] : memref<1x128xf32, #tpu.memory_space<vmem>>, vector<1x128xf32>
    %cst = arith.constant dense<0.000000e+00> : vector<128xf32>
    %3 = vector.multi_reduction <add>, %0, %cst [1] : vector<128x128xf32> to vector<128xf32>
    %4 = vector.shape_cast %3 : vector<128xf32> to vector<128x1xf32>
    %cst_5 = arith.constant 1.280000e+02 : f32
    %5 = vector.broadcast %cst_5 : f32 to vector<128x1xf32>
    %6 = arith.divf %4, %5 : vector<128x1xf32>
    %7 = vector.broadcast %6 : vector<128x1xf32> to vector<128x128xf32>
    %8 = arith.subf %0, %7 : vector<128x128xf32>
    %9 = arith.mulf %8, %8 : vector<128x128xf32>
    %cst_6 = arith.constant dense<0.000000e+00> : vector<128xf32>
    %10 = vector.multi_reduction <add>, %9, %cst_6 [1] : vector<128x128xf32> to vector<128xf32>
    %11 = vector.shape_cast %10 : vector<128xf32> to vector<128x1xf32>
    %cst_7 = arith.constant 1.280000e+02 : f32
    %12 = vector.broadcast %cst_7 : f32 to vector<128x1xf32>
    %13 = arith.divf %11, %12 : vector<128x1xf32>
    %14 = vector.broadcast %6 : vector<128x1xf32> to vector<128x128xf32>
    %15 = arith.subf %0, %14 : vector<128x128xf32>
    %cst_8 = arith.constant 9.99999974E-6 : f32
    %16 = vector.broadcast %cst_8 : f32 to vector<128x1xf32>
    %17 = arith.addf %13, %16 : vector<128x1xf32>
    %18 = math.rsqrt %17 : vector<128x1xf32>
    %19 = vector.broadcast %18 : vector<128x1xf32> to vector<128x128xf32>
    %20 = arith.mulf %15, %19 : vector<128x128xf32>
    %21 = vector.broadcast %1 : vector<1x128xf32> to vector<128x128xf32>
    %22 = arith.mulf %20, %21 : vector<128x128xf32>
    %23 = vector.broadcast %2 : vector<1x128xf32> to vector<128x128xf32>
    %24 = arith.addf %22, %23 : vector<128x128xf32>
    %25 = arith.truncf %24 : vector<128x128xf32> to vector<128x128xbf16>
    %c0_9 = arith.constant 0 : index
    %c0_10 = arith.constant 0 : index
    %26 = vector.load %arg4[%c0_9, %c0_10] : memref<128x512xbf16, #tpu.memory_space<vmem>>, vector<128x512xbf16>
    %cst_11 = arith.constant dense<0.000000e+00> : vector<128x512xf32>
    %27 = tpu.matmul %25, %26, %cst_11 {dimension_numbers = #tpu.dot_dimension_numbers<[1], [0], [0], [1], [0, 0, 1, 1], [], []>} : vector<128x128xbf16>, vector<128x512xbf16>, vector<128x512xf32> -> vector<128x512xf32>
    %c0_12 = arith.constant 0 : index
    %c0_13 = arith.constant 0 : index
    %28 = vector.load %arg5[%c0_12, %c0_13] : memref<1x512xf32, #tpu.memory_space<vmem>>, vector<1x512xf32>
    %29 = vector.broadcast %28 : vector<1x512xf32> to vector<128x512xf32>
    %30 = arith.addf %27, %29 : vector<128x512xf32>
    %cst_14 = arith.constant 1.702000e+00 : f32
    %31 = vector.broadcast %cst_14 : f32 to vector<128x512xf32>
    %32 = arith.mulf %31, %30 : vector<128x512xf32>
    %33 = arith.negf %32 : vector<128x512xf32>
    %34 = math.exp %33 : vector<128x512xf32>
    %cst_15 = arith.constant 1.000000e+00 : f32
    %35 = vector.broadcast %cst_15 : f32 to vector<128x512xf32>
    %36 = arith.addf %35, %34 : vector<128x512xf32>
    %37 = arith.divf %35, %36 : vector<128x512xf32>
    %38 = arith.mulf %30, %37 : vector<128x512xf32>
    %39 = arith.truncf %38 : vector<128x512xf32> to vector<128x512xbf16>
    %c0_16 = arith.constant 0 : index
    %c0_17 = arith.constant 0 : index
    %40 = vector.load %arg6[%c0_16, %c0_17] : memref<512x128xbf16, #tpu.memory_space<vmem>>, vector<512x128xbf16>
    %cst_18 = arith.constant dense<0.000000e+00> : vector<128x128xf32>
    %41 = tpu.matmul %39, %40, %cst_18 {dimension_numbers = #tpu.dot_dimension_numbers<[1], [0], [0], [1], [0, 0, 1, 1], [], []>} : vector<128x512xbf16>, vector<512x128xbf16>, vector<128x128xf32> -> vector<128x128xf32>
    %c0_19 = arith.constant 0 : index
    %c0_20 = arith.constant 0 : index
    %42 = vector.load %arg7[%c0_19, %c0_20] : memref<1x128xf32, #tpu.memory_space<vmem>>, vector<1x128xf32>
    %43 = vector.broadcast %42 : vector<1x128xf32> to vector<128x128xf32>
    %44 = arith.addf %41, %43 : vector<128x128xf32>
    %45 = arith.addf %0, %44 : vector<128x128xf32>
    %c0_21 = arith.constant 0 : index
    %c0_22 = arith.constant 0 : index
    %46 = vector.load %arg8[%c0_21, %c0_22] : memref<128x128xf32, #tpu.memory_space<vmem>>, vector<128x128xf32>
    tpu.vector_store %arg8[%c0_21, %c0_22], %45 {strides = array<i32>} : memref<128x128xf32, #tpu.memory_space<vmem>>, vector<128x128xf32>,
    return
  }
  func.func @transform_0(%arg0: i32) -> (i32, i32) {
    %c0_i32 = arith.constant 0 : i32
    %c0_i32_0 = arith.constant 0 : i32
    return %arg0, %c0_i32 : i32, i32
  }
  func.func @transform_1(%arg0: i32) -> (i32, i32) {
    %c0_i32 = arith.constant 0 : i32
    %c0_i32_0 = arith.constant 0 : i32
    %c0_i32_1 = arith.constant 0 : i32
    return %c0_i32, %c0_i32_0 : i32, i32
  }
  func.func @transform_2(%arg0: i32) -> (i32, i32) {
    %c0_i32 = arith.constant 0 : i32
    %c0_i32_0 = arith.constant 0 : i32
    %c0_i32_1 = arith.constant 0 : i32
    return %c0_i32, %c0_i32_0 : i32, i32
  }
  func.func @transform_3(%arg0: i32) -> (i32, i32) {
    %c0_i32 = arith.constant 0 : i32
    %c0_i32_0 = arith.constant 0 : i32
    %c0_i32_1 = arith.constant 0 : i32
    return %c0_i32, %c0_i32_0 : i32, i32
  }
  func.func @transform_4(%arg0: i32) -> (i32, i32) {
    %c0_i32 = arith.constant 0 : i32
    %c0_i32_0 = arith.constant 0 : i32
    %c0_i32_1 = arith.constant 0 : i32
    return %c0_i32, %c0_i32_0 : i32, i32
  }
  func.func @transform_5(%arg0: i32) -> (i32, i32) {
    %c0_i32 = arith.constant 0 : i32
    %c0_i32_0 = arith.constant 0 : i32
    %c0_i32_1 = arith.constant 0 : i32
    return %c0_i32, %c0_i32_0 : i32, i32
  }
  func.func @transform_6(%arg0: i32) -> (i32, i32) {
    %c0_i32 = arith.constant 0 : i32
    %c0_i32_0 = arith.constant 0 : i32
    %c0_i32_1 = arith.constant 0 : i32
    return %c0_i32, %c0_i32_0 : i32, i32
  }
  func.func @transform_7(%arg0: i32) -> (i32, i32) {
    %c0_i32 = arith.constant 0 : i32
    %c0_i32_0 = arith.constant 0 : i32
    return %arg0, %c0_i32 : i32, i32
  }
}

module attributes {stable_mosaic.version = 11 : i64} {
  func.func @_ln_proj_kernel(%arg0: memref<8x128xf32, #tpu.memory_space<vmem>>, %arg1: memref<1x128xf32, #tpu.memory_space<vmem>>, %arg2: memref<1x128xf32, #tpu.memory_space<vmem>>, %arg3: memref<128x128xbf16, #tpu.memory_space<vmem>>, %arg4: memref<8x128xf32, #tpu.memory_space<vmem>>) attributes {dimension_semantics = [], scalar_prefetch = 0 : i64, scratch_operands = 0 : i64, tpu.core_type = #tpu.core_type<tc>} {
    %c0 = arith.constant 0 : index
    %c0_0 = arith.constant 0 : index
    %0 = vector.load %arg0[%c0, %c0_0] : memref<8x128xf32, #tpu.memory_space<vmem>>, vector<8x128xf32>
    %c0_1 = arith.constant 0 : index
    %c0_2 = arith.constant 0 : index
    %1 = vector.load %arg1[%c0_1, %c0_2] : memref<1x128xf32, #tpu.memory_space<vmem>>, vector<1x128xf32>
    %c0_3 = arith.constant 0 : index
    %c0_4 = arith.constant 0 : index
    %2 = vector.load %arg2[%c0_3, %c0_4] : memref<1x128xf32, #tpu.memory_space<vmem>>, vector<1x128xf32>
    %cst = arith.constant dense<0.000000e+00> : vector<8xf32>
    %3 = vector.multi_reduction <add>, %0, %cst [1] : vector<8x128xf32> to vector<8xf32>
    %4 = vector.shape_cast %3 : vector<8xf32> to vector<8x1xf32>
    %cst_5 = arith.constant 1.280000e+02 : f32
    %5 = vector.broadcast %cst_5 : f32 to vector<8x1xf32>
    %6 = arith.divf %4, %5 : vector<8x1xf32>
    %7 = vector.broadcast %6 : vector<8x1xf32> to vector<8x128xf32>
    %8 = arith.subf %0, %7 : vector<8x128xf32>
    %9 = arith.mulf %8, %8 : vector<8x128xf32>
    %cst_6 = arith.constant dense<0.000000e+00> : vector<8xf32>
    %10 = vector.multi_reduction <add>, %9, %cst_6 [1] : vector<8x128xf32> to vector<8xf32>
    %11 = vector.shape_cast %10 : vector<8xf32> to vector<8x1xf32>
    %cst_7 = arith.constant 1.280000e+02 : f32
    %12 = vector.broadcast %cst_7 : f32 to vector<8x1xf32>
    %13 = arith.divf %11, %12 : vector<8x1xf32>
    %14 = vector.broadcast %6 : vector<8x1xf32> to vector<8x128xf32>
    %15 = arith.subf %0, %14 : vector<8x128xf32>
    %cst_8 = arith.constant 9.99999974E-6 : f32
    %16 = vector.broadcast %cst_8 : f32 to vector<8x1xf32>
    %17 = arith.addf %13, %16 : vector<8x1xf32>
    %18 = math.rsqrt %17 : vector<8x1xf32>
    %19 = vector.broadcast %18 : vector<8x1xf32> to vector<8x128xf32>
    %20 = arith.mulf %15, %19 : vector<8x128xf32>
    %21 = vector.broadcast %1 : vector<1x128xf32> to vector<8x128xf32>
    %22 = arith.mulf %20, %21 : vector<8x128xf32>
    %23 = vector.broadcast %2 : vector<1x128xf32> to vector<8x128xf32>
    %24 = arith.addf %22, %23 : vector<8x128xf32>
    %25 = arith.truncf %24 : vector<8x128xf32> to vector<8x128xbf16>
    %c0_9 = arith.constant 0 : index
    %c0_10 = arith.constant 0 : index
    %26 = vector.load %arg3[%c0_9, %c0_10] : memref<128x128xbf16, #tpu.memory_space<vmem>>, vector<128x128xbf16>
    %cst_11 = arith.constant dense<0.000000e+00> : vector<8x128xf32>
    %27 = tpu.matmul %25, %26, %cst_11 {dimension_numbers = #tpu.dot_dimension_numbers<[1], [0], [0], [1], [0, 0, 1, 1], [], []>} : vector<8x128xbf16>, vector<128x128xbf16>, vector<8x128xf32> -> vector<8x128xf32>
    %c0_12 = arith.constant 0 : index
    %c0_13 = arith.constant 0 : index
    %28 = vector.load %arg4[%c0_12, %c0_13] : memref<8x128xf32, #tpu.memory_space<vmem>>, vector<8x128xf32>
    tpu.vector_store %arg4[%c0_12, %c0_13], %27 {strides = array<i32>} : memref<8x128xf32, #tpu.memory_space<vmem>>, vector<8x128xf32>,
    return
  }
}

</mosaic_0001>

<bundles_post_ra>
// kernel: text_encoder_forward.7
= control target key start
LH: loop header
LB: loop body
LE: loop exit
PB: predicated region body
PF: predicated region fallthrough
CT: control target
= control target key end

     0   :  { %s1377_s18 = smov 0   ;;  %s1723_s0 = inlined_call_operand.vmem [shape: f32[256,128], index: 0, kind: input, shape index: {}]   ;;  %s1724_s1 = inlined_call_operand.vmem [shape: f32[1,128], index: 1, kind: input, shape index: {}]   ;;  %s1725_s2 = inlined_call_operand.vmem [shape: f32[1,128], index: 2, kind: input, shape index: {}]   ;;  %s1726_s3 = inlined_call_operand.vmem [shape: bf16[128,384], index: 3, kind: input, shape index: {}]   ;;  %s1727_s4 = inlined_call_operand.vmem [shape: f32[1,384], index: 4, kind: input, shape index: {}]   ;;  %s1728_s5 = inlined_call_operand.vmem [shape: bf16[256,384], index: 5, kind: output, shape index: {}]  }
   0x1 LB: > { %s1115_s19 = sadd.s32 4294967295, %s1344_s18   ;;  %p1119_p0 = scmp.ge.s32.totalorder %s1344_s18, 1  ;;  %s1344_s18 = sphi %s1377_s18, %s15_s18  }
   0x2   : > { %p188_p1 = scmp.lt.s32.totalorder %s1344_s18, 3 }
   0x4   : > { %p189_p2 = pnand %p1119_p0, %p188_p1 }
   0x5   : > { %s1120_s20 = sshll.u32 (!%p189_p2), %s1115_s19, 4  ;;  %v1274_v16 = vld [vmem:[%s1726_s3 + $0x4] ss:$12 sps:$4 sm:$0xff] (!%p189_p2)   ;;  %v1276_v17 = vld [vmem:[%s1726_s3] ss:$12 sps:$4 sm:$0xff] (!%p189_p2)  }
   0x6   : > { %192 = sbr.rel (%p189_p2) target bundleno = 610 (0x262), region = 40  ;;  %p218_p3 = scmp.lt.s32.totalorder (!%p189_p2), %s1120_s20, 31  ;;  %v1277_v18 = vld [vmem:[%s1726_s3 + $0x1c] ss:$12 sps:$4 sm:$0xff] (!%p189_p2)   ;;  %655 = vmatprep.subr.bf16.mxu0 (!%p189_p2), %v1274_v16  ;;  %v1280_v58 = vld [vmem:[%s1726_s3 + $0x18] ss:$12 sps:$4 sm:$0xff] (!%p189_p2)  }
   0x7   : > { %v1279_v19 = vld [vmem:[%s1726_s3 + $0x8] ss:$12 sps:$4 sm:$0xff] (!%p189_p2)   ;;  %656 = vmatpush1.bf16.msra.mxu0 (!%p189_p2), %v1276_v17 }
   0x8   : > { %1232 = vmatprep.subr.bf16.mxu1 (!%p189_p2), %v1279_v19  ;;  %657 = vmatprep.subr.bf16.mxu0 (!%p189_p2), %v1277_v18  ;;  %v1285_v18 = vld [vmem:[%s1726_s3 + $0x4c] ss:$12 sps:$4 sm:$0xff] (!%p189_p2)  }
   0x9   : > { %1233 = vmatpush3.bf16.msra.mxu1 (!%p189_p2), %v1279_v19  ;;  %v1287_v19 = vld [vmem:[%s1726_s3 + $0x38] ss:$12 sps:$4 sm:$0xff] (!%p189_p2)  }
   0xb   : > { %658 = vmatpush1.bf16.msra.mxu0 (!%p189_p2), %v1280_v58 }
   0xd   : > { %s1730_s20 = smov (!%p218_p3, %s1120_s20), 31 }
   0xe   : > { %s1121_s21 = sshll.u32 %s1730_s20, 3  ;;  %s1264_s8 = smul.u32 12, %s1730_s20 }
   0xf   : > { %s221_s24 = scalar_lea.vmem %s1723_s0, %s1121_s21 }
  0x10   : > { %v231_v0 = vld [vmem:[%s221_s24] sm:$0xff]  ;;  %v233_v1 = vld [vmem:[%s221_s24 + $0x10] sm:$0xff]  ;;  %v232_v2 = vld [vmem:[%s221_s24 + $0x8] sm:$0xff]  ;;  %s1640_s11 = scalar_lea.vmem %s1728_s5, %s1264_s8 }
  0x11   : > { %249 = vadd.xlane.f32.xlu0 %v231_v0  ;;  %253 = vadd.xlane.f32.xlu1 %v233_v1  ;;  %v234_v3 = vld [vmem:[%s221_s24 + $0x18] sm:$0xff]  ;;  %v235_v4 = vld [vmem:[%s221_s24 + $0x20] sm:$0xff]  ;;  %v236_v5 = vld [vmem:[%s221_s24 + $0x28] sm:$0xff] }
  0x12   : > { %v237_v6 = vld [vmem:[%s221_s24 + $0x30] sm:$0xff]  ;;  %v238_v7 = vld [vmem:[%s221_s24 + $0x38] sm:$0xff]  ;;  %v1391_v8 = vld [vmem:[%s221_s24 + $0x40] sm:$0xff] }
  0x13   : > { %v1393_v9 = vld [vmem:[%s221_s24 + $0x48] sm:$0xff]  ;;  %v1397_v10 = vld [vmem:[%s221_s24 + $0x50] sm:$0xff]  ;;  %v1399_v11 = vld [vmem:[%s221_s24 + $0x58] sm:$0xff] }
  0x14   : > { %v1403_v12 = vld [vmem:[%s221_s24 + $0x60] sm:$0xff]  ;;  %v1405_v13 = vld [vmem:[%s221_s24 + $0x68] sm:$0xff]  ;;  %v1409_v14 = vld [vmem:[%s221_s24 + $0x70] sm:$0xff] }
  0x15   : > { %251 = vadd.xlane.f32.xlu0 %v232_v2  ;;  %255 = vadd.xlane.f32.xlu1 %v234_v3  ;;  %v1411_v15 = vld [vmem:[%s221_s24 + $0x78] sm:$0xff] }
  0x19   : > { %257 = vadd.xlane.f32.xlu0 %v235_v4  ;;  %259 = vadd.xlane.f32.xlu1 %v236_v5 }
  0x1d   : > { %261 = vadd.xlane.f32.xlu0 %v237_v6  ;;  %263 = vadd.xlane.f32.xlu1 %v238_v7 }
  0x21   : > { %265 = vadd.xlane.f32.xlu0 %v1391_v8  ;;  %267 = vadd.xlane.f32.xlu1 %v1393_v9 }
  0x25   : > { %269 = vadd.xlane.f32.xlu0 %v1397_v10  ;;  %271 = vadd.xlane.f32.xlu1 %v1399_v11 }
  0x29   : > { %273 = vadd.xlane.f32.xlu0 %v1403_v12  ;;  %275 = vadd.xlane.f32.xlu1 %v1405_v13 }
  0x2d   : > { %277 = vadd.xlane.f32.xlu0 %v1409_v14  ;;  %279 = vadd.xlane.f32.xlu1 %v1411_v15 }
  0x9e   : > { %v250_v20 = vpop.xlane.xlu0 %249  ;;  %v254_v21 = vpop.xlane.xlu1 %253 }
  0x9f   : > { %v282_v22 = vmul.f32 0.0078125, %v250_v20  ;;  %v284_v23 = vmul.f32 0.0078125, %v254_v21 }
  0xa1   : > { %v1427_v24 = vsub.f32 %v231_v0, %v282_v22  ;;  %v1429_v25 = vsub.f32 %v233_v1, %v284_v23  ;;  %v1281_v0 = vld [vmem:[%s1726_s3 + $0x34] ss:$12 sps:$4 sm:$0xff]  }
  0xa2   : > { %v252_v26 = vpop.xlane.xlu0 %251  ;;  %v256_v27 = vpop.xlane.xlu1 %255  ;;  %v1283_v1 = vld [vmem:[%s1726_s3 + $0x20] ss:$12 sps:$4 sm:$0xff]   ;;  %659 = vmatprep.subr.bf16.mxu0 %v1281_v0 }
  0xa3   : > { %v283_v28 = vmul.f32 0.0078125, %v252_v26  ;;  %v314_v29 = vmul.f32 %v1427_v24, %v1427_v24  ;;  %v285_v30 = vmul.f32 0.0078125, %v256_v27  ;;  %v316_v33 = vmul.f32 %v1429_v25, %v1429_v25  ;;  %1234 = vmatprep.subr.bf16.mxu1 %v1283_v1 }
  0xa4   : > { %1235 = vmatpush3.bf16.msra.mxu1 %v1283_v1 }
  0xa5   : > { %v1433_v31 = vsub.f32 %v232_v2, %v283_v28  ;;  %330 = vadd.xlane.f32.xlu0 %v314_v29  ;;  %v1435_v32 = vsub.f32 %v234_v3, %v285_v30  ;;  %1236 = vmatprep.subr.bf16.mxu1 %v1287_v19  ;;  %v1289_v29 = vld [vmem:[%s1726_s3 + $0x64] ss:$12 sps:$4 sm:$0xff]  }
  0xa6   : > { %v258_v34 = vpop.xlane.xlu0 %257  ;;  %v260_v35 = vpop.xlane.xlu1 %259  ;;  %v1291_v30 = vld [vmem:[%s1726_s3 + $0x50] ss:$12 sps:$4 sm:$0xff]  }
  0xa7   : > { %v286_v36 = vmul.f32 0.0078125, %v258_v34  ;;  %v315_v37 = vmul.f32 %v1433_v31, %v1433_v31  ;;  %v287_v38 = vmul.f32 0.0078125, %v260_v35  ;;  %v317_v41 = vmul.f32 %v1435_v32, %v1435_v32  ;;  %v1293_v34 = vld [vmem:[%s1726_s3 + $0x7c] ss:$12 sps:$4 sm:$0xff]  }
  0xa8   : > { %1237 = vmatpush3.bf16.msra.mxu1 %v1287_v19  ;;  %v1295_v35 = vld [vmem:[%s1726_s3 + $0x68] ss:$12 sps:$4 sm:$0xff]  }
  0xa9   : > { %v1441_v39 = vsub.f32 %v235_v4, %v286_v36  ;;  %334 = vadd.xlane.f32.xlu0 %v316_v33  ;;  %332 = vadd.xlane.f32.xlu1 %v315_v37  ;;  %v1443_v40 = vsub.f32 %v236_v5, %v287_v38  ;;  %v1296_v36 = vld [vmem:[%s1726_s3 + $0x78] ss:$12 sps:$4 sm:$0xff]   ;;  %v1297_v37 = vld [vmem:[%s1726_s3 + $0x94] ss:$12 sps:$4 sm:$0xff]  }
  0xaa   : > { %v262_v42 = vpop.xlane.xlu0 %261  ;;  %v264_v43 = vpop.xlane.xlu1 %263  ;;  %1238 = vmatprep.subr.bf16.mxu1 %v1291_v30  ;;  %v1299_v38 = vld [vmem:[%s1726_s3 + $0x80] ss:$12 sps:$4 sm:$0xff]  }
  0xab   : > { %v288_v44 = vmul.f32 0.0078125, %v262_v42  ;;  %v318_v45 = vmul.f32 %v1441_v39, %v1441_v39  ;;  %v289_v46 = vmul.f32 0.0078125, %v264_v43  ;;  %v319_v49 = vmul.f32 %v1443_v40, %v1443_v40  ;;  %v1301_v42 = vld [vmem:[%s1726_s3 + $0xac] ss:$12 sps:$4 sm:$0xff]  }
  0xac   : > { %1239 = vmatpush3.bf16.msra.mxu1 %v1291_v30  ;;  %v1303_v43 = vld [vmem:[%s1726_s3 + $0x98] ss:$12 sps:$4 sm:$0xff]  }
  0xad   : > { %v1449_v47 = vsub.f32 %v237_v6, %v288_v44  ;;  %336 = vadd.xlane.f32.xlu1 %v317_v41  ;;  %338 = vadd.xlane.f32.xlu0 %v318_v45  ;;  %v1451_v48 = vsub.f32 %v238_v7, %v289_v46  ;;  %v1284_v7 = vld [vmem:[%s1726_s3 + $0x30] ss:$12 sps:$4 sm:$0xff]   ;;  %v1304_v44 = vld [vmem:[%s1726_s3 + $0xa8] ss:$12 sps:$4 sm:$0xff]   ;;  %v1346_v46 = vmov 0  }
  0xae   : > { %v266_v50 = vpop.xlane.xlu0 %265  ;;  %v268_v51 = vpop.xlane.xlu1 %267  ;;  %660 = vmatpush1.bf16.msra.mxu0 %v1284_v7  ;;  %1240 = vmatprep.subr.bf16.mxu1 %v1295_v35  ;;  %v1300_v41 = vld [vmem:[%s1726_s3 + $0x90] ss:$12 sps:$4 sm:$0xff]  }
  0xaf   : > { %v290_v52 = vmul.f32 0.0078125, %v266_v50  ;;  %v320_v53 = vmul.f32 %v1449_v47, %v1449_v47  ;;  %v291_v54 = vmul.f32 0.0078125, %v268_v51  ;;  %v321_v57 = vmul.f32 %v1451_v48, %v1451_v48  ;;  %661 = vmatprep.subr.bf16.mxu0 %v1285_v18  ;;  %v1305_v45 = vld [vmem:[%s1726_s3 + $0xb0] ss:$12 sps:$4 sm:$0xff]   ;;  %687 = vmatprep.mubr.bf16.mxu0 %v1346_v46 }
  0xb0   : > { %1241 = vmatpush3.bf16.msra.mxu1 %v1295_v35 }
  0xb1   : > { %v1458_v55 = vsub.f32 %v1391_v8, %v290_v52  ;;  %340 = vadd.xlane.f32.xlu1 %v319_v49  ;;  %342 = vadd.xlane.f32.xlu0 %v320_v53  ;;  %v1461_v56 = vsub.f32 %v1393_v9, %v291_v54 }
  0xb2   : > { %v270_v59 = vpop.xlane.xlu0 %269  ;;  %v272_v60 = vpop.xlane.xlu1 %271  ;;  %1242 = vmatprep.subr.bf16.mxu1 %v1299_v38 }
  0xb3   : > { %v292_v61 = vmul.f32 0.0078125, %v270_v59  ;;  %v322_v62 = vmul.f32 %v1458_v55, %v1458_v55  ;;  %v293_v63 = vmul.f32 0.0078125, %v272_v60  ;;  %v323_v4 = vmul.f32 %v1461_v56, %v1461_v56 }
  0xb4   : > { %1243 = vmatpush3.bf16.msra.mxu1 %v1299_v38 }
  0xb5   : > { %v1477_v2 = vsub.f32 %v1397_v10, %v292_v61  ;;  %344 = vadd.xlane.f32.xlu1 %v321_v57  ;;  %346 = vadd.xlane.f32.xlu0 %v322_v62  ;;  %v1480_v3 = vsub.f32 %v1399_v11, %v293_v63 }
  0xb6   : > { %v274_v5 = vpop.xlane.xlu0 %273  ;;  %v276_v6 = vpop.xlane.xlu1 %275  ;;  %1244 = vmatprep.subr.bf16.mxu1 %v1303_v43 }
  0xb7   : > { %v294_v8 = vmul.f32 0.0078125, %v274_v5  ;;  %v324_v9 = vmul.f32 %v1477_v2, %v1477_v2  ;;  %v295_v10 = vmul.f32 0.0078125, %v276_v6  ;;  %v325_v17 = vmul.f32 %v1480_v3, %v1480_v3 }
  0xb8   : > { %1245 = vmatpush3.bf16.msra.mxu1 %v1303_v43 }
  0xb9   : > { %v1490_v11 = vsub.f32 %v1403_v12, %v294_v8  ;;  %348 = vadd.xlane.f32.xlu1 %v323_v4  ;;  %350 = vadd.xlane.f32.xlu0 %v324_v9  ;;  %v1493_v16 = vsub.f32 %v1405_v13, %v295_v10  ;;  %v1288_v12 = vld [vmem:[%s1726_s3 + $0x48] ss:$12 sps:$4 sm:$0xff]  }
  0xba   : > { %v278_v20 = vpop.xlane.xlu0 %277  ;;  %v280_v21 = vpop.xlane.xlu1 %279  ;;  %662 = vmatpush1.bf16.msra.mxu0 %v1288_v12  ;;  %1246 = vmatprep.subr.bf16.mxu1 %v1305_v45  ;;  %v1564_v12 = vld [vmem:[%s1724_s1] ss:$0 sm:$0xff] }
  0xbb   : > { %v296_v22 = vmul.f32 0.0078125, %v278_v20  ;;  %v326_v13 = vmul.f32 %v1490_v11, %v1490_v11  ;;  %v297_v23 = vmul.f32 0.0078125, %v280_v21  ;;  %v327_v28 = vmul.f32 %v1493_v16, %v1493_v16  ;;  %663 = vmatprep.subr.bf16.mxu0 %v1289_v29 }
  0xbc   : > { %1247 = vmatpush3.bf16.msra.mxu1 %v1305_v45 }
  0xbd   : > { %v1509_v26 = vsub.f32 %v1409_v14, %v296_v22  ;;  %352 = vadd.xlane.f32.xlu1 %v325_v17  ;;  %354 = vadd.xlane.f32.xlu0 %v326_v13  ;;  %v1512_v27 = vsub.f32 %v1411_v15, %v297_v23  ;;  %v1292_v14 = vld [vmem:[%s1726_s3 + $0x60] ss:$12 sps:$4 sm:$0xff]  }
  0xbe   : > { %664 = vmatpush1.bf16.msra.mxu0 %v1292_v14 }
  0xbf   : > { %v328_v33 = vmul.f32 %v1509_v26, %v1509_v26  ;;  %v329_v15 = vmul.f32 %v1512_v27, %v1512_v27  ;;  %665 = vmatprep.subr.bf16.mxu0 %v1293_v34  ;;  %v1571_v34 = vld [vmem:[%s1725_s2] ss:$0 sm:$0xff] }
  0xc1   : > { %356 = vadd.xlane.f32.xlu1 %v327_v28  ;;  %358 = vadd.xlane.f32.xlu0 %v328_v33 }
  0xc2   : > { %666 = vmatpush1.bf16.msra.mxu0 %v1296_v36 }
  0xc3   : > { %667 = vmatprep.subr.bf16.mxu0 %v1297_v37 }
  0xc5   : > { %360 = vadd.xlane.f32.xlu1 %v329_v15 }
  0xc6   : > { %668 = vmatpush1.bf16.msra.mxu0 %v1300_v41 }
  0xc7   : > { %669 = vmatprep.subr.bf16.mxu0 %v1301_v42 }
  0xca   : > { %670 = vmatpush1.bf16.msra.mxu0 %v1304_v44 }
 0x132   : > { %v331_v49 = vpop.xlane.xlu0 %330 }
 0x133   : > { %v362_v50 = vmul.f32 0.0078125, %v331_v49 }
 0x135   : > { %v378_v51 = vadd.f32 1e-05, %v362_v50 }
 0x136   : > { %v333_v52 = vpop.xlane.xlu1 %332  ;;  %v335_v53 = vpop.xlane.xlu0 %334 }
 0x137   : > { %1306 = vrsqrt.f32 %v378_v51  ;;  %v363_v54 = vmul.f32 0.0078125, %v333_v52  ;;  %v364_v57 = vmul.f32 0.0078125, %v335_v53 }
 0x139   : > { %v379_v58 = vadd.f32 1e-05, %v363_v54  ;;  %v380_v59 = vadd.f32 1e-05, %v364_v57 }
 0x13a   : > { %v337_v60 = vpop.xlane.xlu1 %336  ;;  %v339_v61 = vpop.xlane.xlu0 %338 }
 0x13b   : > { %1308 = vrsqrt.f32 %v379_v58  ;;  %v365_v62 = vmul.f32 0.0078125, %v337_v60  ;;  %v366_v63 = vmul.f32 0.0078125, %v339_v61 }
 0x13c   : > { %1310 = vrsqrt.f32 %v380_v59 }
 0x13d   : > { %v381_v0 = vadd.f32 1e-05, %v365_v62  ;;  %v382_v1 = vadd.f32 1e-05, %v366_v63 }
 0x13e   : > { %v341_v4 = vpop.xlane.xlu1 %340  ;;  %v343_v5 = vpop.xlane.xlu0 %342 }
 0x13f   : > { %1312 = vrsqrt.f32 %v381_v0  ;;  %v367_v6 = vmul.f32 0.0078125, %v341_v4  ;;  %v368_v7 = vmul.f32 0.0078125, %v343_v5 }
 0x140   : > { %1314 = vrsqrt.f32 %v382_v1 }
 0x141   : > { %v1307_v8 = vpop.eup %1306  ;;  %v383_v9 = vadd.f32 1e-05, %v367_v6  ;;  %v384_v10 = vadd.f32 1e-05, %v368_v7 }
 0x142   : > { %v345_v17 = vpop.xlane.xlu1 %344  ;;  %v347_v18 = vpop.xlane.xlu0 %346  ;;  %v410_v19 = vmul.f32 %v1307_v8, %v1427_v24 }
 0x143   : > { %1316 = vrsqrt.f32 %v383_v9  ;;  %v369_v20 = vmul.f32 0.0078125, %v345_v17  ;;  %v370_v21 = vmul.f32 0.0078125, %v347_v18 }
 0x144   : > { %1318 = vrsqrt.f32 %v384_v10  ;;  %v432_v33 = vmul.f32 %v1564_v12, %v410_v19 }
 0x145   : > { %v1309_v22 = vpop.eup %1308  ;;  %v385_v13 = vadd.f32 1e-05, %v369_v20  ;;  %v386_v23 = vadd.f32 1e-05, %v370_v21 }
 0x146   : > { %v1311_v28 = vpop.eup %1310  ;;  %v349_v29 = vpop.xlane.xlu1 %348  ;;  %v411_v14 = vmul.f32 %v1309_v22, %v1433_v31  ;;  %v454_v45 = vadd.f32 %v1571_v34, %v432_v33 }
 0x147   : > { %v351_v30 = vpop.xlane.xlu0 %350  ;;  %1320 = vrsqrt.f32 %v385_v13  ;;  %v371_v24 = vmul.f32 0.0078125, %v349_v29  ;;  %v412_v35 = vmul.f32 %v1311_v28, %v1429_v25 }
 0x148   : > { %v372_v15 = vmul.f32 0.0078125, %v351_v30  ;;  %1322 = vrsqrt.f32 %v386_v23  ;;  %v433_v36 = vmul.f32 %v1564_v12, %v411_v14 }
 0x149   : > { %v1313_v37 = vpop.eup %1312  ;;  %v387_v38 = vadd.f32 1e-05, %v371_v24  ;;  %v434_v31 = vmul.f32 %v1564_v12, %v412_v35 }
 0x14a   : > { %v388_v41 = vadd.f32 1e-05, %v372_v15  ;;  %v1315_v42 = vpop.eup %1314  ;;  %v353_v43 = vpop.xlane.xlu1 %352  ;;  %v455_v49 = vadd.f32 %v1571_v34, %v433_v36  ;;  %v413_v50 = vmul.f32 %v1313_v37, %v1435_v32 }
 0x14b   : > { %v355_v44 = vpop.xlane.xlu0 %354  ;;  %1324 = vrsqrt.f32 %v387_v38  ;;  %v373_v51 = vmul.f32 0.0078125, %v353_v43  ;;  %v414_v54 = vmul.f32 %v1315_v42, %v1441_v39  ;;  %v456_v60 = vadd.f32 %v1571_v34, %v434_v31 }
 0x14c   : > { %v374_v25 = vmul.f32 0.0078125, %v355_v44  ;;  %1326 = vrsqrt.f32 %v388_v41  ;;  %v470_v52 = vpack.c.bf16 %v455_v49, %v454_v45  ;;  %v435_v53 = vmul.f32 %v1564_v12, %v413_v50 }
 0x14d   : > { %v1317_v57 = vpop.eup %1316  ;;  %v389_v58 = vadd.f32 1e-05, %v373_v51  ;;  %v436_v1 = vmul.f32 %v1564_v12, %v414_v54 }
 0x14e   : > { %v390_v59 = vadd.f32 1e-05, %v374_v25  ;;  %v1319_v61 = vpop.eup %1318  ;;  %v357_v62 = vpop.xlane.xlu1 %356  ;;  %688 = vmatmul.mubr.bf16.vlgmr.msra.gmra.mrb[0].mxu0 %v470_v52  ;;  %1248 = vmatprep.mubr.bf16.mxu1 %v470_v52  ;;  %v457_v32 = vadd.f32 %v1571_v34, %v435_v53  ;;  %v415_v0 = vmul.f32 %v1317_v57, %v1443_v40 }
 0x14f   : > { %v359_v63 = vpop.xlane.xlu0 %358  ;;  %1328 = vrsqrt.f32 %v389_v58  ;;  %v375_v4 = vmul.f32 0.0078125, %v357_v62  ;;  %697 = vmatprep.mubr.bf16.mxu0 %v1346_v46  ;;  %v416_v39 = vmul.f32 %v1319_v61, %v1449_v47  ;;  %v458_v19 = vadd.f32 %v1571_v34, %v436_v1 }
 0x150   : > { %v376_v5 = vmul.f32 0.0078125, %v359_v63  ;;  %1330 = vrsqrt.f32 %v390_v59  ;;  %v471_v6 = vpack.c.bf16 %v457_v32, %v456_v60  ;;  %v437_v7 = vmul.f32 %v1564_v12, %v415_v0 }
 0x151   : > { %v1321_v8 = vpop.eup %1320  ;;  %v391_v9 = vadd.f32 1e-05, %v375_v4  ;;  %v438_v17 = vmul.f32 %v1564_v12, %v416_v39 }
 0x152   : > { %v392_v10 = vadd.f32 1e-05, %v376_v5  ;;  %v1323_v18 = vpop.eup %1322  ;;  %v361_v40 = vpop.xlane.xlu1 %360  ;;  %1249 = vmatmul.mubr.bf16.vlgmr.msra.gmra.mrb[0].mxu1 %v471_v6  ;;  %v459_v20 = vadd.f32 %v1571_v34, %v437_v7  ;;  %v417_v21 = vmul.f32 %v1321_v8, %v1451_v48 }
 0x153   : > { %1332 = vrsqrt.f32 %v391_v9  ;;  %v377_v47 = vmul.f32 0.0078125, %v361_v40  ;;  %v418_v22 = vmul.f32 %v1323_v18, %v1458_v55  ;;  %v460_v30 = vadd.f32 %v1571_v34, %v438_v17 }
 0x154   : > { %1334 = vrsqrt.f32 %v392_v10  ;;  %v472_v13 = vpack.c.bf16 %v459_v20, %v458_v19  ;;  %v439_v23 = vmul.f32 %v1564_v12, %v417_v21 }
 0x155   : > { %v1325_v28 = vpop.eup %1324  ;;  %v393_v29 = vadd.f32 1e-05, %v377_v47  ;;  %v440_v48 = vmul.f32 %v1564_v12, %v418_v22 }
 0x156   : > { %v1327_v14 = vpop.eup %1326  ;;  %698 = vmatmul.mubr.bf16.gmra.mrb[4].mxu0 %v471_v6  ;;  %1252 = vmatprep.mubr.bf16.mxu1 %v472_v13  ;;  %v461_v33 = vadd.f32 %v1571_v34, %v439_v23  ;;  %v419_v24 = vmul.f32 %v1325_v28, %v1461_v56 }
 0x157   : > { %1336 = vrsqrt.f32 %v393_v29  ;;  %707 = vmatprep.mubr.bf16.mxu0 %v1346_v46  ;;  %v420_v55 = vmul.f32 %v1327_v14, %v1477_v2  ;;  %v462_v41 = vadd.f32 %v1571_v34, %v440_v48 }
 0x158   : > { %v473_v15 = vpack.c.bf16 %v461_v33, %v460_v30  ;;  %v441_v35 = vmul.f32 %v1564_v12, %v419_v24 }
 0x159   : > { %v1329_v36 = vpop.eup %1328  ;;  %v442_v37 = vmul.f32 %v1564_v12, %v420_v55 }
 0x15a   : > { %v1331_v38 = vpop.eup %1330  ;;  %1253 = vmatmul.mubr.bf16.gmra.mrb[4].mxu1 %v473_v15  ;;  %v463_v31 = vadd.f32 %v1571_v34, %v441_v35  ;;  %v421_v56 = vmul.f32 %v1329_v36, %v1480_v3 }
 0x15b   : > { %v422_v42 = vmul.f32 %v1331_v38, %v1490_v11  ;;  %v464_v45 = vadd.f32 %v1571_v34, %v442_v37 }
 0x15c   : > { %v474_v43 = vpack.c.bf16 %v463_v31, %v462_v41  ;;  %v443_v44 = vmul.f32 %v1564_v12, %v421_v56 }
 0x15d   : > { %v1333_v2 = vpop.eup %1332  ;;  %v444_v25 = vmul.f32 %v1564_v12, %v422_v42 }
 0x15e   : > { %v1335_v49 = vpop.eup %1334  ;;  %708 = vmatmul.mubr.bf16.gmra.mrb[8].mxu0 %v472_v13  ;;  %1256 = vmatprep.mubr.bf16.mxu1 %v474_v43  ;;  %v465_v50 = vadd.f32 %v1571_v34, %v443_v44  ;;  %v423_v51 = vmul.f32 %v1333_v2, %v1493_v16 }
 0x15f   : > { %717 = vmatprep.mubr.bf16.mxu0 %v1346_v46  ;;  %v424_v3 = vmul.f32 %v1335_v49, %v1509_v26  ;;  %v466_v54 = vadd.f32 %v1571_v34, %v444_v25 }
 0x160   : > { %v475_v11 = vpack.c.bf16 %v465_v50, %v464_v45  ;;  %v445_v52 = vmul.f32 %v1564_v12, %v423_v51 }
 0x161   : > { %v1337_v53 = vpop.eup %1336  ;;  %v446_v59 = vmul.f32 %v1564_v12, %v424_v3 }
 0x162   : > { %1257 = vmatmul.mubr.bf16.gmra.mrb[8].mxu1 %v475_v11  ;;  %v467_v57 = vadd.f32 %v1571_v34, %v445_v52  ;;  %v425_v58 = vmul.f32 %v1337_v53, %v1512_v27  ;;  %v512_v27 = vlaneseq }
 0x163   : > { %v468_v26 = vadd.f32 %v1571_v34, %v446_v59 }
 0x164   : > { %v476_v16 = vpack.c.bf16 %v467_v57, %v466_v54  ;;  %v447_v60 = vmul.f32 %v1564_v12, %v425_v58  ;;  %v513_v12 = vshrl.u32 %v512_v27, 7 }
 0x166   : > { %718 = vmatmul.mubr.bf16.gmra.mrb[12].mxu0 %v473_v15  ;;  %1260 = vmatprep.mubr.bf16.mxu1 %v476_v16  ;;  %v469_v61 = vadd.f32 %v1571_v34, %v447_v60  ;;  %v514_v63 = vsub.s32 0, %v513_v12  ;;  %v510_v34 = vld [vmem:[%s1727_s4] sm:$0x7]  ;;  %v518_v32 = vsub.s32 1, %v513_v12  ;;  %v522_v1 = vsub.s32 2, %v513_v12 }
 0x167   : > { %727 = vmatprep.mubr.bf16.mxu0 %v1346_v46 }
 0x168   : > { %v477_v62 = vpack.c.bf16 %v469_v61, %v468_v26  ;;  %v1628_v0 = vrot.slane %v510_v34, %v514_v63  ;;  %v1630_v4 = vrot.slane %v510_v34, %v518_v32 }
 0x16a   : > { %1261 = vmatmul.mubr.bf16.gmra.mrb[12].mxu1 %v477_v62 }
 0x16e   : > { %728 = vmatmul.mubr.bf16.gmra.mrb[16].mxu0 %v474_v43 }
 0x16f   : > { %737 = vmatprep.mubr.bf16.mxu0 %v1346_v46 }
 0x176   : > { %738 = vmatmul.mubr.bf16.gmra.mrb[20].mxu0 %v475_v11 }
 0x177   : > { %747 = vmatprep.mubr.bf16.mxu0 %v1346_v46 }
 0x17e   : > { %748 = vmatmul.mubr.bf16.gmra.mrb[24].mxu0 %v476_v16 }
 0x17f   : > { %757 = vmatprep.mubr.bf16.mxu0 %v1346_v46  ;;  %v1634_v46 = vrot.slane %v510_v34, %v522_v1 }
 0x186   : > { %758 = vmatmul.mubr.bf16.gmra.mrb[28].mxu0 %v477_v62 }
 0x221   : > { %v689_v5 = vpop.f32.mrb[0].mxu0 }
 0x222   : > { %v690_v39 = vadd.f32 %v689_v5, %v1628_v0  ;;  %v691_v6 = vpop.f32.mrb[1].mxu0 }
 0x223   : > { %v692_v7 = vadd.f32 %v691_v6, %v1630_v4  ;;  %v693_v8 = vpop.f32.mrb[2].mxu0 }
 0x224   : > { %v694_v9 = vadd.f32 %v693_v8, %v1628_v0  ;;  %v695_v10 = vpop.f32.mrb[3].mxu0 }
 0x225   : > { %v1184_v17 = vpack.c.bf16 %v692_v7, %v690_v39  ;;  %v696_v18 = vadd.f32 %v695_v10, %v1630_v4  ;;  %v1250_v40 = vpop.f32.mrb[0].mxu1 }
 0x226   : > { %v811_v19 = vadd.f32 %v1250_v40, %v1634_v46  ;;  %v802_v20 = vpop.f32.mrb[1].mxu1 }
 0x227   : > { %1025 = vst [vmem:[%s1640_s11] sm:$0xff] %v1184_v17  ;;  %v1186_v21 = vpack.c.bf16 %v696_v18, %v694_v9  ;;  %v803_v47 = vadd.f32 %v802_v20, %v1634_v46  ;;  %v1251_v22 = vpop.f32.mrb[2].mxu1 }
 0x228   : > { %v1189_v13 = vpack.c.bf16 %v811_v19, %v811_v19  ;;  %v814_v23 = vadd.f32 %v1251_v22, %v1634_v46  ;;  %v805_v28 = vpop.f32.mrb[3].mxu1 }
 0x229   : > { %1027 = vst [vmem:[%s1640_s11 + $0xc] sm:$0xff] %v1186_v21  ;;  %v1185_v29 = vpack.c.bf16 %v803_v47, %v803_v47  ;;  %v806_v30 = vadd.f32 %v805_v28, %v1634_v46  ;;  %v699_v14 = vpop.f32.mrb[4].mxu0 }
 0x22a   : > { %1030 = vst [vmem:[%s1640_s11 + $0x20] sm:$0xf] %v1189_v13  ;;  %v1191_v33 = vpack.c.bf16 %v814_v23, %v814_v23  ;;  %v700_v24 = vadd.f32 %v699_v14, %v1628_v0  ;;  %v701_v48 = vpop.f32.mrb[5].mxu0 }
 0x22b   : > { %1026 = vst [vmem:[%s1640_s11 + $0x8] sm:$0xf] %v1185_v29  ;;  %v1187_v55 = vpack.c.bf16 %v806_v30, %v806_v30  ;;  %v702_v15 = vadd.f32 %v701_v48, %v1630_v4  ;;  %v703_v35 = vpop.f32.mrb[6].mxu0 }
 0x22c   : > { %1032 = vst [vmem:[%s1640_s11 + $0x2c] sm:$0xf] %v1191_v33  ;;  %v704_v36 = vadd.f32 %v703_v35, %v1628_v0  ;;  %v705_v37 = vpop.f32.mrb[7].mxu0 }
 0x22d   : > { %1028 = vst [vmem:[%s1640_s11 + $0x14] sm:$0xf] %v1187_v55  ;;  %v1188_v38 = vpack.c.bf16 %v702_v15, %v700_v24  ;;  %v706_v41 = vadd.f32 %v705_v37, %v1630_v4  ;;  %v1254_v31 = vpop.f32.mrb[4].mxu1 }
 0x22e   : > { %v827_v56 = vadd.f32 %v1254_v31, %v1634_v46  ;;  %v818_v42 = vpop.f32.mrb[5].mxu1 }
 0x22f   : > { %1029 = vst [vmem:[%s1640_s11 + $0x18] sm:$0xff] %v1188_v38  ;;  %v1190_v43 = vpack.c.bf16 %v706_v41, %v704_v36  ;;  %v819_v44 = vadd.f32 %v818_v42, %v1634_v46  ;;  %v1255_v2 = vpop.f32.mrb[6].mxu1 }
 0x230   : > { %v1197_v45 = vpack.c.bf16 %v827_v56, %v827_v56  ;;  %v830_v49 = vadd.f32 %v1255_v2, %v1634_v46  ;;  %v821_v50 = vpop.f32.mrb[7].mxu1 }
 0x231   : > { %1031 = vst [vmem:[%s1640_s11 + $0x24] sm:$0xff] %v1190_v43  ;;  %v1193_v51 = vpack.c.bf16 %v819_v44, %v819_v44  ;;  %v822_v25 = vadd.f32 %v821_v50, %v1634_v46  ;;  %v709_v3 = vpop.f32.mrb[8].mxu0 }
 0x232   : > { %1038 = vst [vmem:[%s1640_s11 + $0x50] sm:$0xf] %v1197_v45  ;;  %v1199_v11 = vpack.c.bf16 %v830_v49, %v830_v49  ;;  %v710_v52 = vadd.f32 %v709_v3, %v1628_v0  ;;  %v711_v53 = vpop.f32.mrb[9].mxu0 }
 0x233   : > { %1034 = vst [vmem:[%s1640_s11 + $0x38] sm:$0xf] %v1193_v51  ;;  %v1195_v54 = vpack.c.bf16 %v822_v25, %v822_v25  ;;  %v712_v57 = vadd.f32 %v711_v53, %v1630_v4  ;;  %v713_v58 = vpop.f32.mrb[10].mxu0 }
 0x234   : > { %1040 = vst [vmem:[%s1640_s11 + $0x5c] sm:$0xf] %v1199_v11  ;;  %v714_v59 = vadd.f32 %v713_v58, %v1628_v0  ;;  %v715_v16 = vpop.f32.mrb[11].mxu0 }
 0x235   : > { %1036 = vst [vmem:[%s1640_s11 + $0x44] sm:$0xf] %v1195_v54  ;;  %v1192_v60 = vpack.c.bf16 %v712_v57, %v710_v52  ;;  %v716_v26 = vadd.f32 %v715_v16, %v1630_v4  ;;  %v1258_v61 = vpop.f32.mrb[8].mxu1 }
 0x236   : > { %v843_v62 = vadd.f32 %v1258_v61, %v1634_v46  ;;  %v834_v27 = vpop.f32.mrb[9].mxu1 }
 0x237   : > { %1033 = vst [vmem:[%s1640_s11 + $0x30] sm:$0xff] %v1192_v60  ;;  %v1194_v12 = vpack.c.bf16 %v716_v26, %v714_v59  ;;  %v835_v63 = vadd.f32 %v834_v27, %v1634_v46  ;;  %v1259_v34 = vpop.f32.mrb[10].mxu1 }
 0x238   : > { %v1205_v32 = vpack.c.bf16 %v843_v62, %v843_v62  ;;  %v846_v1 = vadd.f32 %v1259_v34, %v1634_v46  ;;  %v837_v5 = vpop.f32.mrb[11].mxu1 }
 0x239   : > { %1035 = vst [vmem:[%s1640_s11 + $0x3c] sm:$0xff] %v1194_v12  ;;  %v1201_v39 = vpack.c.bf16 %v835_v63, %v835_v63  ;;  %v838_v6 = vadd.f32 %v837_v5, %v1634_v46  ;;  %v719_v7 = vpop.f32.mrb[12].mxu0 }
 0x23a   : > { %1046 = vst [vmem:[%s1640_s11 + $0x80] sm:$0xf] %v1205_v32  ;;  %v1207_v8 = vpack.c.bf16 %v846_v1, %v846_v1  ;;  %v720_v9 = vadd.f32 %v719_v7, %v1628_v0  ;;  %v721_v10 = vpop.f32.mrb[13].mxu0 }
 0x23b   : > { %1042 = vst [vmem:[%s1640_s11 + $0x68] sm:$0xf] %v1201_v39  ;;  %v1203_v17 = vpack.c.bf16 %v838_v6, %v838_v6  ;;  %v722_v18 = vadd.f32 %v721_v10, %v1630_v4  ;;  %v723_v40 = vpop.f32.mrb[14].mxu0 }
 0x23c   : > { %1048 = vst [vmem:[%s1640_s11 + $0x8c] sm:$0xf] %v1207_v8  ;;  %v724_v19 = vadd.f32 %v723_v40, %v1628_v0  ;;  %v725_v20 = vpop.f32.mrb[15].mxu0 }
 0x23d   : > { %1044 = vst [vmem:[%s1640_s11 + $0x74] sm:$0xf] %v1203_v17  ;;  %v1196_v21 = vpack.c.bf16 %v722_v18, %v720_v9  ;;  %v726_v47 = vadd.f32 %v725_v20, %v1630_v4  ;;  %v1262_v22 = vpop.f32.mrb[12].mxu1 }
 0x23e   : > { %v859_v13 = vadd.f32 %v1262_v22, %v1634_v46  ;;  %v850_v23 = vpop.f32.mrb[13].mxu1 }
 0x23f   : > { %1037 = vst [vmem:[%s1640_s11 + $0x48] sm:$0xff] %v1196_v21  ;;  %v1198_v28 = vpack.c.bf16 %v726_v47, %v724_v19  ;;  %v851_v29 = vadd.f32 %v850_v23, %v1634_v46  ;;  %v1263_v30 = vpop.f32.mrb[14].mxu1 }
 0x240   : > { %v1213_v14 = vpack.c.bf16 %v859_v13, %v859_v13  ;;  %v862_v33 = vadd.f32 %v1263_v30, %v1634_v46  ;;  %v853_v24 = vpop.f32.mrb[15].mxu1 }
 0x241   : > { %1039 = vst [vmem:[%s1640_s11 + $0x54] sm:$0xff] %v1198_v28  ;;  %v1209_v48 = vpack.c.bf16 %v851_v29, %v851_v29  ;;  %v854_v55 = vadd.f32 %v853_v24, %v1634_v46  ;;  %v729_v15 = vpop.f32.mrb[16].mxu0 }
 0x242   : > { %1054 = vst [vmem:[%s1640_s11 + $0xb0] sm:$0xf] %v1213_v14  ;;  %v1215_v35 = vpack.c.bf16 %v862_v33, %v862_v33  ;;  %v730_v36 = vadd.f32 %v729_v15, %v1628_v0  ;;  %v731_v37 = vpop.f32.mrb[17].mxu0 }
 0x243   : > { %1050 = vst [vmem:[%s1640_s11 + $0x98] sm:$0xf] %v1209_v48  ;;  %v1211_v38 = vpack.c.bf16 %v854_v55, %v854_v55  ;;  %v732_v41 = vadd.f32 %v731_v37, %v1630_v4  ;;  %v733_v31 = vpop.f32.mrb[18].mxu0 }
 0x244   : > { %1056 = vst [vmem:[%s1640_s11 + $0xbc] sm:$0xf] %v1215_v35  ;;  %v734_v56 = vadd.f32 %v733_v31, %v1628_v0  ;;  %v735_v42 = vpop.f32.mrb[19].mxu0 }
 0x245   : > { %1052 = vst [vmem:[%s1640_s11 + $0xa4] sm:$0xf] %v1211_v38  ;;  %v1200_v46 = vpack.c.bf16 %v732_v41, %v730_v36  ;;  %v736_v43 = vadd.f32 %v735_v42, %v1630_v4 }
 0x247   : > { %1041 = vst [vmem:[%s1640_s11 + $0x60] sm:$0xff] %v1200_v46  ;;  %v1202_v44 = vpack.c.bf16 %v736_v43, %v734_v56 }
 0x249   : > { %1043 = vst [vmem:[%s1640_s11 + $0x6c] sm:$0xff] %v1202_v44  ;;  %v739_v2 = vpop.f32.mrb[20].mxu0 }
 0x24a   : > { %v740_v45 = vadd.f32 %v739_v2, %v1628_v0  ;;  %v741_v49 = vpop.f32.mrb[21].mxu0 }
 0x24b   : > { %v742_v50 = vadd.f32 %v741_v49, %v1630_v4  ;;  %v743_v51 = vpop.f32.mrb[22].mxu0 }
 0x24c   : > { %v744_v25 = vadd.f32 %v743_v51, %v1628_v0  ;;  %v745_v3 = vpop.f32.mrb[23].mxu0 }
 0x24d   : > { %v1204_v11 = vpack.c.bf16 %v742_v50, %v740_v45  ;;  %v746_v52 = vadd.f32 %v745_v3, %v1630_v4 }
 0x24f   : > { %1045 = vst [vmem:[%s1640_s11 + $0x78] sm:$0xff] %v1204_v11  ;;  %v1206_v53 = vpack.c.bf16 %v746_v52, %v744_v25 }
 0x251   : > { %1047 = vst [vmem:[%s1640_s11 + $0x84] sm:$0xff] %v1206_v53  ;;  %v749_v54 = vpop.f32.mrb[24].mxu0 }
 0x252   : > { %v750_v57 = vadd.f32 %v749_v54, %v1628_v0  ;;  %v751_v58 = vpop.f32.mrb[25].mxu0 }
 0x253   : > { %v752_v59 = vadd.f32 %v751_v58, %v1630_v4  ;;  %v753_v16 = vpop.f32.mrb[26].mxu0 }
 0x254   : > { %v754_v60 = vadd.f32 %v753_v16, %v1628_v0  ;;  %v755_v26 = vpop.f32.mrb[27].mxu0 }
 0x255   : > { %v1208_v61 = vpack.c.bf16 %v752_v59, %v750_v57  ;;  %v756_v62 = vadd.f32 %v755_v26, %v1630_v4 }
 0x257   : > { %1049 = vst [vmem:[%s1640_s11 + $0x90] sm:$0xff] %v1208_v61  ;;  %v1210_v27 = vpack.c.bf16 %v756_v62, %v754_v60 }
 0x259   : > { %1051 = vst [vmem:[%s1640_s11 + $0x9c] sm:$0xff] %v1210_v27  ;;  %v759_v12 = vpop.f32.mrb[28].mxu0 }
 0x25a   : > { %v760_v63 = vadd.f32 %v759_v12, %v1628_v0  ;;  %v761_v34 = vpop.f32.mrb[29].mxu0 }
 0x25b   : > { %v762_v32 = vadd.f32 %v761_v34, %v1630_v4  ;;  %v763_v1 = vpop.f32.mrb[30].mxu0 }
 0x25c   : > { %v764_v5 = vadd.f32 %v763_v1, %v1628_v0  ;;  %v765_v39 = vpop.f32.mrb[31].mxu0 }
 0x25d   : > { %v1212_v6 = vpack.c.bf16 %v762_v32, %v760_v63  ;;  %v766_v7 = vadd.f32 %v765_v39, %v1630_v4 }
 0x25f   : > { %1053 = vst [vmem:[%s1640_s11 + $0xa8] sm:$0xff] %v1212_v6  ;;  %v1214_v8 = vpack.c.bf16 %v766_v7, %v764_v5 }
 0x261   : > { %1055 = vst [vmem:[%s1640_s11 + $0xb4] sm:$0xff] %v1214_v8 }
 0x262 PF: > { %s15_s18 = sadd.s32 1, %s1344_s18  }
 0x263   : > { %p12_p4 = scmp.ge.s32.totalorder %s15_s18, 4  }
 0x265   :  { %14 = sbr.rel (!%p12_p4) target bundleno = 1 (0x1), region = 70 }

// kernel: text_encoder_forward.13
= control target key start
LH: loop header
LB: loop body
LE: loop exit
PB: predicated region body
PF: predicated region fallthrough
CT: control target
= control target key end

     0   :  { %s317_s0 = inlined_call_operand.vmem [shape: f32[8,128], index: 0, kind: input, shape index: {}]   ;;  %s318_s1 = inlined_call_operand.vmem [shape: f32[1,128], index: 1, kind: input, shape index: {}]   ;;  %s319_s2 = inlined_call_operand.vmem [shape: f32[1,128], index: 2, kind: input, shape index: {}]   ;;  %s320_s3 = inlined_call_operand.vmem [shape: bf16[128,128], index: 3, kind: input, shape index: {}]   ;;  %s321_s4 = inlined_call_operand.hbm [shape: f32[8,128], index: 4, kind: output, shape index: {}]  }
   0x1   :  { %v19_v0 = vld [vmem:[%s317_s0] sm:$0xff] }
   0x2   :  { %22 = vadd.xlane.f32.xlu0 %v19_v0 }
   0x3   :  { %9 = vsyncpa [#allocation3], 0  ;;  %v210_v1 = vld [vmem:[%s320_s3] sm:$0xff]   ;;  %v244_v2 = vmov 0.0   ;;  %v211_v3 = vld [vmem:[%s320_s3 + $0x8] sm:$0xff]   ;;  %vm245_vm0 = vmmov 0  }
   0x4   :  { %187 = vmatprep.subr.bf16.mxu0 %v244_v2  ;;  %v212_v8 = vld [vmem:[%s320_s3 + $0x10] sm:$0xff]   ;;  %v213_v9 = vld [vmem:[%s320_s3 + $0x18] sm:$0xff]   ;;  %v214_v10 = vld [vmem:[%s320_s3 + $0x20] sm:$0xff]   ;;  %203 = vmatprep.mubr.msk.bf16.mxu0 %vm245_vm0, %v244_v2 }
   0x5   :  { %188 = vmatpush3.bf16.msra.mxu0 %v210_v1  ;;  %v215_v11 = vld [vmem:[%s320_s3 + $0x28] sm:$0xff]   ;;  %v216_v12 = vld [vmem:[%s320_s3 + $0x30] sm:$0xff]   ;;  %v217_v13 = vld [vmem:[%s320_s3 + $0x38] sm:$0xff]   ;;  %s246_s3 = smov [#allocation2]  }
   0x6   :  { %189 = vmatprep.subr.bf16.mxu0 %v244_v2  ;;  %v168_v18 = vld [vmem:[%s318_s1] ss:$0 sm:$0xff]  ;;  %s160_s10 = sshll.u32 %s246_s3, 4  ;;  %s161_s10 = int_to_ptr.vmem [resolvable:$true] %s160_s10 }
   0x7   :  { %v169_v20 = vld [vmem:[%s319_s2] ss:$0 sm:$0xff]  ;;  %s220_s11 = scalar_lea.vmem %s161_s10, 128  ;;  %p225_p1 = scmp.lt.s32.totalorder %s161_s10, %s161_s10 }
   0x8   :  { %p221_p0 = scmp.ne.s32.totalorder %s161_s10, %s220_s11  ;;  %p226_p2 = scmp.lt.s32.totalorder %s220_s11, %s220_s11 }
   0x9   :  { %190 = vmatpush3.bf16.msra.mxu0 %v211_v3 }
   0xa   :  { %191 = vmatprep.subr.bf16.mxu0 %v244_v2  ;;  %p227_p3 = por %p226_p2, %p225_p1 }
   0xc   :  { %p228_p4 = pnand %p227_p3, %p221_p0 }
   0xd   :  { %192 = vmatpush3.bf16.msra.mxu0 %v212_v8 }
   0xe   :  { %193 = vmatprep.subr.bf16.mxu0 %v244_v2 }
  0x11   :  { %194 = vmatpush3.bf16.msra.mxu0 %v213_v9 }
  0x12   :  { %195 = vmatprep.subr.bf16.mxu0 %v244_v2 }
  0x15   :  { %196 = vmatpush3.bf16.msra.mxu0 %v214_v10 }
  0x16   :  { %197 = vmatprep.subr.bf16.mxu0 %v244_v2 }
  0x19   :  { %198 = vmatpush3.bf16.msra.mxu0 %v215_v11 }
  0x1a   :  { %199 = vmatprep.subr.bf16.mxu0 %v244_v2 }
  0x1d   :  { %200 = vmatpush3.bf16.msra.mxu0 %v216_v12 }
  0x1e   :  { %201 = vmatprep.subr.bf16.mxu0 %v244_v2 }
  0x21   :  { %202 = vmatpush3.bf16.msra.mxu0 %v217_v13 }
  0x8f   :  { %v23_v4 = vpop.xlane.xlu0 %22 }
  0x90   :  { %v25_v5 = vmul.f32 0.0078125, %v23_v4 }
  0x92   :  { %v26_v6 = vsub.f32 %v19_v0, %v25_v5 }
  0x94   :  { %v27_v7 = vmul.f32 %v26_v6, %v26_v6 }
  0x96   :  { %28 = vadd.xlane.f32.xlu0 %v27_v7 }
 0x123   :  { %v29_v14 = vpop.xlane.xlu0 %28 }
 0x124   :  { %v30_v15 = vmul.f32 0.0078125, %v29_v14 }
 0x126   :  { %v31_v16 = vadd.f32 1e-05, %v30_v15 }
 0x128   :  { %218 = vrsqrt.f32 %v31_v16 }
 0x132   :  { %v219_v17 = vpop.eup %218 }
 0x133   :  { %v33_v19 = vmul.f32 %v219_v17, %v26_v6 }
 0x135   :  { %v40_v21 = vmul.f32 %v168_v18, %v33_v19 }
 0x137   :  { %v47_v22 = vadd.f32 %v169_v20, %v40_v21 }
 0x139   :  { %v48_v23 = vpack.c.bf16 %v47_v22, %v47_v22 }
 0x13b   :  { %204 = vmatmul.mubr.bf16.vlgmr.msra.gmra.mrb[0].mxu0 %v48_v23 }
 0x20e   :  { %v147_v24 = vpop.f32.mrb[0].mxu0 }
 0x20f   :  { %153 = vst [vmem:[#allocation2] sm:$0xff] %v147_v24  ;;  %v205_v25 = vpop.f32.mrb[1].mxu0 }
 0x210   :  { %v150_v26 = vpop.f32.mrb[2].mxu0 }
 0x211   :  { %231 = shalt.err (!%p228_p4)
}
 0x212   :  { %s232_s12 = scalar_lea.hbm %s321_s4, 128 }
 0x213   :  { %p233_p5 = scmp.ne.s32.totalorder %s321_s4, %s232_s12  ;;  %p236_p6 = scmp.lt.u32.totalorder %s232_s12, %s321_s4 }
 0x215   :  { %p238_p7 = pnand %p236_p6, %p233_p5 }
 0x217   :  { %241 = shalt.err (!%p238_p7)
}
 0x218   :  { %163 = dma.vmem_to_hbm [thread:$0]  %s161_s10, 128, %s321_s4, [#allocation3]   ;;  %v206_v27 = vpop.f32.mrb[3].mxu0 }
 0x219   :  { %242 = dma.done.wait [#allocation3], 128  }
 0x21a   :  { %243 = vsyncadd [#allocation3], 4294967168 }
 0x21b   :  { %167 = vsyncpa [#allocation3], 1 }

// kernel: text_encoder_forward.9
= control target key start
LH: loop header
LB: loop body
LE: loop exit
PB: predicated region body
PF: predicated region fallthrough
CT: control target
= control target key end

     0   :  { %s2771_s24 = smov 0   ;;  %s3794_s0 = inlined_call_operand.vmem [shape: f32[256,128], index: 0, kind: input, shape index: {}]   ;;  %s3795_s1 = inlined_call_operand.vmem [shape: f32[1,128], index: 1, kind: input, shape index: {}]   ;;  %s3796_s2 = inlined_call_operand.vmem [shape: f32[1,128], index: 2, kind: input, shape index: {}]   ;;  %s3797_s3 = inlined_call_operand.vmem [shape: bf16[128,512], index: 3, kind: input, shape index: {}]   ;;  %s3798_s4 = inlined_call_operand.vmem [shape: f32[1,512], index: 4, kind: input, shape index: {}]   ;;  %s3799_s5 = inlined_call_operand.vmem [shape: bf16[512,128], index: 5, kind: input, shape index: {}]   ;;  %s3800_s6 = inlined_call_operand.vmem [shape: f32[1,128], index: 6, kind: input, shape index: {}]   ;;  %s3801_s7 = inlined_call_operand.vmem [shape: f32[256,128], index: 7, kind: output, shape index: {}]  }
   0x1 LB: > { %s2059_s25 = sadd.s32 4294967295, %s2728_s24   ;;  %p2063_p0 = scmp.ge.s32.totalorder %s2728_s24, 1  ;;  %s2728_s24 = sphi %s2771_s24, %s17_s24  }
   0x2   : > { %p238_p1 = scmp.lt.s32.totalorder %s2728_s24, 3 }
   0x4   : > { %p239_p2 = pnand %p2063_p0, %p238_p1 }
   0x6   : > { %242 = sbr.rel (%p239_p2) target bundleno = 924 (0x39c), region = 48 }
   0xd   : > { %s2064_s26 = sshll.u32 %s2059_s25, 4  ;;  %v2338_v16 = vld [vmem:[%s3797_s3 + $0x4] ss:$16 sps:$4 sm:$0xff]   ;;  %v2340_v17 = vld [vmem:[%s3797_s3 + $0xc] ss:$16 sps:$4 sm:$0xff]  }
   0xe   : > { %p271_p3 = scmp.lt.s32.totalorder %s2064_s26, 31  ;;  %v2342_v18 = vld [vmem:[%s3797_s3] ss:$16 sps:$4 sm:$0xff]   ;;  %v2343_v19 = vld [vmem:[%s3797_s3 + $0x8] ss:$16 sps:$4 sm:$0xff]   ;;  %744 = vmatprep.subr.bf16.mxu0 %v2338_v16  ;;  %857 = vmatprep.subr.bf16.mxu1 %v2340_v17 }
   0xf   : > { %v2344_v20 = vld [vmem:[%s3797_s3 + $0x24] ss:$16 sps:$4 sm:$0xff]   ;;  %v2346_v21 = vld [vmem:[%s3797_s3 + $0x2c] ss:$16 sps:$4 sm:$0xff]   ;;  %745 = vmatpush1.bf16.msra.mxu0 %v2342_v18  ;;  %858 = vmatpush1.bf16.msra.mxu1 %v2343_v19  ;;  %v2348_v60 = vld [vmem:[%s3797_s3 + $0x20] ss:$16 sps:$4 sm:$0xff]  }
  0x10   : > { %s3867_s26 = smov (!%p271_p3, %s2064_s26), 31  ;;  %746 = vmatprep.subr.bf16.mxu0 %v2344_v20  ;;  %859 = vmatprep.subr.bf16.mxu1 %v2346_v21  ;;  %v2349_v61 = vld [vmem:[%s3797_s3 + $0x28] ss:$16 sps:$4 sm:$0xff]   ;;  %v2354_v16 = vld [vmem:[%s3797_s3 + $0x40] ss:$16 sps:$4 sm:$0xff]  }
  0x11   : > { %s2065_s27 = sshll.u32 %s3867_s26, 3 }
  0x12   : > { %s2787_s30 = scalar_lea.vmem %s3794_s0, %s2065_s27  ;;  %s3743_s13 = scalar_lea.vmem %s3801_s7, %s2065_s27 }
  0x13   : > { %v283_v0 = vld [vmem:[%s2787_s30] sm:$0xff]  ;;  %v285_v1 = vld [vmem:[%s2787_s30 + $0x10] sm:$0xff]  ;;  %v284_v2 = vld [vmem:[%s2787_s30 + $0x8] sm:$0xff]  ;;  %747 = vmatpush1.bf16.msra.mxu0 %v2348_v60  ;;  %860 = vmatpush1.bf16.msra.mxu1 %v2349_v61 }
  0x14   : > { %301 = vadd.xlane.f32.xlu0 %v283_v0  ;;  %305 = vadd.xlane.f32.xlu1 %v285_v1  ;;  %v286_v3 = vld [vmem:[%s2787_s30 + $0x18] sm:$0xff]  ;;  %v287_v4 = vld [vmem:[%s2787_s30 + $0x20] sm:$0xff]  ;;  %v288_v5 = vld [vmem:[%s2787_s30 + $0x28] sm:$0xff] }
  0x15   : > { %v2796_v6 = vld [vmem:[%s2787_s30 + $0x30] sm:$0xff]  ;;  %v2799_v7 = vld [vmem:[%s2787_s30 + $0x38] sm:$0xff]  ;;  %v2802_v8 = vld [vmem:[%s2787_s30 + $0x40] sm:$0xff] }
  0x16   : > { %v2805_v9 = vld [vmem:[%s2787_s30 + $0x48] sm:$0xff]  ;;  %v2810_v10 = vld [vmem:[%s2787_s30 + $0x50] sm:$0xff]  ;;  %v2813_v11 = vld [vmem:[%s2787_s30 + $0x58] sm:$0xff] }
  0x17   : > { %v2818_v12 = vld [vmem:[%s2787_s30 + $0x60] sm:$0xff]  ;;  %v2821_v13 = vld [vmem:[%s2787_s30 + $0x68] sm:$0xff]  ;;  %v2826_v14 = vld [vmem:[%s2787_s30 + $0x70] sm:$0xff] }
  0x18   : > { %303 = vadd.xlane.f32.xlu0 %v284_v2  ;;  %307 = vadd.xlane.f32.xlu1 %v286_v3  ;;  %v2829_v15 = vld [vmem:[%s2787_s30 + $0x78] sm:$0xff]  ;;  %v2388_v60 = vld [vmem:[%s3799_s5 + $0xc0] sm:$0xff]  }
  0x1c   : > { %309 = vadd.xlane.f32.xlu0 %v287_v4  ;;  %311 = vadd.xlane.f32.xlu1 %v288_v5 }
  0x20   : > { %313 = vadd.xlane.f32.xlu0 %v2796_v6  ;;  %315 = vadd.xlane.f32.xlu1 %v2799_v7 }
  0x24   : > { %317 = vadd.xlane.f32.xlu0 %v2802_v8  ;;  %319 = vadd.xlane.f32.xlu1 %v2805_v9 }
  0x28   : > { %321 = vadd.xlane.f32.xlu0 %v2810_v10  ;;  %323 = vadd.xlane.f32.xlu1 %v2813_v11 }
  0x2c   : > { %325 = vadd.xlane.f32.xlu0 %v2818_v12  ;;  %327 = vadd.xlane.f32.xlu1 %v2821_v13 }
  0x30   : > { %329 = vadd.xlane.f32.xlu0 %v2826_v14  ;;  %331 = vadd.xlane.f32.xlu1 %v2829_v15 }
  0xa1   : > { %v302_v22 = vpop.xlane.xlu0 %301  ;;  %v306_v23 = vpop.xlane.xlu1 %305 }
  0xa2   : > { %v334_v24 = vmul.f32 0.0078125, %v302_v22  ;;  %v336_v25 = vmul.f32 0.0078125, %v306_v23  ;;  %v2356_v22 = vld [vmem:[%s3797_s3 + $0x64] ss:$16 sps:$4 sm:$0xff]   ;;  %v2358_v23 = vld [vmem:[%s3797_s3 + $0x6c] ss:$16 sps:$4 sm:$0xff]  }
  0xa4   : > { %v2853_v26 = vsub.f32 %v283_v0, %v334_v24  ;;  %v2855_v27 = vsub.f32 %v285_v1, %v336_v25 }
  0xa5   : > { %v304_v28 = vpop.xlane.xlu0 %303  ;;  %v308_v29 = vpop.xlane.xlu1 %307 }
  0xa6   : > { %v335_v30 = vmul.f32 0.0078125, %v304_v28  ;;  %v366_v31 = vmul.f32 %v2853_v26, %v2853_v26  ;;  %v337_v32 = vmul.f32 0.0078125, %v308_v29  ;;  %v368_v35 = vmul.f32 %v2855_v27, %v2855_v27 }
  0xa8   : > { %v2859_v33 = vsub.f32 %v284_v2, %v335_v30  ;;  %382 = vadd.xlane.f32.xlu0 %v366_v31  ;;  %v2861_v34 = vsub.f32 %v286_v3, %v337_v32  ;;  %v2350_v3 = vld [vmem:[%s3797_s3 + $0x44] ss:$16 sps:$4 sm:$0xff]  }
  0xa9   : > { %v310_v36 = vpop.xlane.xlu0 %309  ;;  %v312_v37 = vpop.xlane.xlu1 %311  ;;  %748 = vmatprep.subr.bf16.mxu0 %v2350_v3 }
  0xaa   : > { %v338_v38 = vmul.f32 0.0078125, %v310_v36  ;;  %v367_v39 = vmul.f32 %v2859_v33, %v2859_v33  ;;  %v339_v40 = vmul.f32 0.0078125, %v312_v37  ;;  %v369_v43 = vmul.f32 %v2861_v34, %v2861_v34  ;;  %749 = vmatpush1.bf16.msra.mxu0 %v2354_v16  ;;  %v2362_v36 = vld [vmem:[%s3797_s3 + $0x84] ss:$16 sps:$4 sm:$0xff]   ;;  %v2364_v37 = vld [vmem:[%s3797_s3 + $0x8c] ss:$16 sps:$4 sm:$0xff]  }
  0xab   : > { %750 = vmatprep.subr.bf16.mxu0 %v2356_v22 }
  0xac   : > { %v2867_v41 = vsub.f32 %v287_v4, %v338_v38  ;;  %386 = vadd.xlane.f32.xlu0 %v368_v35  ;;  %384 = vadd.xlane.f32.xlu1 %v367_v39  ;;  %v2869_v42 = vsub.f32 %v288_v5, %v339_v40  ;;  %v2352_v4 = vld [vmem:[%s3797_s3 + $0x4c] ss:$16 sps:$4 sm:$0xff]   ;;  %v2368_v40 = vld [vmem:[%s3797_s3 + $0xa4] ss:$16 sps:$4 sm:$0xff]  }
  0xad   : > { %v314_v44 = vpop.xlane.xlu0 %313  ;;  %v316_v45 = vpop.xlane.xlu1 %315  ;;  %861 = vmatprep.subr.bf16.mxu1 %v2352_v4 }
  0xae   : > { %v340_v46 = vmul.f32 0.0078125, %v314_v44  ;;  %v370_v47 = vmul.f32 %v2867_v41, %v2867_v41  ;;  %v341_v48 = vmul.f32 0.0078125, %v316_v45  ;;  %v371_v51 = vmul.f32 %v2869_v42, %v2869_v42  ;;  %v2372_v44 = vld [vmem:[%s3797_s3 + $0xa0] ss:$16 sps:$4 sm:$0xff]   ;;  %v2373_v45 = vld [vmem:[%s3797_s3 + $0xa8] ss:$16 sps:$4 sm:$0xff]  }
  0xb0   : > { %v2876_v49 = vsub.f32 %v2796_v6, %v340_v46  ;;  %388 = vadd.xlane.f32.xlu1 %v369_v43  ;;  %390 = vadd.xlane.f32.xlu0 %v370_v47  ;;  %v2879_v50 = vsub.f32 %v2799_v7, %v341_v48  ;;  %v2370_v43 = vld [vmem:[%s3797_s3 + $0xac] ss:$16 sps:$4 sm:$0xff]   ;;  %v2374_v46 = vld [vmem:[%s3797_s3 + $0xc4] ss:$16 sps:$4 sm:$0xff]   ;;  %v2378_v48 = vld [vmem:[%s3797_s3 + $0xc0] ss:$16 sps:$4 sm:$0xff]  }
  0xb1   : > { %v318_v52 = vpop.xlane.xlu0 %317  ;;  %v320_v53 = vpop.xlane.xlu1 %319  ;;  %v2376_v47 = vld [vmem:[%s3797_s3 + $0xcc] ss:$16 sps:$4 sm:$0xff]  }
  0xb2   : > { %v342_v54 = vmul.f32 0.0078125, %v318_v52  ;;  %v372_v55 = vmul.f32 %v2876_v49, %v2876_v49  ;;  %v343_v56 = vmul.f32 0.0078125, %v320_v53  ;;  %v373_v59 = vmul.f32 %v2879_v50, %v2879_v50  ;;  %v2380_v52 = vld [vmem:[%s3797_s3 + $0xe4] ss:$16 sps:$4 sm:$0xff]   ;;  %v2382_v53 = vld [vmem:[%s3797_s3 + $0xec] ss:$16 sps:$4 sm:$0xff]  }
  0xb4   : > { %v2886_v57 = vsub.f32 %v2802_v8, %v342_v54  ;;  %392 = vadd.xlane.f32.xlu1 %v371_v51  ;;  %394 = vadd.xlane.f32.xlu0 %v372_v55  ;;  %v2889_v58 = vsub.f32 %v2805_v9, %v343_v56  ;;  %v2379_v51 = vld [vmem:[%s3797_s3 + $0xc8] ss:$16 sps:$4 sm:$0xff]   ;;  %v2384_v54 = vld [vmem:[%s3797_s3 + $0xe0] ss:$16 sps:$4 sm:$0xff]   ;;  %v2730_v56 = vmov 0  }
  0xb5   : > { %v322_v62 = vpop.xlane.xlu0 %321  ;;  %v324_v63 = vpop.xlane.xlu1 %323  ;;  %v2385_v55 = vld [vmem:[%s3797_s3 + $0xe8] ss:$16 sps:$4 sm:$0xff]   ;;  %776 = vmatprep.mubr.bf16.mxu0 %v2730_v56  ;;  %889 = vmatprep.mubr.bf16.mxu1 %v2730_v56 }
  0xb6   : > { %v344_v0 = vmul.f32 0.0078125, %v322_v62  ;;  %v374_v1 = vmul.f32 %v2886_v57, %v2886_v57  ;;  %v345_v2 = vmul.f32 0.0078125, %v324_v63  ;;  %v375_v7 = vmul.f32 %v2889_v58, %v2889_v58 }
  0xb8   : > { %v2908_v5 = vsub.f32 %v2810_v10, %v344_v0  ;;  %396 = vadd.xlane.f32.xlu1 %v373_v59  ;;  %398 = vadd.xlane.f32.xlu0 %v374_v1  ;;  %v2911_v6 = vsub.f32 %v2813_v11, %v345_v2  ;;  %v2355_v10 = vld [vmem:[%s3797_s3 + $0x48] ss:$16 sps:$4 sm:$0xff]   ;;  %v2386_v59 = vld [vmem:[%s3799_s5 + $0x40] sm:$0xff]  }
  0xb9   : > { %v326_v8 = vpop.xlane.xlu0 %325  ;;  %v328_v9 = vpop.xlane.xlu1 %327  ;;  %862 = vmatpush1.bf16.msra.mxu1 %v2355_v10 }
  0xba   : > { %v346_v17 = vmul.f32 0.0078125, %v326_v8  ;;  %v376_v11 = vmul.f32 %v2908_v5, %v2908_v5  ;;  %v347_v18 = vmul.f32 0.0078125, %v328_v9  ;;  %v377_v21 = vmul.f32 %v2911_v6, %v2911_v6  ;;  %863 = vmatprep.subr.bf16.mxu1 %v2358_v23 }
  0xbc   : > { %v2924_v19 = vsub.f32 %v2818_v12, %v346_v17  ;;  %400 = vadd.xlane.f32.xlu1 %v375_v7  ;;  %402 = vadd.xlane.f32.xlu0 %v376_v11  ;;  %v2927_v20 = vsub.f32 %v2821_v13, %v347_v18  ;;  %v2360_v12 = vld [vmem:[%s3797_s3 + $0x60] ss:$16 sps:$4 sm:$0xff]   ;;  %v2361_v13 = vld [vmem:[%s3797_s3 + $0x68] ss:$16 sps:$4 sm:$0xff]  }
  0xbd   : > { %v330_v24 = vpop.xlane.xlu0 %329  ;;  %v332_v25 = vpop.xlane.xlu1 %331  ;;  %751 = vmatpush1.bf16.msra.mxu0 %v2360_v12  ;;  %864 = vmatpush1.bf16.msra.mxu1 %v2361_v13 }
  0xbe   : > { %v348_v28 = vmul.f32 0.0078125, %v330_v24  ;;  %v378_v29 = vmul.f32 %v2924_v19, %v2924_v19  ;;  %v349_v30 = vmul.f32 0.0078125, %v332_v25  ;;  %v379_v35 = vmul.f32 %v2927_v20, %v2927_v20  ;;  %752 = vmatprep.subr.bf16.mxu0 %v2362_v36  ;;  %865 = vmatprep.subr.bf16.mxu1 %v2364_v37 }
  0xc0   : > { %v2946_v31 = vsub.f32 %v2826_v14, %v348_v28  ;;  %404 = vadd.xlane.f32.xlu1 %v377_v21  ;;  %406 = vadd.xlane.f32.xlu0 %v378_v29  ;;  %v2949_v32 = vsub.f32 %v2829_v15, %v349_v30  ;;  %v2366_v14 = vld [vmem:[%s3797_s3 + $0x80] ss:$16 sps:$4 sm:$0xff]   ;;  %v2367_v15 = vld [vmem:[%s3797_s3 + $0x88] ss:$16 sps:$4 sm:$0xff]  }
  0xc1   : > { %753 = vmatpush1.bf16.msra.mxu0 %v2366_v14  ;;  %866 = vmatpush1.bf16.msra.mxu1 %v2367_v15  ;;  %v3017_v28 = vld [vmem:[%s3795_s1] ss:$0 sm:$0xff] }
  0xc2   : > { %v380_v38 = vmul.f32 %v2946_v31, %v2946_v31  ;;  %v381_v39 = vmul.f32 %v2949_v32, %v2949_v32  ;;  %754 = vmatprep.subr.bf16.mxu0 %v2368_v40  ;;  %867 = vmatprep.subr.bf16.mxu1 %v2370_v43 }
  0xc4   : > { %408 = vadd.xlane.f32.xlu1 %v379_v35  ;;  %410 = vadd.xlane.f32.xlu0 %v380_v38 }
  0xc5   : > { %755 = vmatpush1.bf16.msra.mxu0 %v2372_v44  ;;  %868 = vmatpush1.bf16.msra.mxu1 %v2373_v45 }
  0xc6   : > { %756 = vmatprep.subr.bf16.mxu0 %v2374_v46  ;;  %869 = vmatprep.subr.bf16.mxu1 %v2376_v47 }
  0xc8   : > { %412 = vadd.xlane.f32.xlu1 %v381_v39 }
  0xc9   : > { %757 = vmatpush1.bf16.msra.mxu0 %v2378_v48  ;;  %870 = vmatpush1.bf16.msra.mxu1 %v2379_v51 }
  0xca   : > { %758 = vmatprep.subr.bf16.mxu0 %v2380_v52  ;;  %871 = vmatprep.subr.bf16.mxu1 %v2382_v53  ;;  %v2387_v52 = vld [vmem:[%s3799_s5] sm:$0xff]  }
  0xcb   : > { %v2389_v53 = vld [vmem:[%s3799_s5 + $0x80] sm:$0xff]  }
  0xcd   : > { %759 = vmatpush1.bf16.msra.mxu0 %v2384_v54  ;;  %872 = vmatpush1.bf16.msra.mxu1 %v2385_v55 }
  0xce   : > { %2201 = vmatprep.subr.bf16.mxu0 %v2386_v59  ;;  %2265 = vmatprep.subr.bf16.mxu1 %v2388_v60 }
 0x135   : > { %v383_v61 = vpop.xlane.xlu0 %382 }
 0x136   : > { %v414_v62 = vmul.f32 0.0078125, %v383_v61 }
 0x138   : > { %v430_v63 = vadd.f32 1e-05, %v414_v62 }
 0x139   : > { %v385_v0 = vpop.xlane.xlu1 %384  ;;  %v387_v1 = vpop.xlane.xlu0 %386 }
 0x13a   : > { %2418 = vrsqrt.f32 %v430_v63  ;;  %v415_v2 = vmul.f32 0.0078125, %v385_v0  ;;  %v416_v3 = vmul.f32 0.0078125, %v387_v1  ;;  %v2391_v1 = vld [vmem:[%s3799_s5 + $0x8] sm:$0xff]  }
 0x13c   : > { %v431_v4 = vadd.f32 1e-05, %v415_v2  ;;  %v432_v7 = vadd.f32 1e-05, %v416_v3  ;;  %v2393_v2 = vld [vmem:[%s3799_s5 + $0x88] sm:$0xff]  }
 0x13d   : > { %v389_v8 = vpop.xlane.xlu1 %388  ;;  %v391_v9 = vpop.xlane.xlu0 %390 }
 0x13e   : > { %2420 = vrsqrt.f32 %v431_v4  ;;  %v417_v16 = vmul.f32 0.0078125, %v389_v8  ;;  %v418_v17 = vmul.f32 0.0078125, %v391_v9  ;;  %v2394_v4 = vld [vmem:[%s3799_s5 + $0x50] sm:$0xff]  }
 0x13f   : > { %2422 = vrsqrt.f32 %v432_v7 }
 0x140   : > { %v433_v10 = vadd.f32 1e-05, %v417_v16  ;;  %v434_v22 = vadd.f32 1e-05, %v418_v17 }
 0x141   : > { %v393_v11 = vpop.xlane.xlu1 %392  ;;  %v395_v24 = vpop.xlane.xlu0 %394 }
 0x142   : > { %2424 = vrsqrt.f32 %v433_v10  ;;  %v419_v18 = vmul.f32 0.0078125, %v393_v11  ;;  %v420_v30 = vmul.f32 0.0078125, %v395_v24  ;;  %v2395_v11 = vld [vmem:[%s3799_s5 + $0x10] sm:$0xff]  }
 0x144   : > { %v2419_v21 = vpop.eup %2418  ;;  %v435_v23 = vadd.f32 1e-05, %v419_v18  ;;  %v436_v40 = vadd.f32 1e-05, %v420_v30  ;;  %v2397_v18 = vld [vmem:[%s3799_s5 + $0x90] sm:$0xff]   ;;  %v2399_v30 = vld [vmem:[%s3799_s5 + $0x18] sm:$0xff]  }
 0x145   : > { %v397_v25 = vpop.xlane.xlu1 %396  ;;  %v462_v12 = vmul.f32 %v2419_v21, %v2853_v26  ;;  %v3024_v26 = vld [vmem:[%s3796_s2] ss:$0 sm:$0xff]  ;;  %v399_v43 = vpop.xlane.xlu0 %398 }
 0x146   : > { %2426 = vrsqrt.f32 %v435_v23  ;;  %v421_v13 = vmul.f32 0.0078125, %v397_v25  ;;  %v422_v55 = vmul.f32 0.0078125, %v399_v43 }
 0x147   : > { %2428 = vrsqrt.f32 %v434_v22  ;;  %v484_v36 = vmul.f32 %v3017_v28, %v462_v12 }
 0x148   : > { %v2421_v29 = vpop.eup %2420  ;;  %v437_v14 = vadd.f32 1e-05, %v421_v13  ;;  %v438_v3 = vadd.f32 1e-05, %v422_v55 }
 0x149   : > { %v463_v35 = vmul.f32 %v2421_v29, %v2859_v33  ;;  %v2423_v37 = vpop.eup %2422  ;;  %v401_v15 = vpop.xlane.xlu1 %400  ;;  %v506_v44 = vadd.f32 %v3024_v26, %v484_v36 }
 0x14a   : > { %v464_v33 = vmul.f32 %v2423_v37, %v2855_v27  ;;  %2430 = vrsqrt.f32 %v437_v14  ;;  %v423_v47 = vmul.f32 0.0078125, %v401_v15  ;;  %v2390_v27 = vld [vmem:[%s3799_s5 + $0x48] sm:$0xff]   ;;  %v403_v7 = vpop.xlane.xlu0 %402 }
 0x14b   : > { %v485_v38 = vmul.f32 %v3017_v28, %v463_v35  ;;  %2432 = vrsqrt.f32 %v436_v40  ;;  %v424_v22 = vmul.f32 0.0078125, %v403_v7 }
 0x14c   : > { %v2425_v39 = vpop.eup %2424  ;;  %v486_v59 = vmul.f32 %v3017_v28, %v464_v33  ;;  %v439_v61 = vadd.f32 1e-05, %v423_v47 }
 0x14d   : > { %v507_v45 = vadd.f32 %v3024_v26, %v485_v38  ;;  %v465_v46 = vmul.f32 %v2425_v39, %v2861_v34  ;;  %v2392_v34 = vld [vmem:[%s3799_s5 + $0xc8] sm:$0xff]   ;;  %v405_v62 = vpop.xlane.xlu1 %404  ;;  %v440_v35 = vadd.f32 1e-05, %v424_v22 }
 0x14e   : > { %v508_v8 = vadd.f32 %v3024_v26, %v486_v59  ;;  %2434 = vrsqrt.f32 %v439_v61  ;;  %v425_v16 = vmul.f32 0.0078125, %v405_v62  ;;  %v407_v36 = vpop.xlane.xlu0 %406 }
 0x14f   : > { %v522_v48 = vpack.c.bf16 %v507_v45, %v506_v44  ;;  %v487_v51 = vmul.f32 %v3017_v28, %v465_v46  ;;  %2436 = vrsqrt.f32 %v438_v3  ;;  %v426_v40 = vmul.f32 0.0078125, %v407_v36  ;;  %v2409_v36 = vld [vmem:[%s3799_s5 + $0xa8] sm:$0xff]  }
 0x150   : > { %v2427_v54 = vpop.eup %2426  ;;  %v441_v25 = vadd.f32 1e-05, %v425_v16 }
 0x151   : > { %777 = vmatmul.mubr.bf16.vlgmr.msra.gmra.mrb[0].mxu0 %v522_v48  ;;  %890 = vmatmul.mubr.bf16.vlgmr.msra.gmra.mrb[0].mxu1 %v522_v48  ;;  %v2429_v60 = vpop.eup %2428  ;;  %v509_v63 = vadd.f32 %v3024_v26, %v487_v51  ;;  %v467_v0 = vmul.f32 %v2427_v54, %v2869_v42  ;;  %v2396_v42 = vld [vmem:[%s3799_s5 + $0xd0] sm:$0xff]   ;;  %v409_v12 = vpop.xlane.xlu1 %408  ;;  %v442_v47 = vadd.f32 1e-05, %v426_v40  ;;  %v2415_v40 = vld [vmem:[%s3799_s5 + $0x38] sm:$0xff]  }
 0x152   : > { %786 = vmatprep.mubr.bf16.mxu0 %v2730_v56  ;;  %899 = vmatprep.mubr.bf16.mxu1 %v2730_v56  ;;  %v466_v9 = vmul.f32 %v2429_v60, %v2867_v41  ;;  %v2398_v41 = vld [vmem:[%s3799_s5 + $0x58] sm:$0xff]   ;;  %2438 = vrsqrt.f32 %v441_v25  ;;  %v427_v15 = vmul.f32 0.0078125, %v409_v12  ;;  %v411_v48 = vpop.xlane.xlu0 %410 }
 0x153   : > { %2202 = vmatpush3.bf16.msra.mxu0 %v2387_v52  ;;  %2266 = vmatpush3.bf16.msra.mxu1 %v2389_v53  ;;  %v523_v10 = vpack.c.bf16 %v509_v63, %v508_v8  ;;  %v489_v17 = vmul.f32 %v3017_v28, %v467_v0  ;;  %2440 = vrsqrt.f32 %v440_v35  ;;  %v2401_v12 = vld [vmem:[%s3799_s5 + $0x98] sm:$0xff]   ;;  %v2407_v35 = vld [vmem:[%s3799_s5 + $0x28] sm:$0xff]  }
 0x154   : > { %2203 = vmatprep.subr.bf16.mxu0 %v2390_v27  ;;  %2267 = vmatprep.subr.bf16.mxu1 %v2392_v34  ;;  %v2431_v21 = vpop.eup %2430  ;;  %v488_v23 = vmul.f32 %v3017_v28, %v466_v9  ;;  %v443_v45 = vadd.f32 1e-05, %v427_v15  ;;  %v428_v34 = vmul.f32 0.0078125, %v411_v48  ;;  %v2411_v15 = vld [vmem:[%s3799_s5 + $0x30] sm:$0xff]  }
 0x155   : > { %v2433_v24 = vpop.eup %2432  ;;  %v511_v13 = vadd.f32 %v3024_v26, %v489_v17  ;;  %v469_v29 = vmul.f32 %v2431_v21, %v2879_v50 }
 0x156   : > { %v510_v37 = vadd.f32 %v3024_v26, %v488_v23  ;;  %v468_v14 = vmul.f32 %v2433_v24, %v2876_v49  ;;  %v413_v49 = vpop.xlane.xlu1 %412  ;;  %2442 = vrsqrt.f32 %v443_v45  ;;  %v444_v62 = vadd.f32 1e-05, %v428_v34 }
 0x157   : > { %2204 = vmatpush3.bf16.msra.mxu0 %v2391_v1  ;;  %2268 = vmatpush3.bf16.msra.mxu1 %v2393_v2  ;;  %v491_v39 = vmul.f32 %v3017_v28, %v469_v29  ;;  %v429_v53 = vmul.f32 0.0078125, %v413_v49  ;;  %2444 = vrsqrt.f32 %v442_v47  ;;  %v2406_v29 = vld [vmem:[%s3799_s5 + $0x68] sm:$0xff]  }
 0x158   : > { %2205 = vmatprep.subr.bf16.mxu0 %v2394_v4  ;;  %2269 = vmatprep.subr.bf16.mxu1 %v2396_v42  ;;  %v524_v38 = vpack.c.bf16 %v511_v13, %v510_v37  ;;  %v2435_v50 = vpop.eup %2434  ;;  %v490_v43 = vmul.f32 %v3017_v28, %v468_v14  ;;  %v2405_v13 = vld [vmem:[%s3799_s5 + $0xa0] sm:$0xff]   ;;  %v2410_v37 = vld [vmem:[%s3799_s5 + $0x70] sm:$0xff]  }
 0x159   : > { %787 = vmatmul.mubr.bf16.gmra.mrb[4].mxu0 %v523_v10  ;;  %900 = vmatmul.mubr.bf16.gmra.mrb[4].mxu1 %v523_v10  ;;  %v2437_v44 = vpop.eup %2436  ;;  %v513_v33 = vadd.f32 %v3024_v26, %v491_v39  ;;  %v471_v46 = vmul.f32 %v2435_v50, %v2889_v58  ;;  %v445_v58 = vadd.f32 1e-05, %v429_v53  ;;  %v2412_v14 = vld [vmem:[%s3799_s5 + $0xf0] sm:$0xff]   ;;  %v2414_v39 = vld [vmem:[%s3799_s5 + $0x78] sm:$0xff]  }
 0x15a   : > { %796 = vmatprep.mubr.bf16.mxu0 %v2730_v56  ;;  %909 = vmatprep.mubr.bf16.mxu1 %v2730_v56  ;;  %v512_v51 = vadd.f32 %v3024_v26, %v490_v43  ;;  %v470_v52 = vmul.f32 %v2437_v44, %v2886_v57  ;;  %v2416_v50 = vld [vmem:[%s3799_s5 + $0xf8] sm:$0xff]   ;;  %v564_v44 = vlaneseq }
 0x15b   : > { %2206 = vmatpush3.bf16.msra.mxu0 %v2395_v11  ;;  %2270 = vmatpush3.bf16.msra.mxu1 %v2397_v18  ;;  %v493_v55 = vmul.f32 %v3017_v28, %v471_v46  ;;  %2446 = vrsqrt.f32 %v445_v58  ;;  %v2417_v43 = vld [vmem:[%s3799_s5 + $0xb8] sm:$0xff]   ;;  %v562_v46 = vld [vmem:[%s3798_s4] sm:$0xf] }
 0x15c   : > { %2207 = vmatprep.subr.bf16.mxu0 %v2398_v41  ;;  %v525_v54 = vpack.c.bf16 %v513_v33, %v512_v51  ;;  %v2439_v27 = vpop.eup %2438  ;;  %v492_v59 = vmul.f32 %v3017_v28, %v470_v52  ;;  %2448 = vrsqrt.f32 %v444_v62  ;;  %v565_v45 = vshrl.u32 %v564_v44, 7 }
 0x15d   : > { %v2441_v60 = vpop.eup %2440  ;;  %v515_v57 = vadd.f32 %v3024_v26, %v493_v55  ;;  %v473_v61 = vmul.f32 %v2439_v27, %v2911_v6 }
 0x15e   : > { %v514_v63 = vadd.f32 %v3024_v26, %v492_v59  ;;  %v472_v0 = vmul.f32 %v2441_v60, %v2908_v5  ;;  %v566_v49 = vsub.s32 0, %v565_v45  ;;  %v574_v33 = vsub.s32 2, %v565_v45 }
 0x15f   : > { %2208 = vmatpush3.bf16.msra.mxu0 %v2399_v30  ;;  %v495_v2 = vmul.f32 %v3017_v28, %v473_v61  ;;  %v2408_v30 = vld [vmem:[%s3799_s5 + $0xe8] sm:$0xff]   ;;  %v570_v47 = vsub.s32 1, %v565_v45  ;;  %v578_v48 = vsub.s32 3, %v565_v45 }
 0x160   : > { %v526_v1 = vpack.c.bf16 %v515_v57, %v514_v63  ;;  %v2443_v3 = vpop.eup %2442  ;;  %v494_v4 = vmul.f32 %v3017_v28, %v472_v0  ;;  %v3178_v51 = vrot.slane %v562_v46, %v566_v49  ;;  %v3180_v52 = vrot.slane %v562_v46, %v574_v33 }
 0x161   : > { %797 = vmatmul.mubr.bf16.gmra.mrb[8].mxu0 %v524_v38  ;;  %910 = vmatmul.mubr.bf16.gmra.mrb[8].mxu1 %v524_v38  ;;  %v2445_v42 = vpop.eup %2444  ;;  %v517_v6 = vadd.f32 %v3024_v26, %v495_v2  ;;  %v475_v7 = vmul.f32 %v2443_v3, %v2927_v20  ;;  %v2413_v38 = vld [vmem:[%s3799_s5 + $0xb0] sm:$0xff]   ;;  %v3182_v53 = vrot.slane %v562_v46, %v570_v47 }
 0x162   : > { %806 = vmatprep.mubr.bf16.mxu0 %v2730_v56  ;;  %919 = vmatprep.mubr.bf16.mxu1 %v2730_v56  ;;  %v516_v5 = vadd.f32 %v3024_v26, %v494_v4  ;;  %v474_v8 = vmul.f32 %v2445_v42, %v2924_v19 }
 0x163   : > { %v497_v16 = vmul.f32 %v3017_v28, %v475_v7 }
 0x164   : > { %v527_v9 = vpack.c.bf16 %v517_v6, %v516_v5  ;;  %v496_v17 = vmul.f32 %v3017_v28, %v474_v8 }
 0x165   : > { %v2447_v10 = vpop.eup %2446  ;;  %v519_v18 = vadd.f32 %v3024_v26, %v497_v16 }
 0x166   : > { %v2449_v11 = vpop.eup %2448  ;;  %v477_v20 = vmul.f32 %v2447_v10, %v2949_v32  ;;  %v518_v21 = vadd.f32 %v3024_v26, %v496_v17 }
 0x167   : > { %v476_v19 = vmul.f32 %v2449_v11, %v2946_v31  ;;  %v2400_v31 = vld [vmem:[%s3799_s5 + $0xd8] sm:$0xff]  }
 0x168   : > { %v528_v22 = vpack.c.bf16 %v519_v18, %v518_v21  ;;  %v499_v41 = vmul.f32 %v3017_v28, %v477_v20  ;;  %2271 = vmatprep.subr.bf16.mxu1 %v2400_v31 }
 0x169   : > { %807 = vmatmul.mubr.bf16.gmra.mrb[12].mxu0 %v525_v54  ;;  %920 = vmatmul.mubr.bf16.gmra.mrb[12].mxu1 %v525_v54  ;;  %v498_v23 = vmul.f32 %v3017_v28, %v476_v19  ;;  %v2404_v28 = vld [vmem:[%s3799_s5 + $0xe0] sm:$0xff]   ;;  %v3184_v54 = vrot.slane %v562_v46, %v578_v48 }
 0x16a   : > { %816 = vmatprep.mubr.bf16.mxu0 %v2730_v56  ;;  %929 = vmatprep.mubr.bf16.mxu1 %v2730_v56  ;;  %v521_v24 = vadd.f32 %v3024_v26, %v499_v41 }
 0x16b   : > { %v520_v25 = vadd.f32 %v3024_v26, %v498_v23  ;;  %2272 = vmatpush3.bf16.msra.mxu1 %v2401_v12  ;;  %v2403_v26 = vld [vmem:[%s3799_s5 + $0x20] sm:$0xff]  }
 0x16c   : > { %2273 = vmatprep.subr.bf16.mxu1 %v2404_v28 }
 0x16d   : > { %v529_v32 = vpack.c.bf16 %v521_v24, %v520_v25 }
 0x16f   : > { %2274 = vmatpush3.bf16.msra.mxu1 %v2405_v13 }
 0x170   : > { %2275 = vmatprep.subr.bf16.mxu1 %v2408_v30 }
 0x171   : > { %817 = vmatmul.mubr.bf16.gmra.mrb[16].mxu0 %v526_v1  ;;  %930 = vmatmul.mubr.bf16.gmra.mrb[16].mxu1 %v526_v1 }
 0x172   : > { %826 = vmatprep.mubr.bf16.mxu0 %v2730_v56  ;;  %939 = vmatprep.mubr.bf16.mxu1 %v2730_v56 }
 0x173   : > { %2276 = vmatpush3.bf16.msra.mxu1 %v2409_v36 }
 0x174   : > { %2277 = vmatprep.subr.bf16.mxu1 %v2412_v14 }
 0x177   : > { %2278 = vmatpush3.bf16.msra.mxu1 %v2413_v38 }
 0x178   : > { %2279 = vmatprep.subr.bf16.mxu1 %v2416_v50 }
 0x179   : > { %827 = vmatmul.mubr.bf16.gmra.mrb[20].mxu0 %v527_v9  ;;  %940 = vmatmul.mubr.bf16.gmra.mrb[20].mxu1 %v527_v9 }
 0x17a   : > { %836 = vmatprep.mubr.bf16.mxu0 %v2730_v56  ;;  %949 = vmatprep.mubr.bf16.mxu1 %v2730_v56 }
 0x17b   : > { %2280 = vmatpush3.bf16.msra.mxu1 %v2417_v43 }
 0x181   : > { %837 = vmatmul.mubr.bf16.gmra.mrb[24].mxu0 %v528_v22  ;;  %950 = vmatmul.mubr.bf16.gmra.mrb[24].mxu1 %v528_v22 }
 0x182   : > { %846 = vmatprep.mubr.bf16.mxu0 %v2730_v56  ;;  %959 = vmatprep.mubr.bf16.mxu1 %v2730_v56  ;;  %v2402_v56 = vld [vmem:[%s3799_s5 + $0x60] sm:$0xff]  }
 0x183   : > { %2209 = vmatprep.subr.bf16.mxu0 %v2402_v56 }
 0x184   : > { %2210 = vmatpush3.bf16.msra.mxu0 %v2403_v26 }
 0x185   : > { %2211 = vmatprep.subr.bf16.mxu0 %v2406_v29 }
 0x188   : > { %2212 = vmatpush3.bf16.msra.mxu0 %v2407_v35 }
 0x189   : > { %847 = vmatmul.mubr.bf16.gmra.mrb[28].mxu0 %v529_v32  ;;  %960 = vmatmul.mubr.bf16.gmra.mrb[28].mxu1 %v529_v32 }
 0x18a   : > { %2213 = vmatprep.subr.bf16.mxu0 %v2410_v37 }
 0x18c   : > { %2214 = vmatpush3.bf16.msra.mxu0 %v2411_v15 }
 0x18d   : > { %2215 = vmatprep.subr.bf16.mxu0 %v2414_v39 }
 0x190   : > { %2216 = vmatpush3.bf16.msra.mxu0 %v2415_v40 }
 0x224   : > { %v778_v55 = vpop.f32.mrb[0].mxu0  ;;  %v891_v27 = vpop.f32.mrb[0].mxu1 }
 0x225   : > { %v3187_v34 = vadd.f32 %v778_v55, %v3178_v51  ;;  %v3190_v59 = vadd.f32 %v891_v27, %v3180_v52  ;;  %v780_v60 = vpop.f32.mrb[1].mxu0  ;;  %v893_v58 = vpop.f32.mrb[1].mxu1 }
 0x226   : > { %v3193_v57 = vadd.f32 %v780_v60, %v3182_v53  ;;  %v3196_v61 = vadd.f32 %v893_v58, %v3184_v54  ;;  %v782_v62 = vpop.f32.mrb[2].mxu0  ;;  %v895_v63 = vpop.f32.mrb[2].mxu1 }
 0x227   : > { %v2102_v0 = vmul.f32 -1.702, %v3187_v34  ;;  %v2104_v1 = vmul.f32 -1.702, %v3190_v59  ;;  %v3201_v2 = vadd.f32 %v782_v62, %v3178_v51  ;;  %v3204_v3 = vadd.f32 %v895_v63, %v3180_v52  ;;  %v784_v4 = vpop.f32.mrb[3].mxu0  ;;  %v897_v42 = vpop.f32.mrb[3].mxu1 }
 0x228   : > { %v2103_v6 = vmul.f32 -1.702, %v3193_v57  ;;  %v2105_v7 = vmul.f32 -1.702, %v3196_v61  ;;  %v3209_v5 = vadd.f32 %v784_v4, %v3182_v53  ;;  %v3212_v8 = vadd.f32 %v897_v42, %v3184_v54 }
 0x229   : > { %v1098_v9 = vmul.f32 1.442695, %v2102_v0  ;;  %v1102_v16 = vmul.f32 1.442695, %v2104_v1  ;;  %v2106_v10 = vmul.f32 -1.702, %v3201_v2 }
 0x22a   : > { %v1100_v17 = vmul.f32 1.442695, %v2103_v6  ;;  %v1104_v11 = vmul.f32 1.442695, %v2105_v7  ;;  %v2108_v18 = vmul.f32 -1.702, %v3204_v3 }
 0x22b   : > { %2450 = vpow2.f32 %v1098_v9  ;;  %v1106_v20 = vmul.f32 1.442695, %v2106_v10  ;;  %v2107_v21 = vmul.f32 -1.702, %v3209_v5  ;;  %v2109_v19 = vmul.f32 -1.702, %v3212_v8 }
 0x22c   : > { %2452 = vpow2.f32 %v1102_v16  ;;  %v1110_v22 = vmul.f32 1.442695, %v2108_v18  ;;  %v788_v41 = vpop.f32.mrb[4].mxu0  ;;  %v901_v23 = vpop.f32.mrb[4].mxu1 }
 0x22d   : > { %2454 = vpow2.f32 %v1100_v17  ;;  %v1108_v24 = vmul.f32 1.442695, %v2107_v21  ;;  %v1112_v25 = vmul.f32 1.442695, %v2109_v19  ;;  %v3219_v32 = vadd.f32 %v788_v41, %v3178_v51  ;;  %v790_v31 = vpop.f32.mrb[5].mxu0  ;;  %v903_v12 = vpop.f32.mrb[5].mxu1 }
 0x22e   : > { %2456 = vpow2.f32 %v1104_v11  ;;  %v3222_v56 = vadd.f32 %v901_v23, %v3180_v52  ;;  %v3225_v28 = vadd.f32 %v790_v31, %v3182_v53  ;;  %v3228_v26 = vadd.f32 %v903_v12, %v3184_v54  ;;  %v792_v13 = vpop.f32.mrb[6].mxu0  ;;  %v905_v29 = vpop.f32.mrb[6].mxu1 }
 0x22f   : > { %2458 = vpow2.f32 %v1106_v20  ;;  %v2110_v30 = vmul.f32 -1.702, %v3219_v32  ;;  %v3232_v35 = vadd.f32 %v792_v13, %v3178_v51  ;;  %v794_v36 = vpop.f32.mrb[7].mxu0  ;;  %v907_v37 = vpop.f32.mrb[7].mxu1  ;;  %v3239_v49 = vadd.f32 %v905_v29, %v3180_v52 }
 0x230   : > { %2460 = vpow2.f32 %v1110_v22  ;;  %v2112_v14 = vmul.f32 -1.702, %v3222_v56  ;;  %v2111_v15 = vmul.f32 -1.702, %v3225_v28  ;;  %v2113_v38 = vmul.f32 -1.702, %v3228_v26 }
 0x231   : > { %2462 = vpow2.f32 %v1108_v24  ;;  %v1114_v39 = vmul.f32 1.442695, %v2110_v30  ;;  %v2114_v50 = vmul.f32 -1.702, %v3232_v35  ;;  %v3242_v58 = vadd.f32 %v794_v36, %v3182_v53 }
 0x232   : > { %2464 = vpow2.f32 %v1112_v25  ;;  %v1118_v40 = vmul.f32 1.442695, %v2112_v14  ;;  %v1116_v43 = vmul.f32 1.442695, %v2111_v15  ;;  %v1120_v44 = vmul.f32 1.442695, %v2113_v38 }
 0x233   : > { %2466 = vpow2.f32 %v1114_v39  ;;  %v1122_v45 = vmul.f32 1.442695, %v2114_v50  ;;  %v2116_v7 = vmul.f32 -1.702, %v3239_v49  ;;  %v3246_v17 = vadd.f32 %v907_v37, %v3184_v54 }
 0x234   : > { %2468 = vpow2.f32 %v1118_v40  ;;  %v798_v33 = vpop.f32.mrb[8].mxu0  ;;  %v911_v46 = vpop.f32.mrb[8].mxu1  ;;  %v2115_v20 = vmul.f32 -1.702, %v3242_v58 }
 0x235   : > { %v2451_v47 = vpop.eup %2450  ;;  %2470 = vpow2.f32 %v1116_v43  ;;  %v800_v48 = vpop.f32.mrb[9].mxu0  ;;  %v3250_v22 = vadd.f32 %v798_v33, %v3178_v51  ;;  %v3253_v41 = vadd.f32 %v911_v46, %v3180_v52  ;;  %v1126_v25 = vmul.f32 1.442695, %v2116_v7 }
 0x236   : > { %v913_v55 = vpop.f32.mrb[9].mxu1  ;;  %v2453_v27 = vpop.eup %2452  ;;  %v1226_v60 = vadd.f32 1.0, %v2451_v47  ;;  %2472 = vpow2.f32 %v1120_v44  ;;  %v3256_v31 = vadd.f32 %v800_v48, %v3182_v53  ;;  %v2117_v36 = vmul.f32 -1.702, %v3246_v17 }
 0x237   : > { %v802_v62 = vpop.f32.mrb[10].mxu0  ;;  %v915_v63 = vpop.f32.mrb[10].mxu1  ;;  %v1228_v1 = vadd.f32 1.0, %v2453_v27  ;;  %2474 = vpow2.f32 %v1122_v45  ;;  %3816 = vst [vmem:[#allocation2_spill] sm:$0xff] %v3253_v41  ;;  %v3260_v37 = vadd.f32 %v913_v55, %v3184_v54  ;;  %v1124_v50 = vmul.f32 1.442695, %v2115_v20 }
 0x238   : > { %v2455_v0 = vpop.eup %2454  ;;  %v804_v4 = vpop.f32.mrb[11].mxu0  ;;  %2476 = vrcp.f32 %v1226_v60  ;;  %3817 = vst [vmem:[#allocation3_spill] sm:$0xff] %v3256_v31  ;;  %v3267_v40 = vadd.f32 %v802_v62, %v3178_v51  ;;  %v2118_v33 = vmul.f32 -1.702, %v3250_v22  ;;  %v2120_v46 = vmul.f32 -1.702, %v3253_v41 }
 0x239   : > { %v2457_v42 = vpop.eup %2456  ;;  %v1227_v6 = vadd.f32 1.0, %v2455_v0  ;;  %v917_v9 = vpop.f32.mrb[11].mxu1  ;;  %2478 = vrcp.f32 %v1228_v1  ;;  %3818 = vst [vmem:[#allocation4_spill] sm:$0xff] %v3260_v37  ;;  %v2119_v27 = vmul.f32 -1.702, %v3256_v31 }
 0x23a   : > { %v2459_v16 = vpop.eup %2458  ;;  %v1229_v10 = vadd.f32 1.0, %v2457_v42  ;;  %3819 = vst [vmem:[#allocation5_spill] sm:$0xff] %v3267_v40  ;;  %v2121_v42 = vmul.f32 -1.702, %v3260_v37  ;;  %v1128_v20 = vmul.f32 1.442695, %v2117_v36 }
 0x23b   : > { %v2461_v11 = vpop.eup %2460  ;;  %2480 = vrcp.f32 %v1227_v6  ;;  %v1230_v18 = vadd.f32 1.0, %v2459_v16  ;;  %v3282_v6 = vadd.f32 %v915_v63, %v3180_v52  ;;  %v1134_v63 = vmul.f32 1.442695, %v2120_v46 }
 0x23c   : > { %v2463_v21 = vpop.eup %2462  ;;  %2482 = vrcp.f32 %v1229_v10  ;;  %v1232_v19 = vadd.f32 1.0, %v2461_v11  ;;  %v808_v12 = vpop.f32.mrb[12].mxu0  ;;  %v2122_v10 = vmul.f32 -1.702, %v3267_v40  ;;  %v3286_v11 = vadd.f32 %v804_v4, %v3182_v53 }
 0x23d   : > { %v2465_v23 = vpop.eup %2464  ;;  %2484 = vrcp.f32 %v1230_v18  ;;  %v1231_v24 = vadd.f32 1.0, %v2463_v21  ;;  %v921_v13 = vpop.f32.mrb[12].mxu1  ;;  %3820 = vst [vmem:[#allocation6_spill] sm:$0xff] %v3282_v6  ;;  %v1130_v21 = vmul.f32 1.442695, %v2118_v33 }
 0x23e   : > { %v2467_v29 = vpop.eup %2466  ;;  %2486 = vrcp.f32 %v1232_v19  ;;  %v1233_v30 = vadd.f32 1.0, %v2465_v23  ;;  %v3262_v14 = vpop.f32.mrb[13].mxu0  ;;  %3821 = vst [vmem:[#allocation7_spill] sm:$0xff] %v3286_v11  ;;  %v3289_v19 = vadd.f32 %v917_v9, %v3184_v54  ;;  %v1136_v36 = vmul.f32 1.442695, %v2121_v42 }
 0x23f   : > { %v3264_v15 = vpop.f32.mrb[13].mxu1  ;;  %v2469_v38 = vpop.eup %2468  ;;  %2488 = vrcp.f32 %v1231_v24  ;;  %v1234_v39 = vadd.f32 1.0, %v2467_v29  ;;  %v1132_v24 = vmul.f32 1.442695, %v2119_v27  ;;  %v3294_v29 = vadd.f32 %v808_v12, %v3178_v51 }
 0x240   : > { %v3269_v43 = vpop.f32.mrb[14].mxu0  ;;  %v2471_v44 = vpop.eup %2470  ;;  %2490 = vrcp.f32 %v1233_v30  ;;  %v1236_v45 = vadd.f32 1.0, %v2469_v38  ;;  %3822 = vst [vmem:[#allocation8_spill] sm:$0xff] %v3289_v19  ;;  %v3304_v9 = vadd.f32 %v921_v13, %v3180_v52  ;;  %v1138_v12 = vmul.f32 1.442695, %v2122_v10 }
 0x241   : > { %v3273_v47 = vpop.f32.mrb[14].mxu1  ;;  %v2473_v48 = vpop.eup %2472  ;;  %2492 = vrcp.f32 %v1234_v39  ;;  %v1235_v55 = vadd.f32 1.0, %v2471_v44  ;;  %3823 = vst [vmem:[#allocation9_spill] sm:$0xff] %v3294_v29  ;;  %v2124_v39 = vmul.f32 -1.702, %v3282_v6 }
 0x242   : > { %v3276_v60 = vpop.f32.mrb[15].mxu0  ;;  %v3278_v62 = vpop.f32.mrb[15].mxu1  ;;  %2494 = vrcp.f32 %v1236_v45  ;;  %v1237_v1 = vadd.f32 1.0, %v2473_v48  ;;  %3824 = vst [vmem:[#allocation10_spill] sm:$0xff] %v3304_v9  ;;  %v2123_v46 = vmul.f32 -1.702, %v3286_v11 }
 0x243   : > { %v2475_v0 = vpop.eup %2474  ;;  %2496 = vrcp.f32 %v1235_v55 }
 0x244   : > { %v2477_v7 = vpop.eup %2476  ;;  %v1238_v16 = vadd.f32 1.0, %v2475_v0  ;;  %2498 = vrcp.f32 %v1237_v1  ;;  %v3296_v30 = vpop.f32.mrb[16].mxu0  ;;  %v2125_v0 = vmul.f32 -1.702, %v3289_v19 }
 0x245   : > { %v2479_v18 = vpop.eup %2478  ;;  %v3298_v38 = vpop.f32.mrb[16].mxu1  ;;  %v3316_v27 = vmul.f32 %v2477_v7, %v3187_v34  ;;  %v2126_v34 = vmul.f32 -1.702, %v3294_v29 }
 0x246   : > { %v3291_v23 = vpop.eup %2480  ;;  %2500 = vrcp.f32 %v1238_v16  ;;  %v3306_v44 = vpop.f32.mrb[17].mxu0  ;;  %v3327_v16 = vmul.f32 %v2479_v18, %v3190_v59 }
 0x247   : > { %v3300_v4 = vpop.eup %2482  ;;  %2502 = vpow2.f32 %v1126_v25  ;;  %v3308_v45 = vpop.f32.mrb[17].mxu1  ;;  %v1146_v29 = vmul.f32 1.442695, %v2126_v34 }
 0x248   : > { %v2485_v33 = vpop.eup %2484  ;;  %2504 = vpow2.f32 %v1124_v50  ;;  %v3311_v48 = vpop.f32.mrb[18].mxu0 }
 0x249   : > { %v3313_v55 = vpop.f32.mrb[18].mxu1  ;;  %v2487_v25 = vpop.eup %2486  ;;  %v3319_v13 = vmul.f32 %v2485_v33, %v3201_v2  ;;  %2506 = vpow2.f32 %v1128_v20  ;;  %v1142_v20 = vmul.f32 1.442695, %v2124_v39  ;;  %v2128_v33 = vmul.f32 -1.702, %v3304_v9 }
 0x24a   : > { %v3322_v1 = vpop.f32.mrb[19].mxu0  ;;  %v3324_v50 = vpop.f32.mrb[19].mxu1  ;;  %v3330_v10 = vmul.f32 %v2487_v25, %v3204_v3  ;;  %2508 = vpow2.f32 %v1130_v21  ;;  %v1140_v3 = vmul.f32 1.442695, %v2123_v46  ;;  %v1144_v21 = vmul.f32 1.442695, %v2125_v0 }
 0x24b   : > { %v2489_v42 = vpop.eup %2488  ;;  %2510 = vpow2.f32 %v1134_v63  ;;  %v1150_v9 = vmul.f32 1.442695, %v2128_v33 }
 0x24c   : > { %v3333_v7 = vpop.eup %2490  ;;  %2512 = vpow2.f32 %v1132_v24  ;;  %v3346_v2 = vpop.f32.mrb[20].mxu0  ;;  %v3354_v24 = vadd.f32 %v3262_v14, %v3182_v53  ;;  %v3372_v14 = vadd.f32 %v3269_v43, %v3178_v51 }
 0x24d   : > { %v3338_v6 = vpop.eup %2492  ;;  %2514 = vpow2.f32 %v1136_v36  ;;  %v3348_v63 = vpop.f32.mrb[20].mxu1 }
 0x24e   : > { %v3342_v18 = vpop.eup %2494  ;;  %2516 = vpow2.f32 %v1138_v12  ;;  %3825 = vst [vmem:[#allocation11_spill] sm:$0xff] %v3354_v24  ;;  %v3356_v46 = vpop.f32.mrb[21].mxu0  ;;  %3828 = vst [vmem:[#allocation14_spill] sm:$0xff] %v3372_v14 }
 0x24f   : > { %v3344_v25 = vpop.eup %2496  ;;  %2518 = vpow2.f32 %v1142_v20  ;;  %v3358_v36 = vpop.f32.mrb[21].mxu1  ;;  %v3368_v20 = vadd.f32 %v3264_v15, %v3184_v54  ;;  %v1419_v15 = vmul.f32 %v3291_v23, %v3193_v57 }
 0x250   : > { %v3350_v39 = vpop.eup %2498  ;;  %2520 = vpow2.f32 %v1140_v3  ;;  %v3362_v12 = vpop.f32.mrb[22].mxu0 }
 0x251   : > { %v3360_v0 = vpop.eup %2500  ;;  %v3364_v34 = vpop.f32.mrb[22].mxu1  ;;  %2522 = vpow2.f32 %v1144_v21  ;;  %3827 = vst [vmem:[#allocation13_spill] sm:$0xff] %v3368_v20  ;;  %v2127_v21 = vmul.f32 -1.702, %v3354_v24 }
 0x252   : > { %3826 = vst [vmem:[#allocation12_spill] sm:$0xff] %v3364_v34  ;;  %v2503_v59 = vpop.eup %2502  ;;  %v3374_v33 = vpop.f32.mrb[23].mxu0  ;;  %2524 = vpow2.f32 %v1146_v29 }
 0x253   : > { %3829 = vst [vmem:[#allocation15_spill] sm:$0xff] %v3374_v33  ;;  %v3376_v19 = vpop.f32.mrb[23].mxu1  ;;  %v2505_v11 = vpop.eup %2504  ;;  %v1240_v3 = vadd.f32 1.0, %v2503_v59  ;;  %2526 = vpow2.f32 %v1150_v9  ;;  %v2129_v33 = vmul.f32 -1.702, %v3368_v20  ;;  %v3387_v9 = vadd.f32 %v3273_v47, %v3180_v52 }
 0x254   : > { %3830 = vst [vmem:[#allocation16_spill] sm:$0xff] %v3376_v19  ;;  %v2507_v40 = vpop.eup %2506  ;;  %v1239_v37 = vadd.f32 1.0, %v2505_v11  ;;  %v2130_v19 = vmul.f32 -1.702, %v3372_v14  ;;  %v1421_v11 = vmul.f32 %v3300_v4, %v3196_v61  ;;  %v3389_v57 = vpop.f32.mrb[24].mxu0  ;;  %v1425_v61 = vmul.f32 %v3333_v7, %v3212_v8 }
 0x255   : > { %v2509_v34 = vpop.eup %2508  ;;  %2528 = vrcp.f32 %v1240_v3  ;;  %v1241_v31 = vadd.f32 1.0, %v2507_v40  ;;  %3831 = vst [vmem:[#allocation17_spill] sm:$0xff] %v3387_v9  ;;  %v3392_v3 = vpop.f32.mrb[24].mxu1  ;;  %v3400_v47 = vadd.f32 %v3276_v60, %v3182_v53  ;;  %v2132_v8 = vmul.f32 -1.702, %v3387_v9 }
 0x256   : > { %v2511_v43 = vpop.eup %2510  ;;  %2530 = vrcp.f32 %v1239_v37  ;;  %v1242_v41 = vadd.f32 1.0, %v2509_v34  ;;  %v1423_v37 = vmul.f32 %v2489_v42, %v3209_v5  ;;  %v1148_v34 = vmul.f32 1.442695, %v2127_v21  ;;  %v3394_v14 = vpop.f32.mrb[25].mxu0 }
 0x257   : > { %v2513_v59 = vpop.eup %2512  ;;  %2532 = vrcp.f32 %v1241_v31  ;;  %v1244_v29 = vadd.f32 1.0, %v2511_v43  ;;  %v3402_v4 = vpop.f32.mrb[25].mxu1  ;;  %v1152_v42 = vmul.f32 1.442695, %v2129_v33  ;;  %v1154_v21 = vmul.f32 1.442695, %v2130_v19 }
 0x258   : > { %v2515_v40 = vpop.eup %2514  ;;  %2534 = vrcp.f32 %v1242_v41  ;;  %v1243_v23 = vadd.f32 1.0, %v2513_v59  ;;  %v3404_v43 = vpop.f32.mrb[26].mxu0  ;;  %v3409_v7 = vadd.f32 %v3278_v62, %v3184_v54  ;;  %v3417_v19 = vadd.f32 %v3296_v30, %v3178_v51 }
 0x259   : > { %v2517_v20 = vpop.eup %2516  ;;  %2536 = vrcp.f32 %v1244_v29  ;;  %v1245_v31 = vadd.f32 1.0, %v2515_v40  ;;  %v3411_v60 = vpop.f32.mrb[26].mxu1  ;;  %v1483_v33 = vpack.c.bf16 %v1423_v37, %v1419_v15  ;;  %v2131_v62 = vmul.f32 -1.702, %v3400_v47 }
 0x25a   : > { %v2519_v5 = vpop.eup %2518  ;;  %2538 = vrcp.f32 %v1243_v23  ;;  %v1246_v41 = vadd.f32 1.0, %v2517_v20  ;;  %v3413_v29 = vpop.f32.mrb[27].mxu0  ;;  %v3424_v9 = vadd.f32 %v3298_v38, %v3180_v52  ;;  %v1485_v30 = vpack.c.bf16 %v1425_v61, %v1421_v11 }
 0x25b   : > { %v2521_v59 = vpop.eup %2520  ;;  %2540 = vrcp.f32 %v1245_v31  ;;  %v1248_v24 = vadd.f32 1.0, %v2519_v5  ;;  %3832 = vst [vmem:[#allocation18_spill] sm:$0xff] %v3413_v29  ;;  %v3419_v23 = vpop.f32.mrb[27].mxu1  ;;  %1809 = vmatprep.mubr.bf16.mxu0 %v1483_v33  ;;  %v3834_v38 = vpack.c.bf16 %v3319_v13, %v3316_v27  ;;  %v3443_v11 = vadd.f32 %v3311_v48, %v3178_v51 }
 0x25c   : > { %v2523_v40 = vpop.eup %2522  ;;  %2542 = vrcp.f32 %v1246_v41  ;;  %v1247_v20 = vadd.f32 1.0, %v2521_v59  ;;  %v3428_v59 = vadd.f32 %v3306_v44, %v3182_v53  ;;  %v2134_v44 = vmul.f32 -1.702, %v3417_v19  ;;  %1906 = vmatprep.mubr.bf16.mxu1 %v1485_v30 }
 0x25d   : > { %v2525_v31 = vpop.eup %2524  ;;  %2544 = vrcp.f32 %v1248_v24  ;;  %v1249_v5 = vadd.f32 1.0, %v2523_v40  ;;  %v2133_v24 = vmul.f32 -1.702, %v3409_v7  ;;  %v3433_v40 = vadd.f32 %v3308_v45, %v3184_v54  ;;  %1810 = vmatmul.mubr.bf16.vlgmr.msra.gmra.mrb[32].mxu0 %v3834_v38  ;;  %v3449_v45 = vpop.f32.mrb[28].mxu1 }
 0x25e   : > { %v2527_v29 = vpop.eup %2526  ;;  %2546 = vrcp.f32 %v1247_v20  ;;  %v1250_v41 = vadd.f32 1.0, %v2525_v31  ;;  %v3438_v20 = vpop.f32.mrb[28].mxu0  ;;  %v3447_v61 = vadd.f32 %v3313_v55, %v3180_v52  ;;  %v3455_v13 = vmul.f32 %v3338_v6, %v3219_v32 }
 0x25f   : > { %v2529_v15 = vpop.eup %2528  ;;  %2548 = vrcp.f32 %v1249_v5  ;;  %v1252_v37 = vadd.f32 1.0, %v2527_v29  ;;  %3833 = vst [vmem:[#allocation19_spill] sm:$0xff] %v3433_v40  ;;  %v3451_v29 = vpop.f32.mrb[29].mxu0  ;;  %v1158_v33 = vmul.f32 1.442695, %v2132_v8  ;;  %v3836_v48 = vpack.c.bf16 %v3330_v10, %v3327_v16 }
 0x260   : > { %v2531_v31 = vpop.eup %2530  ;;  %2550 = vrcp.f32 %v1250_v41  ;;  %3835 = vst [vmem:[#allocation20_spill] sm:$0xff] %v3451_v29  ;;  %v2136_v5 = vmul.f32 -1.702, %v3424_v9  ;;  %v3461_v55 = vpop.f32.mrb[29].mxu1  ;;  %v1156_v38 = vmul.f32 1.442695, %v2131_v62  ;;  %v3470_v32 = vadd.f32 %v3322_v1, %v3182_v53 }
 0x261   : > { %v2533_v27 = vpop.eup %2532  ;;  %2552 = vrcp.f32 %v1252_v37  ;;  %1907 = vmatmul.mubr.bf16.vlgmr.msra.gmra.mrb[32].mxu1 %v3836_v48  ;;  %3837 = vst [vmem:[#allocation21_spill] sm:$0xff] %v3461_v55  ;;  %v3463_v41 = vpop.f32.mrb[30].mxu0  ;;  %v2135_v29 = vmul.f32 -1.702, %v3428_v59  ;;  %v1427_v10 = vmul.f32 %v3344_v25, %v3225_v28  ;;  %v1160_v37 = vmul.f32 1.442695, %v2133_v24 }
 0x262   : > { %3838 = vst [vmem:[#allocation22_spill] sm:$0xff] %v3463_v41  ;;  %v3465_v30 = vpop.eup %2534  ;;  %2554 = vpow2.f32 %v1148_v34  ;;  %v3472_v6 = vpop.f32.mrb[30].mxu1  ;;  %v2137_v34 = vmul.f32 -1.702, %v3433_v40  ;;  %v1162_v1 = vmul.f32 1.442695, %v2134_v44  ;;  %v1429_v55 = vmul.f32 %v3350_v39, %v3228_v26 }
 0x263   : > { %3839 = vst [vmem:[#allocation23_spill] sm:$0xff] %v3472_v6  ;;  %v3474_v8 = vpop.f32.mrb[31].mxu0  ;;  %v3476_v16 = vpop.eup %2536  ;;  %2556 = vpow2.f32 %v1152_v42  ;;  %v2138_v41 = vmul.f32 -1.702, %v3443_v11  ;;  %v2140_v6 = vmul.f32 -1.702, %v3447_v61  ;;  %v3493_v25 = vadd.f32 %v3324_v50, %v3184_v54 }
 0x264   : > { %3840 = vst [vmem:[#allocation24_spill] sm:$0xff] %v3474_v8  ;;  %v3481_v62 = vpop.f32.mrb[31].mxu1  ;;  %v3483_v48 = vpop.eup %2538  ;;  %2558 = vpow2.f32 %v1154_v21  ;;  %v1166_v28 = vmul.f32 1.442695, %v2136_v5  ;;  %v1431_v21 = vmul.f32 %v2531_v31, %v3242_v58  ;;  %v1164_v24 = vmul.f32 1.442695, %v2135_v29 }
 0x265   : > { %3841 = vst [vmem:[#allocation25_spill] sm:$0xff] %v3481_v62  ;;  %v3487_v8 = vpop.eup %2540  ;;  %2560 = vpow2.f32 %v1158_v33  ;;  %v2139_v44 = vmul.f32 -1.702, %v3470_v32  ;;  %v1430_v40 = vmul.f32 %v3360_v0, %v3232_v35  ;;  %v1168_v26 = vmul.f32 1.442695, %v2137_v34 }
 0x266   : > { %v3495_v42 = vpop.eup %2542  ;;  %2562 = vpow2.f32 %v1156_v38  ;;  %v3505_v39 = vadd.f32 %v3346_v2, %v3178_v51  ;;  %v1433_v33 = vmul.f32 %v2533_v27, %v3246_v17  ;;  %v1170_v58 = vmul.f32 1.442695, %v2138_v41 }
 0x267   : > { %v3499_v62 = vpop.eup %2544  ;;  %2564 = vpow2.f32 %v1160_v37  ;;  %v1174_v31 = vmul.f32 1.442695, %v2140_v6  ;;  %v1432_v5 = vmul.f32 %v2529_v15, %v3239_v49  ;;  %v2141_v35 = vmul.f32 -1.702, %v3493_v25 }
 0x268   : > { %v3507_v50 = vpop.eup %2546  ;;  %2566 = vpow2.f32 %v1162_v1  ;;  %v3516_v0 = vadd.f32 %v3348_v63, %v3180_v52  ;;  %v1172_v38 = vmul.f32 1.442695, %v2139_v44  ;;  %v3522_v17 = vadd.f32 %v3356_v46, %v3182_v53 }
 0x269   : > { %v3510_v29 = vpop.eup %2548  ;;  %2568 = vpow2.f32 %v1166_v28  ;;  %v1487_v27 = vpack.c.bf16 %v1431_v21, %v1427_v10  ;;  %v1428_v49 = vmul.f32 %v3342_v18, %v3222_v56  ;;  %v2142_v15 = vmul.f32 -1.702, %v3505_v39 }
 0x26a   : > { %v3518_v2 = vpop.eup %2550  ;;  %2570 = vpow2.f32 %v1164_v24  ;;  %v3531_v63 = vadd.f32 %v3358_v36, %v3184_v54  ;;  %v1489_v37 = vpack.c.bf16 %v1433_v33, %v1429_v55  ;;  %v1486_v46 = vpack.c.bf16 %v1430_v40, %v3455_v13 }
 0x26b   : > { %v3524_v41 = vpop.eup %2552  ;;  %2572 = vpow2.f32 %v1168_v26  ;;  %1817 = vmatprep.mubr.bf16.mxu0 %v1487_v27  ;;  %v2144_v1 = vmul.f32 -1.702, %v3516_v0  ;;  %v1488_v28 = vpack.c.bf16 %v1432_v5, %v1428_v49  ;;  %v3535_v21 = vmul.f32 1.442695, %v2141_v35  ;;  %v3842_v5 = vld [vmem:[#allocation2_spill] sm:$0xff]  ;;  %v3843_v49 = vld [vmem:[#allocation3_spill] sm:$0xff] }
 0x26c   : > { %v2555_v6 = vpop.eup %2554  ;;  %2574 = vpow2.f32 %v1170_v58  ;;  %v2143_v24 = vmul.f32 -1.702, %v3522_v17  ;;  %1914 = vmatprep.mubr.bf16.mxu1 %v1489_v37  ;;  %1818 = vmatmul.mubr.bf16.gmra.mrb[36].mxu0 %v1486_v46  ;;  %v3538_v44 = vmul.f32 1.442695, %v2142_v15  ;;  %v3542_v40 = vadd.f32 %v3362_v12, %v3178_v51  ;;  %v3844_v37 = vld [vmem:[#allocation4_spill] sm:$0xff] }
 0x26d   : > { %v2557_v34 = vpop.eup %2556  ;;  %v1251_v10 = vadd.f32 1.0, %v2555_v6  ;;  %2576 = vpow2.f32 %v1174_v31  ;;  %1915 = vmatmul.mubr.bf16.gmra.mrb[36].mxu1 %v1488_v28  ;;  %v3546_v26 = vmul.f32 %v3465_v30, %v3250_v22  ;;  %v2145_v58 = vmul.f32 -1.702, %v3531_v63  ;;  %v3845_v28 = vld [vmem:[#allocation5_spill] sm:$0xff] }
 0x26e   : > { %v2559_v56 = vpop.eup %2558  ;;  %v1253_v18 = vadd.f32 1.0, %v2557_v34  ;;  %2578 = vpow2.f32 %v1172_v38  ;;  %v3551_v35 = vmul.f32 %v3476_v16, %v3842_v5  ;;  %v3553_v27 = vmul.f32 1.442695, %v2144_v1  ;;  %v3849_v5 = vld [vmem:[#allocation8_spill] sm:$0xff] }
 0x26f   : > { %v2561_v36 = vpop.eup %2560  ;;  %2580 = vrcp.f32 %v1251_v10  ;;  %v1254_v55 = vadd.f32 1.0, %v2559_v56  ;;  %v1435_v15 = vmul.f32 %v3483_v48, %v3843_v49  ;;  %v3557_v30 = vmul.f32 1.442695, %v2143_v24  ;;  %v3846_v48 = vld [vmem:[#allocation12_spill] sm:$0xff] }
 0x270   : > { %v2563_v13 = vpop.eup %2562  ;;  %2582 = vrcp.f32 %v1253_v18  ;;  %v1256_v33 = vadd.f32 1.0, %v2561_v36  ;;  %v1437_v46 = vmul.f32 %v3487_v8, %v3844_v37  ;;  %v2146_v16 = vmul.f32 -1.702, %v3542_v40  ;;  %v3847_v36 = vld [vmem:[#allocation7_spill] sm:$0xff] }
 0x271   : > { %v2565_v31 = vpop.eup %2564  ;;  %2584 = vrcp.f32 %v1254_v55  ;;  %v1255_v38 = vadd.f32 1.0, %v2563_v13  ;;  %v1438_v1 = vmul.f32 %v3495_v42, %v3845_v28  ;;  %v3566_v18 = vadd.f32 %v3846_v48, %v3180_v52  ;;  %v3848_v13 = vld [vmem:[#allocation15_spill] sm:$0xff] }
 0x272   : > { %v2567_v12 = vpop.eup %2566  ;;  %2586 = vrcp.f32 %v1256_v33  ;;  %v1257_v22 = vadd.f32 1.0, %v2565_v31  ;;  %v1439_v55 = vmul.f32 %v3507_v50, %v3847_v36  ;;  %v3572_v33 = vadd.f32 %v3848_v13, %v3182_v53 }
 0x273   : > { %v2569_v6 = vpop.eup %2568  ;;  %2588 = vrcp.f32 %v1255_v38  ;;  %v1258_v34 = vadd.f32 1.0, %v2567_v12  ;;  %v1441_v42 = vmul.f32 %v3510_v29, %v3849_v5  ;;  %v3850_v12 = vld [vmem:[#allocation16_spill] sm:$0xff]  ;;  %v3588_v29 = vadd.f32 %v3392_v3, %v3180_v52 }
 0x274   : > { %v2571_v10 = vpop.eup %2570  ;;  %2590 = vrcp.f32 %v1257_v22  ;;  %v1260_v56 = vadd.f32 1.0, %v2569_v6  ;;  %v3578_v49 = vadd.f32 %v3850_v12, %v3184_v54  ;;  %v3851_v6 = vld [vmem:[#allocation6_spill] sm:$0xff]  ;;  %v1490_v3 = vpack.c.bf16 %v1438_v1, %v3546_v26 }
 0x275   : > { %v2573_v24 = vpop.eup %2572  ;;  %2592 = vrcp.f32 %v1258_v34  ;;  %v1259_v8 = vadd.f32 1.0, %v2571_v10  ;;  %v1440_v50 = vmul.f32 %v3499_v62, %v3851_v6  ;;  %v3584_v34 = vadd.f32 %v3389_v57, %v3178_v51 }
 0x276   : > { %v2575_v31 = vpop.eup %2574  ;;  %2594 = vrcp.f32 %v1260_v56  ;;  %v1261_v38 = vadd.f32 1.0, %v2573_v24  ;;  %v3592_v56 = vadd.f32 %v3394_v14, %v3182_v53  ;;  %v3596_v24 = vadd.f32 %v3402_v4, %v3184_v54 }
 0x277   : > { %v2577_v22 = vpop.eup %2576  ;;  %2596 = vrcp.f32 %v1259_v8  ;;  %v1262_v37 = vadd.f32 1.0, %v2575_v31  ;;  %v1491_v57 = vpack.c.bf16 %v1439_v55, %v1435_v15  ;;  %v2148_v8 = vmul.f32 -1.702, %v3566_v18 }
 0x278   : > { %v2579_v10 = vpop.eup %2578  ;;  %2598 = vrcp.f32 %v1261_v38  ;;  %v1264_v28 = vadd.f32 1.0, %v2577_v22  ;;  %v1493_v13 = vpack.c.bf16 %v1441_v42, %v1437_v46  ;;  %v1184_v5 = vmul.f32 1.442695, %v2145_v58  ;;  %v3852_v22 = vld [vmem:[#allocation9_spill] sm:$0xff] }
 0x279   : > { %v2581_v48 = vpop.eup %2580  ;;  %2600 = vrcp.f32 %v1262_v37  ;;  %v1263_v62 = vadd.f32 1.0, %v2579_v10  ;;  %v2147_v14 = vmul.f32 -1.702, %v3572_v33  ;;  %1825 = vmatprep.mubr.bf16.mxu0 %v1491_v57  ;;  %v1492_v38 = vpack.c.bf16 %v1440_v50, %v3551_v35  ;;  %v3853_v37 = vld [vmem:[#allocation10_spill] sm:$0xff] }
 0x27a   : > { %v2583_v36 = vpop.eup %2582  ;;  %2602 = vrcp.f32 %v1264_v28  ;;  %v1186_v4 = vmul.f32 1.442695, %v2146_v16  ;;  %v2149_v15 = vmul.f32 -1.702, %v3578_v49  ;;  %v2150_v55 = vmul.f32 -1.702, %v3584_v34  ;;  %1922 = vmatprep.mubr.bf16.mxu1 %v1493_v13  ;;  %1826 = vmatmul.mubr.bf16.gmra.mrb[40].mxu0 %v1490_v3 }
 0x27b   : > { %v2585_v31 = vpop.eup %2584  ;;  %2604 = vrcp.f32 %v1263_v62  ;;  %v2152_v26 = vmul.f32 -1.702, %v3588_v29  ;;  %v2151_v58 = vmul.f32 -1.702, %v3592_v56  ;;  %v2153_v1 = vmul.f32 -1.702, %v3596_v24  ;;  %1923 = vmatmul.mubr.bf16.gmra.mrb[40].mxu1 %v1492_v38 }
 0x27c   : > { %v2587_v12 = vpop.eup %2586  ;;  %2606 = vpow2.f32 %v3535_v21  ;;  %v1190_v21 = vmul.f32 1.442695, %v2148_v8  ;;  %v3612_v16 = vadd.f32 %v3404_v43, %v3178_v51  ;;  %v1442_v6 = vmul.f32 %v3518_v2, %v3852_v22  ;;  %v3854_v3 = vld [vmem:[#allocation18_spill] sm:$0xff] }
 0x27d   : > { %v2589_v46 = vpop.eup %2588  ;;  %2608 = vpow2.f32 %v3538_v44  ;;  %v1188_v44 = vmul.f32 1.442695, %v2147_v14  ;;  %v1444_v10 = vmul.f32 %v3524_v41, %v3853_v37  ;;  %v1192_v28 = vmul.f32 1.442695, %v2149_v15  ;;  %v3855_v14 = vld [vmem:[#allocation11_spill] sm:$0xff]  ;;  %v3858_v37 = vld [vmem:[#allocation17_spill] sm:$0xff] }
 0x27e   : > { %v2591_v35 = vpop.eup %2590  ;;  %2610 = vpow2.f32 %v3553_v27  ;;  %v1194_v62 = vmul.f32 1.442695, %v2150_v55  ;;  %v1198_v57 = vmul.f32 1.442695, %v2152_v26  ;;  %v1196_v8 = vmul.f32 1.442695, %v2151_v58 }
 0x27f   : > { %v2593_v42 = vpop.eup %2592  ;;  %2612 = vpow2.f32 %v3557_v30  ;;  %v1200_v43 = vmul.f32 1.442695, %v2153_v1  ;;  %v2154_v2 = vmul.f32 -1.702, %v3612_v16  ;;  %v3624_v30 = vadd.f32 %v3411_v60, %v3180_v52  ;;  %v3856_v26 = vld [vmem:[#allocation13_spill] sm:$0xff]  ;;  %v3857_v1 = vld [vmem:[#allocation14_spill] sm:$0xff] }
 0x280   : > { %v2595_v50 = vpop.eup %2594  ;;  %2614 = vpow2.f32 %v1184_v5  ;;  %v3628_v41 = vadd.f32 %v3854_v3, %v3182_v53  ;;  %v1443_v38 = vmul.f32 %v2581_v48, %v3855_v14  ;;  %v3634_v15 = vadd.f32 %v3419_v23, %v3184_v54 }
 0x281   : > { %v2597_v27 = vpop.eup %2596  ;;  %2616 = vpow2.f32 %v1186_v4  ;;  %v1447_v4 = vmul.f32 %v2589_v46, %v3400_v47  ;;  %v1445_v58 = vmul.f32 %v2583_v36, %v3856_v26  ;;  %v1446_v60 = vmul.f32 %v2585_v31, %v3857_v1 }
 0x282   : > { %v3619_v13 = vpop.eup %2598  ;;  %2618 = vpow2.f32 %v1190_v21  ;;  %v1449_v21 = vmul.f32 %v2591_v35, %v3409_v7  ;;  %v1448_v3 = vmul.f32 %v2587_v12, %v3858_v37  ;;  %v3641_v48 = vmul.f32 %v2593_v42, %v3417_v19 }
 0x283   : > { %v2601_v5 = vpop.eup %2600  ;;  %2620 = vpow2.f32 %v1188_v44  ;;  %v3644_v47 = vmul.f32 %v2595_v50, %v3424_v9  ;;  %v1451_v12 = vmul.f32 %v2597_v27, %v3428_v59  ;;  %v1495_v19 = vpack.c.bf16 %v1447_v4, %v1443_v38 }
 0x284   : > { %v2603_v55 = vpop.eup %2602  ;;  %2622 = vpow2.f32 %v1192_v28  ;;  %v3647_v46 = vmul.f32 %v2601_v5, %v3443_v11  ;;  %v1497_v44 = vpack.c.bf16 %v1449_v21, %v1445_v58  ;;  %v1494_v50 = vpack.c.bf16 %v1446_v60, %v1442_v6 }
 0x285   : > { %v2605_v22 = vpop.eup %2604  ;;  %2624 = vpow2.f32 %v1194_v62  ;;  %v3650_v36 = vmul.f32 %v2603_v55, %v3447_v61  ;;  %1833 = vmatprep.mubr.bf16.mxu0 %v1495_v19  ;;  %v1496_v61 = vpack.c.bf16 %v1448_v3, %v1444_v10  ;;  %v2155_v14 = vmul.f32 -1.702, %v3628_v41  ;;  %v3859_v3 = vld [vmem:[#allocation20_spill] sm:$0xff] }
 0x286   : > { %v2607_v23 = vpop.eup %2606  ;;  %v1455_v7 = vmul.f32 %v2605_v22, %v3470_v32  ;;  %2626 = vpow2.f32 %v1198_v57  ;;  %1930 = vmatprep.mubr.bf16.mxu1 %v1497_v44  ;;  %1834 = vmatmul.mubr.bf16.gmra.mrb[44].mxu0 %v1494_v50  ;;  %v1498_v59 = vpack.c.bf16 %v3647_v46, %v3641_v48  ;;  %v1202_v55 = vmul.f32 1.442695, %v2154_v2  ;;  %v3860_v2 = vld [vmem:[#allocation21_spill] sm:$0xff] }
 0x287   : > { %v2609_v31 = vpop.eup %2608  ;;  %v1265_v35 = vadd.f32 1.0, %v2607_v23  ;;  %2628 = vpow2.f32 %v1196_v8  ;;  %v1500_v27 = vpack.c.bf16 %v3650_v36, %v3644_v47  ;;  %1931 = vmatmul.mubr.bf16.gmra.mrb[44].mxu1 %v1496_v61  ;;  %v2157_v26 = vmul.f32 -1.702, %v3634_v15  ;;  %v3863_v61 = vld [vmem:[#allocation24_spill] sm:$0xff] }
 0x288   : > { %v2611_v42 = vpop.eup %2610  ;;  %v1266_v9 = vadd.f32 1.0, %v2609_v31  ;;  %2630 = vpow2.f32 %v1200_v43  ;;  %v1499_v62 = vpack.c.bf16 %v1455_v7, %v1451_v12  ;;  %v2156_v43 = vmul.f32 -1.702, %v3624_v30  ;;  %v3861_v31 = vld [vmem:[#allocation22_spill] sm:$0xff] }
 0x289   : > { %v2613_v28 = vpop.eup %2612  ;;  %2632 = vrcp.f32 %v1265_v35  ;;  %v1268_v11 = vadd.f32 1.0, %v2611_v42  ;;  %v3663_v60 = vadd.f32 %v3438_v20, %v3178_v51  ;;  %v3667_v21 = vadd.f32 %v3449_v45, %v3180_v52  ;;  %v3862_v42 = vld [vmem:[#allocation23_spill] sm:$0xff] }
 0x28a   : > { %v2615_v5 = vpop.eup %2614  ;;  %2634 = vrcp.f32 %v1266_v9  ;;  %v1267_v32 = vadd.f32 1.0, %v2613_v28  ;;  %1841 = vmatprep.mubr.bf16.mxu0 %v1499_v62  ;;  %v3671_v48 = vadd.f32 %v3859_v3, %v3182_v53  ;;  %v3675_v23 = vadd.f32 %v3860_v2, %v3184_v54 }
 0x28b   : > { %v2617_v57 = vpop.eup %2616  ;;  %2636 = vrcp.f32 %v1268_v11  ;;  %v1269_v6 = vadd.f32 1.0, %v2615_v5  ;;  %v1206_v20 = vmul.f32 1.442695, %v2156_v43  ;;  %v3679_v12 = vadd.f32 %v3861_v31, %v3178_v51  ;;  %v3864_v5 = vld [vmem:[#allocation19_spill] sm:$0xff]  ;;  %v3865_v43 = vld [vmem:[#allocation25_spill] sm:$0xff] }
 0x28c   : > { %v2619_v8 = vpop.eup %2618  ;;  %2638 = vrcp.f32 %v1267_v32  ;;  %v1270_v10 = vadd.f32 1.0, %v2617_v57  ;;  %v1204_v19 = vmul.f32 1.442695, %v2155_v14  ;;  %v3683_v9 = vadd.f32 %v3862_v42, %v3180_v52 }
 0x28d   : > { %v2621_v38 = vpop.eup %2620  ;;  %2640 = vrcp.f32 %v1269_v6  ;;  %v1272_v4 = vadd.f32 1.0, %v2619_v8  ;;  %v2158_v28 = vmul.f32 -1.702, %v3663_v60  ;;  %v2160_v11 = vmul.f32 -1.702, %v3667_v21 }
 0x28e   : > { %v2623_v58 = vpop.eup %2622  ;;  %2642 = vrcp.f32 %v1270_v10  ;;  %v1271_v1 = vadd.f32 1.0, %v2621_v38  ;;  %v3689_v62 = vadd.f32 %v3863_v61, %v3182_v53  ;;  %1842 = vmatmul.mubr.bf16.gmra.mrb[48].mxu0 %v1498_v59  ;;  %v1453_v32 = vmul.f32 %v3619_v13, %v3864_v5 }
 0x28f   : > { %v2625_v22 = vpop.eup %2624  ;;  %2644 = vrcp.f32 %v1272_v4  ;;  %v1273_v37 = vadd.f32 1.0, %v2623_v58  ;;  %v2159_v57 = vmul.f32 -1.702, %v3671_v48  ;;  %v2161_v52 = vmul.f32 -1.702, %v3675_v23 }
 0x290   : > { %v2627_v46 = vpop.eup %2626  ;;  %2646 = vrcp.f32 %v1271_v1  ;;  %v1274_v7 = vadd.f32 1.0, %v2625_v22  ;;  %v2162_v10 = vmul.f32 -1.702, %v3679_v12  ;;  %v3699_v53 = vadd.f32 %v3865_v43, %v3184_v54 }
 0x291   : > { %v2629_v45 = vpop.eup %2628  ;;  %2648 = vrcp.f32 %v1273_v37  ;;  %v1276_v35 = vadd.f32 1.0, %v2627_v46  ;;  %v1208_v14 = vmul.f32 1.442695, %v2157_v26  ;;  %v2164_v13 = vmul.f32 -1.702, %v3683_v9 }
 0x292   : > { %v2631_v44 = vpop.eup %2630  ;;  %v1275_v50 = vadd.f32 1.0, %v2629_v45  ;;  %2650 = vrcp.f32 %v1274_v7  ;;  %v1210_v4 = vmul.f32 1.442695, %v2158_v28  ;;  %v2163_v58 = vmul.f32 -1.702, %v3689_v62 }
 0x293   : > { %v2633_v51 = vpop.eup %2632  ;;  %2652 = vrcp.f32 %v1276_v35  ;;  %v1212_v37 = vmul.f32 1.442695, %v2159_v57  ;;  %v1216_v2 = vmul.f32 1.442695, %v2161_v52  ;;  %v1218_v54 = vmul.f32 1.442695, %v2162_v10 }
 0x294   : > { %v2635_v6 = vpop.eup %2634  ;;  %v1457_v8 = vmul.f32 %v2633_v51, %v3493_v25  ;;  %2654 = vrcp.f32 %v1275_v50  ;;  %v1214_v25 = vmul.f32 1.442695, %v2160_v11  ;;  %v2165_v46 = vmul.f32 -1.702, %v3699_v53 }
 0x295   : > { %v2637_v59 = vpop.eup %2636  ;;  %2656 = vpow2.f32 %v1202_v55  ;;  %v1458_v7 = vmul.f32 %v2635_v6, %v3505_v39  ;;  %v1222_v31 = vmul.f32 1.442695, %v2164_v13  ;;  %v1277_v61 = vadd.f32 1.0, %v2631_v44 }
 0x296   : > { %v2639_v38 = vpop.eup %2638  ;;  %v1501_v1 = vpack.c.bf16 %v1457_v8, %v1453_v32  ;;  %2658 = vpow2.f32 %v1206_v20  ;;  %v1460_v45 = vmul.f32 %v2637_v59, %v3516_v0  ;;  %v1224_v0 = vmul.f32 1.442695, %v2165_v46 }
 0x297   : > { %v2641_v22 = vpop.eup %2640  ;;  %2660 = vpow2.f32 %v1204_v19  ;;  %v1220_v19 = vmul.f32 1.442695, %v2163_v58  ;;  %v1459_v50 = vmul.f32 %v2639_v38, %v3522_v17 }
 0x298   : > { %v2643_v3 = vpop.eup %2642  ;;  %1938 = vmatprep.mubr.bf16.mxu1 %v1501_v1  ;;  %2662 = vpow2.f32 %v1208_v14  ;;  %v1461_v28 = vmul.f32 %v2641_v22, %v3531_v63 }
 0x299   : > { %v2645_v26 = vpop.eup %2644  ;;  %v1462_v55 = vmul.f32 %v2643_v3, %v3542_v40  ;;  %1939 = vmatmul.mubr.bf16.gmra.mrb[48].mxu1 %v1500_v27  ;;  %2664 = vpow2.f32 %v1210_v4 }
 0x29a   : > { %v2647_v20 = vpop.eup %2646  ;;  %v1464_v35 = vmul.f32 %v2645_v26, %v3566_v18  ;;  %2666 = vpow2.f32 %v1214_v25 }
 0x29b   : > { %v2649_v42 = vpop.eup %2648  ;;  %v1463_v39 = vmul.f32 %v2647_v20, %v3572_v33  ;;  %v1502_v40 = vpack.c.bf16 %v1462_v55, %v1458_v7  ;;  %2668 = vpow2.f32 %v1212_v37 }
 0x29c   : > { %v1465_v11 = vmul.f32 %v2649_v42, %v3578_v49  ;;  %v1504_v47 = vpack.c.bf16 %v1464_v35, %v1460_v45  ;;  %v2651_v36 = vpop.eup %2650  ;;  %2670 = vpow2.f32 %v1216_v2 }
 0x29d   : > { %v1503_v27 = vpack.c.bf16 %v1463_v39, %v1459_v50  ;;  %v2653_v18 = vpop.eup %2652  ;;  %2672 = vpow2.f32 %v1218_v54  ;;  %v1466_v7 = vmul.f32 %v2651_v36, %v3584_v34 }
 0x29e   : > { %v1505_v51 = vpack.c.bf16 %v1465_v11, %v1461_v28  ;;  %v2655_v5 = vpop.eup %2654  ;;  %2674 = vpow2.f32 %v1222_v31  ;;  %v1468_v20 = vmul.f32 %v2653_v18, %v3588_v29 }
 0x29f   : > { %1849 = vmatprep.mubr.bf16.mxu0 %v1503_v27  ;;  %v2657_v17 = vpop.eup %2656  ;;  %2676 = vpow2.f32 %v1220_v19  ;;  %v1467_v19 = vmul.f32 %v2655_v5, %v3592_v56 }
 0x2a0   : > { %1946 = vmatprep.mubr.bf16.mxu1 %v1505_v51  ;;  %1850 = vmatmul.mubr.bf16.gmra.mrb[52].mxu0 %v1502_v40  ;;  %v2659_v63 = vpop.eup %2658  ;;  %v1278_v33 = vadd.f32 1.0, %v2657_v17  ;;  %2678 = vpow2.f32 %v1224_v0 }
 0x2a1   : > { %1947 = vmatmul.mubr.bf16.gmra.mrb[52].mxu1 %v1504_v47  ;;  %v2661_v49 = vpop.eup %2660  ;;  %2680 = vrcp.f32 %v1277_v61  ;;  %v1280_v32 = vadd.f32 1.0, %v2659_v63 }
 0x2a2   : > { %v2663_v57 = vpop.eup %2662  ;;  %2682 = vrcp.f32 %v1278_v33  ;;  %v1279_v52 = vadd.f32 1.0, %v2661_v49 }
 0x2a3   : > { %v2665_v44 = vpop.eup %2664  ;;  %2684 = vrcp.f32 %v1280_v32  ;;  %v1281_v6 = vadd.f32 1.0, %v2663_v57 }
 0x2a4   : > { %v2667_v8 = vpop.eup %2666  ;;  %2686 = vrcp.f32 %v1279_v52  ;;  %v1282_v10 = vadd.f32 1.0, %v2665_v44 }
 0x2a5   : > { %v2669_v43 = vpop.eup %2668  ;;  %2688 = vrcp.f32 %v1281_v6  ;;  %v1284_v59 = vadd.f32 1.0, %v2667_v8 }
 0x2a6   : > { %v2671_v14 = vpop.eup %2670  ;;  %2690 = vrcp.f32 %v1282_v10  ;;  %v1283_v13 = vadd.f32 1.0, %v2669_v43 }
 0x2a7   : > { %v2673_v38 = vpop.eup %2672  ;;  %2692 = vrcp.f32 %v1284_v59  ;;  %v1285_v4 = vadd.f32 1.0, %v2671_v14  ;;  %v2706_v14 = vld [vmem:[%s2787_s30] sm:$0xff] }
 0x2a8   : > { %v2675_v58 = vpop.eup %2674  ;;  %2694 = vrcp.f32 %v1283_v13  ;;  %v1286_v1 = vadd.f32 1.0, %v2673_v38 }
 0x2a9   : > { %v2677_v22 = vpop.eup %2676  ;;  %2696 = vrcp.f32 %v1285_v4  ;;  %v1288_v25 = vadd.f32 1.0, %v2675_v58  ;;  %v2707_v4 = vld [vmem:[%s2787_s30 + $0x8] sm:$0xff] }
 0x2aa   : > { %v2679_v37 = vpop.eup %2678  ;;  %2698 = vrcp.f32 %v1286_v1  ;;  %v1287_v3 = vadd.f32 1.0, %v2677_v22 }
 0x2ab   : > { %v2681_v2 = vpop.eup %2680  ;;  %2700 = vrcp.f32 %v1288_v25  ;;  %v1289_v54 = vadd.f32 1.0, %v2679_v37 }
 0x2ac   : > { %v2683_v46 = vpop.eup %2682  ;;  %2702 = vrcp.f32 %v1287_v3  ;;  %v1469_v40 = vmul.f32 %v2681_v2, %v3596_v24 }
 0x2ad   : > { %v2685_v26 = vpop.eup %2684  ;;  %v1470_v55 = vmul.f32 %v2683_v46, %v3612_v16  ;;  %2704 = vrcp.f32 %v1289_v54 }
 0x2ae   : > { %v2687_v31 = vpop.eup %2686  ;;  %v1472_v45 = vmul.f32 %v2685_v26, %v3624_v30 }
 0x2af   : > { %v2689_v35 = vpop.eup %2688  ;;  %v1471_v42 = vmul.f32 %v2687_v31, %v3628_v41  ;;  %v1506_v50 = vpack.c.bf16 %v1470_v55, %v1466_v7 }
 0x2b0   : > { %v2691_v39 = vpop.eup %2690  ;;  %v1473_v28 = vmul.f32 %v2689_v35, %v3634_v15  ;;  %v1508_v34 = vpack.c.bf16 %v1472_v45, %v1468_v20 }
 0x2b1   : > { %v2693_v11 = vpop.eup %2692  ;;  %v1507_v16 = vpack.c.bf16 %v1471_v42, %v1467_v19  ;;  %v1474_v56 = vmul.f32 %v2691_v39, %v3663_v60  ;;  %v2708_v19 = vld [vmem:[%s2787_s30 + $0x10] sm:$0xff]  ;;  %v2709_v39 = vld [vmem:[%s2787_s30 + $0x18] sm:$0xff] }
 0x2b2   : > { %v2695_v47 = vpop.eup %2694  ;;  %v1509_v36 = vpack.c.bf16 %v1473_v28, %v1469_v40  ;;  %v1476_v24 = vmul.f32 %v2693_v11, %v3667_v21 }
 0x2b3   : > { %v2697_v0 = vpop.eup %2696  ;;  %1857 = vmatprep.mubr.bf16.mxu0 %v1507_v16  ;;  %v1475_v61 = vmul.f32 %v2695_v47, %v3671_v48  ;;  %v3734_v48 = vld [vmem:[%s3800_s6] ss:$0 sm:$0xff] }
 0x2b4   : > { %v2699_v29 = vpop.eup %2698  ;;  %1954 = vmatprep.mubr.bf16.mxu1 %v1509_v36  ;;  %1858 = vmatmul.mubr.bf16.gmra.mrb[56].mxu0 %v1506_v50  ;;  %v1477_v17 = vmul.f32 %v2697_v0, %v3675_v23 }
 0x2b5   : > { %v2701_v30 = vpop.eup %2700  ;;  %v1478_v41 = vmul.f32 %v2699_v29, %v3679_v12  ;;  %1955 = vmatmul.mubr.bf16.gmra.mrb[56].mxu1 %v1508_v34 }
 0x2b6   : > { %v2703_v27 = vpop.eup %2702  ;;  %v1480_v15 = vmul.f32 %v2701_v30, %v3683_v9 }
 0x2b7   : > { %v2705_v18 = vpop.eup %2704  ;;  %v1479_v51 = vmul.f32 %v2703_v27, %v3689_v62  ;;  %v1510_v5 = vpack.c.bf16 %v1478_v41, %v1474_v56 }
 0x2b8   : > { %v1481_v63 = vmul.f32 %v2705_v18, %v3699_v53  ;;  %v1512_v33 = vpack.c.bf16 %v1480_v15, %v1476_v24 }
 0x2b9   : > { %v1511_v60 = vpack.c.bf16 %v1479_v51, %v1475_v61  ;;  %v2710_v61 = vld [vmem:[%s2787_s30 + $0x20] sm:$0xff] }
 0x2ba   : > { %v1513_v49 = vpack.c.bf16 %v1481_v63, %v1477_v17  ;;  %v2711_v17 = vld [vmem:[%s2787_s30 + $0x28] sm:$0xff] }
 0x2bb   : > { %1865 = vmatprep.mubr.bf16.mxu0 %v1511_v60 }
 0x2bc   : > { %1962 = vmatprep.mubr.bf16.mxu1 %v1513_v49  ;;  %1866 = vmatmul.mubr.bf16.gmra.mrb[60].mxu0 %v1510_v5 }
 0x2bd   : > { %1963 = vmatmul.mubr.bf16.gmra.mrb[60].mxu1 %v1512_v33 }
 0x330   : > { %v2217_v21 = vpop.f32.mrb[32].mxu0 }
 0x331   : > { %v2218_v12 = vpop.f32.mrb[33].mxu0 }
 0x332   : > { %v2219_v23 = vadd.f32 %v2218_v12, %v2217_v21  ;;  %v2220_v62 = vpop.f32.mrb[34].mxu0 }
 0x333   : > { %v2221_v32 = vpop.f32.mrb[35].mxu0 }
 0x334   : > { %v2281_v9 = vpop.f32.mrb[32].mxu1  ;;  %v1812_v57 = vadd.f32 %v2219_v23, %v3734_v48  ;;  %v2222_v6 = vadd.f32 %v2221_v32, %v2220_v62 }
 0x335   : > { %v2282_v53 = vpop.f32.mrb[33].mxu1 }
 0x336   : > { %v2283_v52 = vadd.f32 %v2282_v53, %v2281_v9  ;;  %v2284_v44 = vpop.f32.mrb[34].mxu1  ;;  %v1815_v43 = vadd.f32 %v2222_v6, %v3734_v48 }
 0x337   : > { %v2285_v8 = vpop.f32.mrb[35].mxu1 }
 0x338   : > { %v1909_v10 = vadd.f32 %v2283_v52, %v1812_v57  ;;  %v2286_v59 = vadd.f32 %v2285_v8, %v2284_v44 }
 0x33a   : > { %v1971_v13 = vadd.f32 %v2706_v14, %v1909_v10  ;;  %v1912_v38 = vadd.f32 %v2286_v59, %v1815_v43  ;;  %v2712_v10 = vld [vmem:[%s2787_s30 + $0x30] sm:$0xff] }
 0x33c   : > { %1987 = vst [vmem:[%s3743_s13] sm:$0xff] %v1971_v13  ;;  %v1972_v58 = vadd.f32 %v2707_v4, %v1912_v38  ;;  %v2713_v38 = vld [vmem:[%s2787_s30 + $0x38] sm:$0xff] }
 0x33e   : > { %1988 = vst [vmem:[%s3743_s13 + $0x8] sm:$0xff] %v1972_v58 }
 0x33f   : > { %v2223_v1 = vpop.f32.mrb[36].mxu0 }
 0x340   : > { %v2287_v22 = vpop.f32.mrb[36].mxu1  ;;  %v2224_v25 = vpop.f32.mrb[37].mxu0 }
 0x341   : > { %v2225_v37 = vadd.f32 %v2224_v25, %v2223_v1  ;;  %v2288_v3 = vpop.f32.mrb[37].mxu1  ;;  %v2226_v2 = vpop.f32.mrb[38].mxu0 }
 0x342   : > { %v2289_v54 = vadd.f32 %v2288_v3, %v2287_v22  ;;  %v2290_v46 = vpop.f32.mrb[38].mxu1  ;;  %v2227_v26 = vpop.f32.mrb[39].mxu0 }
 0x343   : > { %v1820_v7 = vadd.f32 %v2225_v37, %v3734_v48  ;;  %v2228_v55 = vadd.f32 %v2227_v26, %v2226_v2  ;;  %v2291_v31 = vpop.f32.mrb[39].mxu1 }
 0x344   : > { %v2292_v20 = vadd.f32 %v2291_v31, %v2290_v46 }
 0x345   : > { %v1917_v45 = vadd.f32 %v2289_v54, %v1820_v7  ;;  %v1823_v35 = vadd.f32 %v2228_v55, %v3734_v48 }
 0x347   : > { %v1973_v42 = vadd.f32 %v2708_v19, %v1917_v45  ;;  %v1920_v50 = vadd.f32 %v2292_v20, %v1823_v35  ;;  %v2714_v20 = vld [vmem:[%s2787_s30 + $0x40] sm:$0xff] }
 0x349   : > { %1989 = vst [vmem:[%s3743_s13 + $0x10] sm:$0xff] %v1973_v42  ;;  %v1974_v40 = vadd.f32 %v2709_v39, %v1920_v50  ;;  %v2715_v42 = vld [vmem:[%s2787_s30 + $0x48] sm:$0xff] }
 0x34b   : > { %1990 = vst [vmem:[%s3743_s13 + $0x18] sm:$0xff] %v1974_v40 }
 0x34d   : > { %v2229_v28 = vpop.f32.mrb[40].mxu0 }
 0x34e   : > { %v2293_v34 = vpop.f32.mrb[40].mxu1  ;;  %v2230_v11 = vpop.f32.mrb[41].mxu0 }
 0x34f   : > { %v2231_v16 = vadd.f32 %v2230_v11, %v2229_v28  ;;  %v2294_v47 = vpop.f32.mrb[41].mxu1  ;;  %v2232_v36 = vpop.f32.mrb[42].mxu0 }
 0x350   : > { %v2295_v0 = vadd.f32 %v2294_v47, %v2293_v34  ;;  %v2296_v29 = vpop.f32.mrb[42].mxu1  ;;  %v2233_v30 = vpop.f32.mrb[43].mxu0 }
 0x351   : > { %v1828_v56 = vadd.f32 %v2231_v16, %v3734_v48  ;;  %v2234_v41 = vadd.f32 %v2233_v30, %v2232_v36  ;;  %v2297_v27 = vpop.f32.mrb[43].mxu1 }
 0x352   : > { %v2298_v24 = vadd.f32 %v2297_v27, %v2296_v29 }
 0x353   : > { %v1925_v15 = vadd.f32 %v2295_v0, %v1828_v56  ;;  %v1831_v18 = vadd.f32 %v2234_v41, %v3734_v48 }
 0x355   : > { %v1975_v51 = vadd.f32 %v2710_v61, %v1925_v15  ;;  %v1928_v5 = vadd.f32 %v2298_v24, %v1831_v18  ;;  %v2716_v24 = vld [vmem:[%s2787_s30 + $0x50] sm:$0xff]  ;;  %v2717_v61 = vld [vmem:[%s2787_s30 + $0x58] sm:$0xff] }
 0x357   : > { %1991 = vst [vmem:[%s3743_s13 + $0x20] sm:$0xff] %v1975_v51  ;;  %v1976_v63 = vadd.f32 %v2711_v17, %v1928_v5 }
 0x359   : > { %1992 = vst [vmem:[%s3743_s13 + $0x28] sm:$0xff] %v1976_v63  ;;  %v2235_v33 = vpop.f32.mrb[44].mxu0 }
 0x35a   : > { %v2299_v60 = vpop.f32.mrb[44].mxu1  ;;  %v2236_v49 = vpop.f32.mrb[45].mxu0 }
 0x35b   : > { %v2237_v21 = vadd.f32 %v2236_v49, %v2235_v33  ;;  %v2300_v12 = vpop.f32.mrb[45].mxu1  ;;  %v2238_v9 = vpop.f32.mrb[46].mxu0 }
 0x35c   : > { %v2301_v23 = vadd.f32 %v2300_v12, %v2299_v60  ;;  %v2302_v62 = vpop.f32.mrb[46].mxu1  ;;  %v2239_v53 = vpop.f32.mrb[47].mxu0 }
 0x35d   : > { %v1836_v32 = vadd.f32 %v2237_v21, %v3734_v48  ;;  %v2240_v57 = vadd.f32 %v2239_v53, %v2238_v9  ;;  %v2303_v52 = vpop.f32.mrb[47].mxu1 }
 0x35e   : > { %v2304_v44 = vadd.f32 %v2303_v52, %v2302_v62 }
 0x35f   : > { %v1933_v6 = vadd.f32 %v2301_v23, %v1836_v32  ;;  %v1839_v8 = vadd.f32 %v2240_v57, %v3734_v48 }
 0x361   : > { %v1977_v43 = vadd.f32 %v2712_v10, %v1933_v6  ;;  %v1936_v59 = vadd.f32 %v2304_v44, %v1839_v8  ;;  %v2241_v14 = vpop.f32.mrb[48].mxu0  ;;  %v2718_v44 = vld [vmem:[%s2787_s30 + $0x60] sm:$0xff] }
 0x362   : > { %v2242_v13 = vpop.f32.mrb[49].mxu0 }
 0x363   : > { %1993 = vst [vmem:[%s3743_s13 + $0x30] sm:$0xff] %v1977_v43  ;;  %v1978_v4 = vadd.f32 %v2713_v38, %v1936_v59  ;;  %v2243_v58 = vadd.f32 %v2242_v13, %v2241_v14  ;;  %v2244_v1 = vpop.f32.mrb[50].mxu0  ;;  %v2719_v14 = vld [vmem:[%s2787_s30 + $0x68] sm:$0xff] }
 0x364   : > { %v2245_v22 = vpop.f32.mrb[51].mxu0 }
 0x365   : > { %1994 = vst [vmem:[%s3743_s13 + $0x38] sm:$0xff] %v1978_v4  ;;  %v2246_v25 = vadd.f32 %v2245_v22, %v2244_v1  ;;  %v1844_v3 = vadd.f32 %v2243_v58, %v3734_v48 }
 0x367   : > { %v1847_v26 = vadd.f32 %v2246_v25, %v3734_v48 }
 0x36c   : > { %v2305_v37 = vpop.f32.mrb[48].mxu1 }
 0x36d   : > { %v2306_v2 = vpop.f32.mrb[49].mxu1 }
 0x36e   : > { %v2307_v54 = vadd.f32 %v2306_v2, %v2305_v37  ;;  %v2308_v46 = vpop.f32.mrb[50].mxu1 }
 0x36f   : > { %v2309_v7 = vpop.f32.mrb[51].mxu1 }
 0x370   : > { %v1941_v55 = vadd.f32 %v2307_v54, %v1844_v3  ;;  %v2310_v31 = vadd.f32 %v2309_v7, %v2308_v46  ;;  %v2720_v7 = vld [vmem:[%s2787_s30 + $0x70] sm:$0xff] }
 0x372   : > { %v1979_v45 = vadd.f32 %v2714_v20, %v1941_v55  ;;  %v1944_v35 = vadd.f32 %v2310_v31, %v1847_v26  ;;  %v2721_v20 = vld [vmem:[%s2787_s30 + $0x78] sm:$0xff] }
 0x373   : > { %v2247_v19 = vpop.f32.mrb[52].mxu0 }
 0x374   : > { %1995 = vst [vmem:[%s3743_s13 + $0x40] sm:$0xff] %v1979_v45  ;;  %v1980_v50 = vadd.f32 %v2715_v42, %v1944_v35  ;;  %v2311_v39 = vpop.f32.mrb[52].mxu1  ;;  %v2248_v40 = vpop.f32.mrb[53].mxu0 }
 0x375   : > { %v2249_v28 = vadd.f32 %v2248_v40, %v2247_v19  ;;  %v2312_v34 = vpop.f32.mrb[53].mxu1  ;;  %v2250_v11 = vpop.f32.mrb[54].mxu0 }
 0x376   : > { %1996 = vst [vmem:[%s3743_s13 + $0x48] sm:$0xff] %v1980_v50  ;;  %v2313_v16 = vadd.f32 %v2312_v34, %v2311_v39  ;;  %v2314_v47 = vpop.f32.mrb[54].mxu1  ;;  %v2251_v36 = vpop.f32.mrb[55].mxu0 }
 0x377   : > { %v1852_v0 = vadd.f32 %v2249_v28, %v3734_v48  ;;  %v2252_v29 = vadd.f32 %v2251_v36, %v2250_v11  ;;  %v2315_v30 = vpop.f32.mrb[55].mxu1 }
 0x378   : > { %v2316_v56 = vadd.f32 %v2315_v30, %v2314_v47 }
 0x379   : > { %v1949_v41 = vadd.f32 %v2313_v16, %v1852_v0  ;;  %v1855_v27 = vadd.f32 %v2252_v29, %v3734_v48 }
 0x37b   : > { %v1981_v15 = vadd.f32 %v2716_v24, %v1949_v41  ;;  %v1952_v18 = vadd.f32 %v2316_v56, %v1855_v27 }
 0x37d   : > { %1997 = vst [vmem:[%s3743_s13 + $0x50] sm:$0xff] %v1981_v15  ;;  %v1982_v51 = vadd.f32 %v2717_v61, %v1952_v18 }
 0x37f   : > { %1998 = vst [vmem:[%s3743_s13 + $0x58] sm:$0xff] %v1982_v51 }
 0x387   : > { %v2253_v5 = vpop.f32.mrb[56].mxu0 }
 0x388   : > { %v2317_v17 = vpop.f32.mrb[56].mxu1  ;;  %v2254_v63 = vpop.f32.mrb[57].mxu0 }
 0x389   : > { %v2255_v33 = vadd.f32 %v2254_v63, %v2253_v5  ;;  %v2318_v60 = vpop.f32.mrb[57].mxu1  ;;  %v2256_v49 = vpop.f32.mrb[58].mxu0 }
 0x38a   : > { %v2319_v21 = vadd.f32 %v2318_v60, %v2317_v17  ;;  %v2320_v12 = vpop.f32.mrb[58].mxu1  ;;  %v2257_v9 = vpop.f32.mrb[59].mxu0 }
 0x38b   : > { %v1860_v23 = vadd.f32 %v2255_v33, %v3734_v48  ;;  %v2258_v62 = vadd.f32 %v2257_v9, %v2256_v49  ;;  %v2321_v53 = vpop.f32.mrb[59].mxu1 }
 0x38c   : > { %v2322_v32 = vadd.f32 %v2321_v53, %v2320_v12 }
 0x38d   : > { %v1957_v57 = vadd.f32 %v2319_v21, %v1860_v23  ;;  %v1863_v52 = vadd.f32 %v2258_v62, %v3734_v48 }
 0x38f   : > { %v1983_v6 = vadd.f32 %v2718_v44, %v1957_v57  ;;  %v1960_v8 = vadd.f32 %v2322_v32, %v1863_v52  ;;  %v2259_v10 = vpop.f32.mrb[60].mxu0 }
 0x390   : > { %v2323_v43 = vpop.f32.mrb[60].mxu1  ;;  %v2260_v59 = vpop.f32.mrb[61].mxu0 }
 0x391   : > { %1999 = vst [vmem:[%s3743_s13 + $0x60] sm:$0xff] %v1983_v6  ;;  %v1984_v13 = vadd.f32 %v2719_v14, %v1960_v8  ;;  %v2261_v38 = vadd.f32 %v2260_v59, %v2259_v10  ;;  %v2324_v4 = vpop.f32.mrb[61].mxu1  ;;  %v2262_v58 = vpop.f32.mrb[62].mxu0 }
 0x392   : > { %v2325_v1 = vadd.f32 %v2324_v4, %v2323_v43  ;;  %v2326_v22 = vpop.f32.mrb[62].mxu1  ;;  %v2263_v25 = vpop.f32.mrb[63].mxu0 }
 0x393   : > { %2000 = vst [vmem:[%s3743_s13 + $0x68] sm:$0xff] %v1984_v13  ;;  %v1868_v37 = vadd.f32 %v2261_v38, %v3734_v48  ;;  %v2264_v3 = vadd.f32 %v2263_v25, %v2262_v58  ;;  %v2327_v2 = vpop.f32.mrb[63].mxu1 }
 0x394   : > { %v2328_v54 = vadd.f32 %v2327_v2, %v2326_v22 }
 0x395   : > { %v1965_v46 = vadd.f32 %v2325_v1, %v1868_v37  ;;  %v1871_v26 = vadd.f32 %v2264_v3, %v3734_v48 }
 0x397   : > { %v1985_v55 = vadd.f32 %v2720_v7, %v1965_v46  ;;  %v1968_v31 = vadd.f32 %v2328_v54, %v1871_v26 }
 0x399   : > { %2001 = vst [vmem:[%s3743_s13 + $0x70] sm:$0xff] %v1985_v55  ;;  %v1986_v45 = vadd.f32 %v2721_v20, %v1968_v31 }
 0x39b   : > { %2002 = vst [vmem:[%s3743_s13 + $0x78] sm:$0xff] %v1986_v45 }
 0x39c PF: > { %s17_s24 = sadd.s32 1, %s2728_s24  }
 0x39d   : > { %p14_p4 = scmp.ge.s32.totalorder %s17_s24, 4  }
 0x39f   :  { %16 = sbr.rel (!%p14_p4) target bundleno = 1 (0x1), region = 78 }

// kernel: text_encoder_forward.8
= control target key start
LH: loop header
LB: loop body
LE: loop exit
PB: predicated region body
PF: predicated region fallthrough
CT: control target
= control target key end

     0   :  { %s5228_s18 = smov 0   ;;  %s6751_s0 = inlined_call_operand.vmem [shape: bf16[8,32,384], index: 0, kind: input, shape index: {}]   ;;  %s6752_s1 = inlined_call_operand.vmem [shape: f32[8,32,128], index: 1, kind: input, shape index: {}]   ;;  %s6753_s2 = inlined_call_operand.vmem [shape: f32[32,32], index: 2, kind: input, shape index: {}]   ;;  %s6754_s3 = inlined_call_operand.vmem [shape: bf16[128,128], index: 3, kind: input, shape index: {}]   ;;  %s6755_s4 = inlined_call_operand.vmem [shape: f32[1,128], index: 4, kind: input, shape index: {}]   ;;  %s6756_s5 = inlined_call_operand.vmem [shape: f32[8,32,128], index: 5, kind: output, shape index: {}]  }
   0x1 LB: > { %s4105_s19 = sadd.s32 4294967295, %s5193_s18   ;;  %p4109_p0 = scmp.ge.s32.totalorder %s5193_s18, 1  ;;  %s5193_s18 = sphi %s5228_s18, %s15_s18  }
   0x2   : > { %p201_p1 = scmp.lt.s32.totalorder %s5193_s18, 3 }
   0x4   : > { %p202_p2 = pnand %p4109_p0, %p201_p1 }
   0x6   : > { %205 = sbr.rel (%p202_p2) target bundleno = 3469 (0xd8d), region = 40 }
   0xd   : > { %s4110_s20 = sshll.u32 %s4105_s19, 2  ;;  %vm331_vm0 = vcmask 261120   ;;  %s5195_s25 = smov 96   ;;  %v5363_v56 = vld [vmem:[%s6753_s2 + $0x10] sm:$0xff]  ;;  %v5368_v58 = vld [vmem:[%s6753_s2 + $0x18] sm:$0xff]  ;;  %v5376_v62 = vld [vmem:[%s6753_s2] sm:$0xff] }
   0xe   : > { %p238_p3 = scmp.lt.s32.totalorder %s4110_s20, 7  ;;  %s5196_s9 = smov 64  }
   0xf   : > { %s5197_s29 = smov 32  }
  0x10   : > { %s6785_s20 = smov (!%p238_p3, %s4110_s20), 7 }
  0x11   : > { %s4863_s21 = smul.u32 48, %s6785_s20  ;;  %s4273_s14 = sshll.u32 %s6785_s20, 5 }
  0x12   : > { %s6676_s17 = scalar_lea.vmem %s6752_s1, %s4273_s14  ;;  %s6689_s23 = scalar_lea.vmem %s6756_s5, %s4273_s14 }
  0x13   : > { %s5242_s24 = scalar_lea.vmem %s6751_s0, %s4863_s21 }
  0x14   : > { %v259_v0 = vld [vmem:[%s5242_s24] sm:$0xff]  ;;  %v261_v1 = vld [vmem:[%s5242_s24 + $0xc] sm:$0xff]  ;;  %v263_v7 = vld [vmem:[%s5242_s24 + $0x18] sm:$0xff] }
  0x15   : > { %v5247_v2 = vld [vmem:[%s5242_s24 + $0x30] sm:$0xff]  ;;  %v315_v3 = vrot.slane %v259_v0, 4  ;;  %v316_v4 = vrot.slane %v261_v1, 4  ;;  %v5250_v5 = vld [vmem:[%s5242_s24 + $0x3c] sm:$0xff]  ;;  %v265_v8 = vld [vmem:[%s5242_s24 + $0x24] sm:$0xff]  ;;  %v5255_v9 = vcombine.low %v259_v0, %v261_v1  ;;  %1098 = vrot.lane.b32.xlu1 %v261_v1, %s5195_s25  ;;  %v317_v11 = vrot.slane %v263_v7, 4 }
  0x16   : > { %v397_v6 = vrot.slane %v5247_v2, 4  ;;  %v398_v10 = vrot.slane %v5250_v5, 4  ;;  %v318_v12 = vrot.slane %v265_v8, 4  ;;  %v5260_v13 = vld [vmem:[%s5242_s24 + $0x48] sm:$0xff]  ;;  %v5263_v14 = vld [vmem:[%s5242_s24 + $0x54] sm:$0xff]  ;;  %v5267_v15 = vcombine.low %v5247_v2, %v5250_v5  ;;  %1096 = vrot.lane.b32.xlu0 %v259_v0, %s5195_s25  ;;  %v5277_v21 = vld [vmem:[%s5242_s24 + $0x60] sm:$0xff] }
  0x17   : > { %v4120_v16 = vcombine.low %v315_v3, %v316_v4  ;;  %v399_v17 = vrot.slane %v5260_v13, 4  ;;  %v400_v18 = vrot.slane %v5263_v14, 4  ;;  %4447 = vmatprep.mubr.msk.bf16.mxu0 %vm331_vm0, %v5255_v9  ;;  %v5280_v22 = vld [vmem:[%s5242_s24 + $0x6c] sm:$0xff]  ;;  %v5288_v26 = vld [vmem:[%s5242_s24 + $0x9c] sm:$0xff]  ;;  %v478_v28 = vrot.slane %v5277_v21, 4  ;;  %v5304_v33 = vld [vmem:[%s5242_s24 + $0x84] sm:$0xff] }
  0x18   : > { %v4126_v19 = vcombine.low %v397_v6, %v398_v10  ;;  %v4121_v20 = vcombine.low %v317_v11, %v318_v12  ;;  %4455 = vmatprep.mubr.msk.bf16.mxu1 %vm331_vm0, %v5267_v15  ;;  %v5285_v25 = vld [vmem:[%s5242_s24 + $0x90] sm:$0xff]  ;;  %v479_v29 = vrot.slane %v5280_v22, 4  ;;  %v560_v31 = vrot.slane %v5288_v26, 4  ;;  %v5301_v32 = vld [vmem:[%s5242_s24 + $0x78] sm:$0xff]  ;;  %v5308_v36 = vld [vmem:[%s5242_s24 + $0xa8] sm:$0xff] }
  0x19   : > { %4831 = vmatprep.subr.msk.bf16.mxu0 %vm331_vm0, %v4120_v16  ;;  %v339_v23 = vsel %vm331_vm0, %v4120_v16, 0  ;;  %v4127_v24 = vcombine.low %v399_v17, %v400_v18  ;;  %1100 = vrot.lane.b32.xlu1 %v263_v7, %s5195_s25  ;;  %v559_v30 = vrot.slane %v5285_v25, 4  ;;  %v5312_v39 = vld [vmem:[%s5242_s24 + $0xb4] sm:$0xff]  ;;  %v480_v40 = vrot.slane %v5301_v32, 4  ;;  %v5402_v18 = vld [vmem:[%s6753_s2 + $0x8] sm:$0xff] }
  0x1a   : > { %4833 = vmatprep.subr.msk.bf16.mxu1 %vm331_vm0, %v4126_v19  ;;  %4444 = vmatpush3.bf16.xpose.msra.mxu0 %v339_v23  ;;  %v420_v27 = vsel %vm331_vm0, %v4126_v19, 0  ;;  %v342_v34 = vsel %vm331_vm0, %v4121_v20, 0  ;;  %v4132_v35 = vcombine.low %v478_v28, %v479_v29  ;;  %v481_v41 = vrot.slane %v5304_v33, 4 }
  0x1b   : > { %4452 = vmatpush3.bf16.xpose.msra.mxu1 %v420_v27  ;;  %4832 = vmatprep.subr.msk.bf16.mxu0 %vm331_vm0, %v4121_v20  ;;  %v423_v37 = vsel %vm331_vm0, %v4127_v24, 0  ;;  %v4138_v38 = vcombine.low %v559_v30, %v560_v31  ;;  %v561_v42 = vrot.slane %v5308_v36, 4  ;;  %v562_v43 = vrot.slane %v5312_v39, 4 }
  0x1c   : > { %4834 = vmatprep.subr.msk.bf16.mxu1 %vm331_vm0, %v4127_v24  ;;  %v5320_v44 = vcombine.low %v263_v7, %v265_v8  ;;  %v5324_v45 = vcombine.low %v5260_v13, %v5263_v14  ;;  %v501_v46 = vsel %vm331_vm0, %v4132_v35, 0  ;;  %v4133_v47 = vcombine.low %v480_v40, %v481_v41 }
  0x1d   : > { %1102 = vrot.lane.b32.xlu1 %v265_v8, %s5195_s25  ;;  %v582_v48 = vsel %vm331_vm0, %v4138_v38, 0  ;;  %v4139_v49 = vcombine.low %v561_v42, %v562_v43  ;;  %v5330_v50 = vcombine.low %v5277_v21, %v5280_v22  ;;  %v5336_v51 = vcombine.low %v5285_v25, %v5288_v26 }
  0x1e   : > { %6760 = vst [vmem:[#allocation2_spill] sm:$0xff] %v5324_v45  ;;  %v504_v52 = vsel %vm331_vm0, %v4133_v47, 0  ;;  %v5350_v54 = vcombine.low %v5301_v32, %v5304_v33  ;;  %v5354_v55 = vcombine.low %v5308_v36, %v5312_v39 }
  0x1f   : > { %v585_v53 = vsel %vm331_vm0, %v4139_v49, 0 }
  0x22   : > { %4446 = vmatpush3.bf16.xpose.msra.mxu0 %v342_v34 }
  0x23   : > { %4454 = vmatpush3.bf16.xpose.msra.mxu1 %v423_v37  ;;  %4835 = vmatprep.subr.msk.bf16.mxu0 %vm331_vm0, %v4132_v35 }
  0x24   : > { %4837 = vmatprep.subr.msk.bf16.mxu1 %vm331_vm0, %v4138_v38 }
  0x29   : > { %4448 = vmatmul.mubr.msk.bf16.vlgmr.msra.gmra.mrb[0].mxu0 %vm331_vm0, %v5320_v44 }
  0x2a   : > { %4456 = vmatmul.mubr.msk.bf16.vlgmr.msra.gmra.mrb[0].mxu1 %vm331_vm0, %v5324_v45  ;;  %4460 = vmatpush3.bf16.xpose.msra.mxu0 %v501_v46 }
  0x2b   : > { %4468 = vmatpush3.bf16.xpose.msra.mxu1 %v582_v48  ;;  %4836 = vmatprep.subr.msk.bf16.mxu0 %vm331_vm0, %v4133_v47 }
  0x2c   : > { %4838 = vmatprep.subr.msk.bf16.mxu1 %vm331_vm0, %v4139_v49  ;;  %4463 = vmatprep.mubr.msk.bf16.mxu0 %vm331_vm0, %v5330_v50 }
  0x2d   : > { %4471 = vmatprep.mubr.msk.bf16.mxu1 %vm331_vm0, %v5336_v51 }
  0x32   : > { %4462 = vmatpush3.bf16.xpose.msra.mxu0 %v504_v52 }
  0x33   : > { %4470 = vmatpush3.bf16.xpose.msra.mxu1 %v585_v53 }
  0x39   : > { %4464 = vmatmul.mubr.msk.bf16.vlgmr.msra.gmra.mrb[4].mxu0 %vm331_vm0, %v5350_v54 }
  0x3a   : > { %4472 = vmatmul.mubr.msk.bf16.vlgmr.msra.gmra.mrb[4].mxu1 %vm331_vm0, %v5354_v55 }
  0xfc   : > { %v4449_v57 = vpop.f32.mrb[0].mxu0 }
  0xfd   : > { %v5371_v59 = vadd.f32 %v4449_v57, %v5363_v56  ;;  %v4457_v60 = vpop.f32.mrb[0].mxu1  ;;  %v378_v61 = vpop.f32.mrb[1].mxu0 }
  0xfe   : > { %v5379_v63 = vadd.f32 %v4457_v60, %v5363_v56  ;;  %v459_v0 = vpop.f32.mrb[1].mxu1  ;;  %v4450_v1 = vpop.f32.mrb[2].mxu0  ;;  %v5387_v8 = vadd.f32 %v378_v61, %v5376_v62 }
  0xff   : > { %v5382_v3 = vadd.f32 %v4450_v1, %v5368_v58  ;;  %v4458_v4 = vpop.f32.mrb[2].mxu1  ;;  %v381_v6 = vpop.f32.mrb[3].mxu0  ;;  %v642_v7 = vsel %vm331_vm0, %v5371_v59, -inf  ;;  %v5397_v17 = vadd.f32 %v459_v0, %v5376_v62 }
 0x100   : > { %v462_v10 = vpop.f32.mrb[3].mxu1  ;;  %v654_v11 = vsel %vm331_vm0, %v5379_v63, -inf  ;;  %643 = vmax.xlane.f32.xlu1 %v642_v7  ;;  %v5392_v12 = vadd.f32 %v4458_v4, %v5368_v58  ;;  %v636_v19 = vsel %vm331_vm0, %v5387_v8, -inf  ;;  %v5412_v24 = vadd.f32 %v381_v6, %v5402_v18  ;;  %v5464_v6 = vpop.permute.xlu1 %1098 }
 0x101   : > { %655 = vmax.xlane.f32.xlu0 %v654_v11  ;;  %v645_v16 = vsel %vm331_vm0, %v5382_v3, -inf  ;;  %v5407_v20 = vadd.f32 %v462_v10, %v5402_v18  ;;  %v648_v27 = vsel %vm331_vm0, %v5397_v17, -inf  ;;  %v5470_v11 = vpop.permute.xlu0 %1096 }
 0x102   : > { %v657_v23 = vsel %vm331_vm0, %v5392_v12, -inf  ;;  %v639_v30 = vsel %vm331_vm0, %v5412_v24, -inf }
 0x103   : > { %v651_v28 = vsel %vm331_vm0, %v5407_v20, -inf }
 0x104   : > { %646 = vmax.xlane.f32.xlu1 %v645_v16  ;;  %v5466_v7 = vpop.permute.xlu1 %1100 }
 0x105   : > { %637 = vmax.xlane.f32.xlu0 %v636_v19 }
 0x108   : > { %658 = vmax.xlane.f32.xlu1 %v657_v23  ;;  %v5468_v10 = vpop.permute.xlu1 %1102 }
 0x109   : > { %649 = vmax.xlane.f32.xlu0 %v648_v27 }
 0x10c   : > { %652 = vmax.xlane.f32.xlu1 %v651_v28  ;;  %v4465_v29 = vpop.f32.mrb[4].mxu0 }
 0x10d   : > { %v5421_v31 = vadd.f32 %v4465_v29, %v5363_v56  ;;  %640 = vmax.xlane.f32.xlu0 %v639_v30  ;;  %v4473_v34 = vpop.f32.mrb[4].mxu1  ;;  %v540_v35 = vpop.f32.mrb[5].mxu0 }
 0x10e   : > { %v5424_v37 = vadd.f32 %v4473_v34, %v5363_v56  ;;  %v621_v38 = vpop.f32.mrb[5].mxu1  ;;  %v4466_v40 = vpop.f32.mrb[6].mxu0  ;;  %v5429_v47 = vadd.f32 %v540_v35, %v5376_v62 }
 0x10f   : > { %v666_v41 = vsel %vm331_vm0, %v5421_v31, -inf  ;;  %v543_v42 = vpop.f32.mrb[7].mxu0  ;;  %v4474_v43 = vpop.f32.mrb[6].mxu1  ;;  %v5434_v49 = vadd.f32 %v621_v38, %v5376_v62  ;;  %v5445_v57 = vadd.f32 %v4466_v40, %v5368_v58 }
 0x110   : > { %v624_v46 = vpop.f32.mrb[7].mxu1  ;;  %v678_v48 = vsel %vm331_vm0, %v5424_v37, -inf  ;;  %v660_v52 = vsel %vm331_vm0, %v5429_v47, -inf  ;;  %v5448_v60 = vadd.f32 %v4474_v43, %v5368_v58  ;;  %v5455_v1 = vadd.f32 %v543_v42, %v5402_v18 }
 0x111   : > { %667 = vmax.xlane.f32.xlu0 %v666_v41  ;;  %v672_v53 = vsel %vm331_vm0, %v5434_v49, -inf  ;;  %v669_v61 = vsel %vm331_vm0, %v5445_v57, -inf }
 0x112   : > { %v681_v0 = vsel %vm331_vm0, %v5448_v60, -inf }
 0x115   : > { %679 = vmax.xlane.f32.xlu0 %v678_v48 }
 0x119   : > { %661 = vmax.xlane.f32.xlu0 %v660_v52 }
 0x11d   : > { %673 = vmax.xlane.f32.xlu0 %v672_v53  ;;  %1181 = vrot.lane.b32.xlu1 %v5250_v5, %s5195_s25  ;;  %v5458_v5 = vadd.f32 %v624_v46, %v5402_v18 }
 0x11f   : > { %v675_v4 = vsel %vm331_vm0, %v5458_v5, -inf }
 0x133   : > { %1179 = vrot.lane.b32.xlu0 %v5247_v2, %s5195_s25  ;;  %v663_v2 = vsel %vm331_vm0, %v5455_v1, -inf }
 0x141   : > { %670 = vmax.xlane.f32.xlu1 %v669_v61 }
 0x145   : > { %682 = vmax.xlane.f32.xlu1 %v681_v0 }
 0x149   : > { %664 = vmax.xlane.f32.xlu1 %v663_v2 }
 0x14d   : > { %676 = vmax.xlane.f32.xlu1 %v675_v4 }
 0x18d   : > { %v644_v16 = vpop.xlane.xlu1 %643 }
 0x18e   : > { %v656_v19 = vpop.xlane.xlu0 %655  ;;  %v686_v23 = vsub.f32 %v5371_v59, %v644_v16 }
 0x18f   : > { %v690_v27 = vsub.f32 %v5379_v63, %v656_v19 }
 0x190   : > { %v704_v28 = vmul.f32 1.442695, %v686_v23 }
 0x191   : > { %v712_v29 = vmul.f32 1.442695, %v690_v27  ;;  %v647_v30 = vpop.xlane.xlu1 %646 }
 0x192   : > { %4899 = vpow2.f32 %v704_v28  ;;  %v687_v34 = vsub.f32 %v5382_v3, %v647_v30  ;;  %v638_v35 = vpop.xlane.xlu0 %637 }
 0x193   : > { %v684_v38 = vsub.f32 %v5387_v8, %v638_v35  ;;  %4901 = vpow2.f32 %v712_v29 }
 0x194   : > { %v706_v40 = vmul.f32 1.442695, %v687_v34 }
 0x195   : > { %v700_v41 = vmul.f32 1.442695, %v684_v38  ;;  %v659_v42 = vpop.xlane.xlu1 %658 }
 0x196   : > { %4903 = vpow2.f32 %v706_v40  ;;  %v691_v43 = vsub.f32 %v5392_v12, %v659_v42  ;;  %v650_v46 = vpop.xlane.xlu0 %649 }
 0x197   : > { %v688_v59 = vsub.f32 %v5397_v17, %v650_v46  ;;  %4905 = vpow2.f32 %v700_v41 }
 0x198   : > { %v714_v63 = vmul.f32 1.442695, %v691_v43 }
 0x199   : > { %v708_v48 = vmul.f32 1.442695, %v688_v59  ;;  %v653_v52 = vpop.xlane.xlu1 %652 }
 0x19a   : > { %4907 = vpow2.f32 %v714_v63  ;;  %v689_v3 = vsub.f32 %v5407_v20, %v653_v52  ;;  %v641_v53 = vpop.xlane.xlu0 %640 }
 0x19b   : > { %v685_v8 = vsub.f32 %v5412_v24, %v641_v53  ;;  %4909 = vpow2.f32 %v708_v48 }
 0x19c   : > { %v5480_v61 = vpop.eup %4899  ;;  %v710_v0 = vmul.f32 1.442695, %v689_v3 }
 0x19d   : > { %v702_v2 = vmul.f32 1.442695, %v685_v8  ;;  %v738_v12 = vsel %vm331_vm0, %v5480_v61, 0.0  ;;  %v5484_v4 = vpop.eup %4901 }
 0x19e   : > { %v668_v17 = vpop.xlane.xlu0 %667  ;;  %739 = vadd.xlane.f32.xlu0 %v738_v12  ;;  %v750_v23 = vsel %vm331_vm0, %v5484_v4, 0.0  ;;  %v5538_v12 = vld [vmem:[%s5242_s24 + $0x38] ss:$12 sps:$4 sm:$0xff]  }
 0x19f   : > { %4911 = vpow2.f32 %v702_v2  ;;  %v694_v16 = vsub.f32 %v5421_v31, %v668_v17  ;;  %v5535_v2 = vld [vmem:[%s5242_s24 + $0x20] ss:$12 sps:$4 sm:$0xff]   ;;  %4483 = vmatprep.subr.bf16.mxu1 %v5538_v12  ;;  %v5545_v17 = vld [vmem:[%s5242_s24 + $0x50] ss:$12 sps:$4 sm:$0xff]  }
 0x1a0   : > { %v5487_v19 = vpop.eup %4903  ;;  %4913 = vpow2.f32 %v710_v0  ;;  %v5528_v0 = vld [vmem:[%s5242_s24 + $0x8] ss:$12 sps:$4 sm:$0xff]   ;;  %4484 = vmatpush3.bf16.msra.mxu1 %v5538_v12 }
 0x1a1   : > { %v720_v20 = vmul.f32 1.442695, %v694_v16  ;;  %v741_v24 = vsel %vm331_vm0, %v5487_v19, 0.0  ;;  %v5493_v27 = vpop.eup %4905  ;;  %4475 = vmatprep.subr.bf16.mxu0 %v5528_v0  ;;  %v5548_v16 = vld [vmem:[%s5242_s24 + $0x68] ss:$12 sps:$4 sm:$0xff]   ;;  %4485 = vmatprep.subr.bf16.mxu1 %v5545_v17 }
 0x1a2   : > { %v680_v28 = vpop.xlane.xlu0 %679  ;;  %742 = vadd.xlane.f32.xlu1 %v741_v24  ;;  %751 = vadd.xlane.f32.xlu0 %v750_v23  ;;  %v732_v35 = vsel %vm331_vm0, %v5493_v27, 0.0 }
 0x1a3   : > { %4915 = vpow2.f32 %v720_v20  ;;  %v698_v29 = vsub.f32 %v5424_v37, %v680_v28  ;;  %4476 = vmatpush3.bf16.msra.mxu0 %v5528_v0  ;;  %v5556_v20 = vld [vmem:[%s5242_s24 + $0x98] ss:$12 sps:$4 sm:$0xff]  }
 0x1a4   : > { %v5496_v30 = vpop.eup %4907  ;;  %4477 = vmatprep.subr.bf16.mxu0 %v5535_v2  ;;  %4486 = vmatpush3.bf16.msra.mxu1 %v5545_v17 }
 0x1a5   : > { %v728_v31 = vmul.f32 1.442695, %v698_v29  ;;  %v753_v34 = vsel %vm331_vm0, %v5496_v30, 0.0  ;;  %v5502_v38 = vpop.eup %4909  ;;  %4499 = vmatprep.subr.bf16.mxu1 %v5556_v20 }
 0x1a6   : > { %v662_v40 = vpop.xlane.xlu0 %661  ;;  %754 = vadd.xlane.f32.xlu1 %v753_v34  ;;  %733 = vadd.xlane.f32.xlu0 %v732_v35  ;;  %v744_v43 = vsel %vm331_vm0, %v5502_v38, 0.0 }
 0x1a7   : > { %4917 = vpow2.f32 %v728_v31  ;;  %v692_v41 = vsub.f32 %v5429_v47, %v662_v40  ;;  %4478 = vmatpush3.bf16.msra.mxu0 %v5535_v2 }
 0x1a8   : > { %4491 = vmatprep.subr.bf16.mxu0 %v5548_v16 }
 0x1a9   : > { %v5505_v42 = vpop.eup %4911  ;;  %v716_v37 = vmul.f32 1.442695, %v692_v41 }
 0x1aa   : > { %745 = vadd.xlane.f32.xlu0 %v744_v43  ;;  %v735_v46 = vsel %vm331_vm0, %v5505_v42, 0.0  ;;  %v5511_v59 = vpop.eup %4913  ;;  %v674_v28 = vpop.xlane.xlu0 %673 }
 0x1ab   : > { %4919 = vpow2.f32 %v716_v37  ;;  %736 = vadd.xlane.f32.xlu1 %v735_v46  ;;  %v747_v47 = vsel %vm331_vm0, %v5511_v59, 0.0  ;;  %v696_v35 = vsub.f32 %v5434_v49, %v674_v28 }
 0x1ad   : > { %v5513_v63 = vpop.eup %4915  ;;  %v724_v43 = vmul.f32 1.442695, %v696_v35 }
 0x1ae   : > { %v762_v48 = vsel %vm331_vm0, %v5513_v63, 0.0 }
 0x1af   : > { %748 = vadd.xlane.f32.xlu1 %v747_v47  ;;  %763 = vadd.xlane.f32.xlu0 %v762_v48 }
 0x1b1   : > { %v5519_v52 = vpop.eup %4917 }
 0x1b2   : > { %v774_v3 = vsel %vm331_vm0, %v5519_v52, 0.0 }
 0x1b3   : > { %775 = vadd.xlane.f32.xlu0 %v774_v3 }
 0x1b5   : > { %v5523_v53 = vpop.eup %4919 }
 0x1b6   : > { %v756_v8 = vsel %vm331_vm0, %v5523_v53, 0.0 }
 0x1b7   : > { %757 = vadd.xlane.f32.xlu0 %v756_v8 }
 0x1c0   : > { %1185 = vrot.lane.b32.xlu1 %v5263_v14, %s5195_s25  ;;  %v5552_v14 = vpop.permute.xlu1 %1181 }
 0x1cd   : > { %1183 = vrot.lane.b32.xlu0 %v5260_v13, %s5195_s25 }
 0x1ce   : > { %v671_v24 = vpop.xlane.xlu1 %670 }
 0x1cf   : > { %v695_v23 = vsub.f32 %v5445_v57, %v671_v24 }
 0x1d1   : > { %v722_v29 = vmul.f32 1.442695, %v695_v23 }
 0x1d2   : > { %v683_v31 = vpop.xlane.xlu1 %682 }
 0x1d3   : > { %v699_v34 = vsub.f32 %v5448_v60, %v683_v31  ;;  %4921 = vpow2.f32 %v722_v29 }
 0x1d5   : > { %v730_v40 = vmul.f32 1.442695, %v699_v34 }
 0x1d6   : > { %v665_v41 = vpop.xlane.xlu1 %664 }
 0x1d7   : > { %v693_v37 = vsub.f32 %v5455_v1, %v665_v41  ;;  %4923 = vpow2.f32 %v730_v40 }
 0x1d8   : > { %4925 = vpow2.f32 %v724_v43 }
 0x1d9   : > { %v718_v13 = vmul.f32 1.442695, %v693_v37 }
 0x1da   : > { %v677_v8 = vpop.xlane.xlu1 %676 }
 0x1db   : > { %4927 = vpow2.f32 %v718_v13  ;;  %v697_v24 = vsub.f32 %v5458_v5, %v677_v8 }
 0x1dd   : > { %v5565_v46 = vpop.eup %4921  ;;  %v726_v23 = vmul.f32 1.442695, %v697_v24 }
 0x1de   : > { %v765_v57 = vsel %vm331_vm0, %v5565_v46, 0.0 }
 0x1df   : > { %4929 = vpow2.f32 %v726_v23 }
 0x1e1   : > { %v5569_v47 = vpop.eup %4923 }
 0x1e2   : > { %v5571_v60 = vpop.eup %4925  ;;  %v777_v49 = vsel %vm331_vm0, %v5569_v47, 0.0 }
 0x1e3   : > { %v768_v3 = vsel %vm331_vm0, %v5571_v60, 0.0 }
 0x1e4   : > { %766 = vadd.xlane.f32.xlu1 %v765_v57 }
 0x1e5   : > { %v5575_v48 = vpop.eup %4927 }
 0x1e6   : > { %v759_v1 = vsel %vm331_vm0, %v5575_v48, 0.0 }
 0x1e8   : > { %778 = vadd.xlane.f32.xlu1 %v777_v49 }
 0x1ec   : > { %760 = vadd.xlane.f32.xlu1 %v759_v1  ;;  %769 = vadd.xlane.f32.xlu0 %v768_v3 }
 0x1fd   : > { %1264 = vrot.lane.b32.xlu1 %v5280_v22, %s5195_s25 }
 0x202   : > { %1262 = vrot.lane.b32.xlu0 %v5277_v21, %s5195_s25  ;;  %v5598_v21 = vpop.eup %4929 }
 0x203   : > { %v771_v22 = vsel %vm331_vm0, %v5598_v21, 0.0 }
 0x206   : > { %1108 = vrot.lane.b32.xlu0 %v5255_v9, %s5195_s25 }
 0x20a   : > { %1266 = vrot.lane.b32.xlu0 %v5301_v32, %s5195_s25 }
 0x20e   : > { %1345 = vrot.lane.b32.xlu0 %v5285_v25, %s5195_s25  ;;  %v1180_v25 = vpop.permute.xlu0 %1179 }
 0x212   : > { %1191 = vrot.lane.b32.xlu0 %v5267_v15, %s5195_s25 }
 0x216   : > { %1349 = vrot.lane.b32.xlu0 %v5308_v36, %s5195_s25 }
 0x21a   : > { %1274 = vrot.lane.b32.xlu0 %v5330_v50, %s5195_s25 }
 0x21e   : > { %1357 = vrot.lane.b32.xlu0 %v5336_v51, %s5195_s25 }
 0x221   : > { %772 = vadd.xlane.f32.xlu1 %v771_v22  ;;  %v5622_v22 = vld [vmem:[%s5242_s24 + $0x80] ss:$12 sps:$4 sm:$0xff]  }
 0x22b   : > { %v740_v32 = vpop.xlane.xlu0 %739 }
 0x22f   : > { %v743_v5 = vpop.xlane.xlu1 %742  ;;  %v752_v28 = vpop.xlane.xlu0 %751 }
 0x230   : > { %4931 = vrcp.f32 %v743_v5 }
 0x232   : > { %1110 = vrot.lane.b32.xlu1 %v5320_v44, %s5195_s25 }
 0x233   : > { %v755_v36 = vpop.xlane.xlu1 %754  ;;  %v734_v29 = vpop.xlane.xlu0 %733 }
 0x234   : > { %4933 = vrcp.f32 %v734_v29 }
 0x235   : > { %4935 = vrcp.f32 %v740_v32 }
 0x236   : > { %1268 = vrot.lane.b32.xlu1 %v5304_v33, %s5195_s25 }
 0x237   : > { %v746_v34 = vpop.xlane.xlu0 %745 }
 0x238   : > { %v737_v31 = vpop.xlane.xlu1 %736 }
 0x239   : > { %4937 = vrcp.f32 %v737_v31 }
 0x23a   : > { %4939 = vrcp.f32 %v755_v36  ;;  %1347 = vrot.lane.b32.xlu1 %v5288_v26, %s5195_s25  ;;  %v4932_v40 = vpop.eup %4931 }
 0x23b   : > { %4941 = vrcp.f32 %v746_v34  ;;  %v799_v43 = vmul.f32 %v4932_v40, %v5487_v19 }
 0x23c   : > { %4943 = vrcp.f32 %v752_v28  ;;  %v749_v35 = vpop.xlane.xlu1 %748 }
 0x23d   : > { %4945 = vrcp.f32 %v749_v35 }
 0x23e   : > { %1193 = vrot.lane.b32.xlu1 %v5324_v45, %s5195_s25  ;;  %v4934_v41 = vpop.eup %4933 }
 0x23f   : > { %v4936_v33 = vpop.eup %4935  ;;  %v796_v26 = vmul.f32 %v4934_v41, %v5493_v27 }
 0x240   : > { %v798_v1 = vmul.f32 %v4936_v33, %v5480_v61  ;;  %v1105_v61 = vrot.slane %v5464_v6, 4  ;;  %v5650_v28 = vpop.permute.xlu1 %1185 }
 0x242   : > { %1351 = vrot.lane.b32.xlu1 %v5312_v39, %s5195_s25  ;;  %v813_v23 = vpack.c.bf16 %v799_v43, %v798_v1  ;;  %v1106_v1 = vrot.slane %v5466_v7, 4 }
 0x243   : > { %v4938_v37 = vpop.eup %4937 }
 0x244   : > { %v4940_v13 = vpop.eup %4939  ;;  %v797_v57 = vmul.f32 %v4938_v37, %v5505_v42  ;;  %v1104_v42 = vrot.slane %v5470_v11, 4  ;;  %v1188_v11 = vrot.slane %v5552_v14, 4 }
 0x245   : > { %v4942_v49 = vpop.eup %4941  ;;  %v803_v39 = vmul.f32 %v4940_v13, %v5496_v30 }
 0x246   : > { %v4944_v3 = vpop.eup %4943  ;;  %v812_v8 = vpack.c.bf16 %v797_v57, %v796_v26  ;;  %1276 = vrot.lane.b32.xlu1 %v5350_v54, %s5195_s25  ;;  %v800_v19 = vmul.f32 %v4942_v49, %v5502_v38  ;;  %v5636_v38 = vld [vmem:[%s5242_s24 + $0xb0] ss:$12 sps:$4 sm:$0xff]   ;;  %v4158_v6 = vcombine.low %v1104_v42, %v1105_v61 }
 0x247   : > { %v4946_v24 = vpop.eup %4945  ;;  %v802_v32 = vmul.f32 %v4944_v3, %v5484_v4  ;;  %v1107_v3 = vrot.slane %v5468_v10, 4 }
 0x248   : > { %4479 = vmatprep.mubr.msk.bf16.mxu0 %vm331_vm0, %v812_v8  ;;  %v801_v27 = vmul.f32 %v4946_v24, %v5511_v59  ;;  %v1187_v59 = vrot.slane %v1180_v25, 4  ;;  %v764_v25 = vpop.xlane.xlu0 %763 }
 0x249   : > { %4480 = vmatmul.mubr.msk.bf16.vlgmr.msra.gmra.mrb[8].mxu0 %vm331_vm0, %v813_v23  ;;  %v815_v5 = vpack.c.bf16 %v803_v39, %v802_v32 }
 0x24a   : > { %4492 = vmatpush3.bf16.msra.mxu0 %v5548_v16  ;;  %v814_v30 = vpack.c.bf16 %v801_v27, %v800_v19  ;;  %1359 = vrot.lane.b32.xlu1 %v5354_v55, %s5195_s25  ;;  %v5645_v4 = vcombine.low %v1187_v59, %v1188_v11  ;;  %v4159_v19 = vcombine.low %v1106_v1, %v1107_v3  ;;  %v1190_v1 = vrot.slane %v5650_v28, 4 }
 0x24b   : > { %4493 = vmatprep.subr.bf16.mxu0 %v5622_v22 }
 0x24c   : > { %4487 = vmatprep.mubr.msk.bf16.mxu1 %vm331_vm0, %v814_v30  ;;  %v776_v36 = vpop.xlane.xlu0 %775 }
 0x24d   : > { %4488 = vmatmul.mubr.msk.bf16.vlgmr.msra.gmra.mrb[8].mxu1 %vm331_vm0, %v815_v5 }
 0x24e   : > { %4494 = vmatpush3.bf16.msra.mxu0 %v5622_v22  ;;  %4500 = vmatpush3.bf16.msra.mxu1 %v5556_v20 }
 0x24f   : > { %4839 = vmatprep.subr.msk.bf16.mxu0 %vm331_vm0, %v4158_v6  ;;  %4501 = vmatprep.subr.bf16.mxu1 %v5636_v38 }
 0x250   : > { %v758_v31 = vpop.xlane.xlu0 %757 }
 0x252   : > { %4502 = vmatpush3.bf16.msra.mxu1 %v5636_v38 }
 0x253   : > { %4841 = vmatprep.subr.msk.bf16.mxu1 %vm331_vm0, %v5645_v4 }
 0x254   : > { %v5652_v35 = vpop.permute.xlu0 %1183 }
 0x271   : > { %v767_v29 = vpop.xlane.xlu1 %766 }
 0x272   : > { %4947 = vrcp.f32 %v767_v29 }
 0x273   : > { %4949 = vrcp.f32 %v758_v31 }
 0x274   : > { %4951 = vrcp.f32 %v764_v25 }
 0x275   : > { %v779_v34 = vpop.xlane.xlu1 %778 }
 0x279   : > { %v761_v14 = vpop.xlane.xlu1 %760  ;;  %v770_v40 = vpop.xlane.xlu0 %769 }
 0x27a   : > { %4953 = vrcp.f32 %v761_v14 }
 0x27b   : > { %4955 = vrcp.f32 %v779_v34 }
 0x27c   : > { %v4948_v41 = vpop.eup %4947  ;;  %4957 = vrcp.f32 %v770_v40 }
 0x27d   : > { %v4950_v33 = vpop.eup %4949  ;;  %v807_v13 = vmul.f32 %v4948_v41, %v5565_v46  ;;  %v1263_v26 = vpop.permute.xlu0 %1262  ;;  %v1125_v46 = vsel %vm331_vm0, %v4158_v6, 0  ;;  %4959 = vrcp.f32 %v776_v36 }
 0x27e   : > { %v4952_v37 = vpop.eup %4951  ;;  %v804_v57 = vmul.f32 %v4950_v33, %v5523_v53  ;;  %v1265_v27 = vpop.permute.xlu1 %1264  ;;  %v1270_v10 = vrot.slane %v1263_v26, 4  ;;  %v1189_v26 = vrot.slane %v5652_v35, 4 }
 0x27f   : > { %v806_v8 = vmul.f32 %v4952_v37, %v5513_v63  ;;  %v1271_v7 = vrot.slane %v1265_v27, 4  ;;  %v1128_v63 = vsel %vm331_vm0, %v4159_v19, 0 }
 0x281   : > { %v817_v39 = vpack.c.bf16 %v807_v13, %v806_v8  ;;  %v1109_v23 = vpop.permute.xlu0 %1108  ;;  %v4166_v53 = vcombine.low %v1270_v10, %v1271_v7 }
 0x283   : > { %v1291_v59 = vsel %vm331_vm0, %v4166_v53, 0 }
 0x284   : > { %v4954_v43 = vpop.eup %4953 }
 0x285   : > { %v805_v49 = vmul.f32 %v4954_v43, %v5575_v48  ;;  %v1267_v48 = vpop.permute.xlu0 %1266  ;;  %v4956_v25 = vpop.eup %4955 }
 0x286   : > { %v1272_v11 = vrot.slane %v1267_v48, 4  ;;  %v4958_v31 = vpop.eup %4957  ;;  %v811_v36 = vmul.f32 %v4956_v25, %v5569_v47 }
 0x287   : > { %v816_v24 = vpack.c.bf16 %v805_v49, %v804_v57  ;;  %v4960_v34 = vpop.eup %4959  ;;  %v808_v33 = vmul.f32 %v4958_v31, %v5571_v60  ;;  %v4163_v60 = vcombine.low %v1189_v26, %v1190_v1 }
 0x288   : > { %v810_v13 = vmul.f32 %v4960_v34, %v5519_v52  ;;  %v1208_v52 = vsel %vm331_vm0, %v5645_v4, 0 }
 0x289   : > { %4495 = vmatprep.mubr.msk.bf16.mxu0 %vm331_vm0, %v816_v24  ;;  %v1346_v61 = vpop.permute.xlu0 %1345 }
 0x28a   : > { %4496 = vmatmul.mubr.msk.bf16.vlgmr.msra.gmra.mrb[12].mxu0 %vm331_vm0, %v817_v39  ;;  %v819_v3 = vpack.c.bf16 %v811_v36, %v810_v13  ;;  %v1353_v35 = vrot.slane %v1346_v61, 4  ;;  %v1211_v39 = vsel %vm331_vm0, %v4163_v60, 0 }
 0x28b   : > { %4508 = vmatpush3.bf16.xpose.msra.mxu0 %v1125_v46  ;;  %4511 = vmatprep.mubr.msk.bf16.mxu0 %vm331_vm0, %v1109_v23 }
 0x28c   : > { %4840 = vmatprep.subr.msk.bf16.mxu0 %vm331_vm0, %v4159_v19 }
 0x28d   : > { %v1192_v42 = vpop.permute.xlu0 %1191 }
 0x291   : > { %v1350_v32 = vpop.permute.xlu0 %1349 }
 0x292   : > { %v1355_v19 = vrot.slane %v1350_v32, 4 }
 0x293   : > { %4510 = vmatpush3.bf16.xpose.msra.mxu0 %v1128_v63 }
 0x294   : > { %4843 = vmatprep.subr.msk.bf16.mxu0 %vm331_vm0, %v4166_v53 }
 0x295   : > { %v1275_v5 = vpop.permute.xlu0 %1274 }
 0x299   : > { %v1358_v27 = vpop.permute.xlu0 %1357 }
 0x2ae   : > { %v773_v30 = vpop.xlane.xlu1 %772 }
 0x2af   : > { %4961 = vrcp.f32 %v773_v30 }
 0x2b2   : > { %v1111_v6 = vpop.permute.xlu1 %1110 }
 0x2b3   : > { %4512 = vmatmul.mubr.msk.bf16.vlgmr.msra.gmra.mrb[16].mxu0 %vm331_vm0, %v1111_v6 }
 0x2b4   : > { %4524 = vmatpush3.bf16.xpose.msra.mxu0 %v1291_v59  ;;  %4527 = vmatprep.mubr.msk.bf16.mxu0 %vm331_vm0, %v1275_v5 }
 0x2b6   : > { %v1269_v29 = vpop.permute.xlu1 %1268 }
 0x2b7   : > { %v1273_v14 = vrot.slane %v1269_v29, 4 }
 0x2b9   : > { %v4962_v40 = vpop.eup %4961  ;;  %v4167_v41 = vcombine.low %v1272_v11, %v1273_v14 }
 0x2ba   : > { %v809_v37 = vmul.f32 %v4962_v40, %v5598_v21  ;;  %v1348_v43 = vpop.permute.xlu1 %1347 }
 0x2bb   : > { %4844 = vmatprep.subr.msk.bf16.mxu0 %vm331_vm0, %v4167_v41  ;;  %v1294_v57 = vsel %vm331_vm0, %v4167_v41, 0  ;;  %v1354_v21 = vrot.slane %v1348_v43, 4 }
 0x2bc   : > { %v818_v49 = vpack.c.bf16 %v809_v37, %v808_v33  ;;  %4526 = vmatpush3.bf16.xpose.msra.mxu0 %v1294_v57 }
 0x2bd   : > { %v4170_v24 = vcombine.low %v1353_v35, %v1354_v21 }
 0x2be   : > { %4503 = vmatprep.mubr.msk.bf16.mxu1 %vm331_vm0, %v818_v49  ;;  %v1194_v47 = vpop.permute.xlu1 %1193 }
 0x2bf   : > { %4504 = vmatmul.mubr.msk.bf16.vlgmr.msra.gmra.mrb[12].mxu1 %vm331_vm0, %v819_v3  ;;  %v1374_v4 = vsel %vm331_vm0, %v4170_v24, 0 }
 0x2c0   : > { %4516 = vmatpush3.bf16.xpose.msra.mxu1 %v1208_v52  ;;  %4519 = vmatprep.mubr.msk.bf16.mxu1 %vm331_vm0, %v1192_v42 }
 0x2c1   : > { %4842 = vmatprep.subr.msk.bf16.mxu1 %vm331_vm0, %v4163_v60 }
 0x2c2   : > { %v1352_v8 = vpop.permute.xlu1 %1351 }
 0x2c3   : > { %v1356_v23 = vrot.slane %v1352_v8, 4 }
 0x2c5   : > { %v4171_v46 = vcombine.low %v1355_v19, %v1356_v23 }
 0x2c6   : > { %v1277_v28 = vpop.permute.xlu1 %1276 }
 0x2c7   : > { %4528 = vmatmul.mubr.msk.bf16.vlgmr.msra.gmra.mrb[20].mxu0 %vm331_vm0, %v1277_v28  ;;  %v1377_v7 = vsel %vm331_vm0, %v4171_v46, 0 }
 0x2c8   : > { %4518 = vmatpush3.bf16.xpose.msra.mxu1 %v1211_v39 }
 0x2c9   : > { %4845 = vmatprep.subr.msk.bf16.mxu1 %vm331_vm0, %v4170_v24 }
 0x2ca   : > { %v1360_v10 = vpop.permute.xlu1 %1359 }
 0x2cf   : > { %4520 = vmatmul.mubr.msk.bf16.vlgmr.msra.gmra.mrb[16].mxu1 %vm331_vm0, %v1194_v47 }
 0x2d0   : > { %4532 = vmatpush3.bf16.xpose.msra.mxu1 %v1374_v4  ;;  %4535 = vmatprep.mubr.msk.bf16.mxu1 %vm331_vm0, %v1358_v27 }
 0x2d1   : > { %4846 = vmatprep.subr.msk.bf16.mxu1 %vm331_vm0, %v4171_v46 }
 0x2d8   : > { %4534 = vmatpush3.bf16.xpose.msra.mxu1 %v1377_v7 }
 0x2df   : > { %4536 = vmatmul.mubr.msk.bf16.vlgmr.msra.gmra.mrb[20].mxu1 %vm331_vm0, %v1360_v10 }
 0x31c   : > { %v5693_v53 = vpop.f32.mrb[8].mxu0 }
 0x31d   : > { %v5695_v63 = vpop.f32.mrb[9].mxu0 }
 0x31e   : > { %v5697_v48 = vpop.f32.mrb[10].mxu0 }
 0x31f   : > { %v5701_v42 = vpop.f32.mrb[11].mxu0 }
 0x320   : > { %v5705_v30 = vpop.f32.mrb[8].mxu1 }
 0x321   : > { %v5707_v5 = vpop.f32.mrb[9].mxu1 }
 0x322   : > { %v5709_v6 = vpop.f32.mrb[10].mxu1 }
 0x323   : > { %v5713_v11 = vpop.f32.mrb[11].mxu1 }
 0x35d   : > { %v5717_v29 = vpop.f32.mrb[12].mxu0 }
 0x35e   : > { %v5719_v31 = vpop.f32.mrb[13].mxu0 }
 0x35f   : > { %v5721_v14 = vpop.f32.mrb[14].mxu0 }
 0x360   : > { %v5725_v40 = vpop.f32.mrb[15].mxu0 }
 0x386   : > { %v4513_v41 = vpop.f32.mrb[16].mxu0 }
 0x387   : > { %v5730_v33 = vadd.f32 %v4513_v41, %v5363_v56  ;;  %v1164_v37 = vpop.f32.mrb[17].mxu0 }
 0x388   : > { %v4514_v43 = vpop.f32.mrb[18].mxu0  ;;  %v5755_v46 = vadd.f32 %v1164_v37, %v5376_v62 }
 0x389   : > { %v5733_v13 = vadd.f32 %v4514_v43, %v5368_v58  ;;  %v1434_v26 = vsel %vm331_vm0, %v5730_v33, -inf  ;;  %v1167_v57 = vpop.f32.mrb[19].mxu0 }
 0x38a   : > { %1435 = vmax.xlane.f32.xlu0 %v1434_v26  ;;  %v5763_v41 = vadd.f32 %v1167_v57, %v5402_v18  ;;  %v1428_v37 = vsel %vm331_vm0, %v5755_v46, -inf }
 0x38b   : > { %v1437_v49 = vsel %vm331_vm0, %v5733_v13, -inf }
 0x38c   : > { %1438 = vmax.xlane.f32.xlu1 %v1437_v49  ;;  %v1431_v49 = vsel %vm331_vm0, %v5763_v41, -inf }
 0x392   : > { %v5739_v1 = vpop.f32.mrb[12].mxu1 }
 0x393   : > { %v5741_v3 = vpop.f32.mrb[13].mxu1 }
 0x394   : > { %v5743_v47 = vpop.f32.mrb[14].mxu1 }
 0x395   : > { %v5747_v52 = vpop.f32.mrb[15].mxu1 }
 0x39a   : > { %v4529_v35 = vpop.f32.mrb[20].mxu0 }
 0x39b   : > { %v1330_v8 = vpop.f32.mrb[21].mxu0 }
 0x39c   : > { %v4530_v24 = vpop.f32.mrb[22].mxu0 }
 0x39d   : > { %v1333_v28 = vpop.f32.mrb[23].mxu0 }
 0x3a2   : > { %v4521_v39 = vpop.f32.mrb[16].mxu1 }
 0x3a3   : > { %v5752_v23 = vadd.f32 %v4521_v39, %v5363_v56  ;;  %v1247_v19 = vpop.f32.mrb[17].mxu1 }
 0x3a4   : > { %v4522_v4 = vpop.f32.mrb[18].mxu1  ;;  %v5768_v26 = vadd.f32 %v1247_v19, %v5376_v62 }
 0x3a5   : > { %v5758_v27 = vadd.f32 %v4522_v4, %v5368_v58  ;;  %v1250_v7 = vpop.f32.mrb[19].mxu1  ;;  %v1446_v10 = vsel %vm331_vm0, %v5752_v23, -inf  ;;  %v5780_v4 = vadd.f32 %v4529_v35, %v5363_v56 }
 0x3a6   : > { %1447 = vmax.xlane.f32.xlu0 %v1446_v10  ;;  %v5775_v39 = vadd.f32 %v1250_v7, %v5402_v18  ;;  %v1440_v57 = vsel %vm331_vm0, %v5768_v26, -inf }
 0x3a7   : > { %v1449_v43 = vsel %vm331_vm0, %v5758_v27, -inf }
 0x3a8   : > { %1450 = vmax.xlane.f32.xlu1 %v1449_v43  ;;  %v1443_v19 = vsel %vm331_vm0, %v5775_v39, -inf  ;;  %v1458_v43 = vsel %vm331_vm0, %v5780_v4, -inf }
 0x3aa   : > { %1429 = vmax.xlane.f32.xlu0 %v1428_v37 }
 0x3ac   : > { %1432 = vmax.xlane.f32.xlu1 %v1431_v49 }
 0x3ae   : > { %1441 = vmax.xlane.f32.xlu0 %v1440_v57  ;;  %v5790_v57 = vadd.f32 %v1330_v8, %v5376_v62 }
 0x3b2   : > { %1444 = vmax.xlane.f32.xlu0 %v1443_v19  ;;  %v4537_v10 = vpop.f32.mrb[20].mxu1  ;;  %v1452_v19 = vsel %vm331_vm0, %v5790_v57, -inf }
 0x3b3   : > { %v5787_v37 = vadd.f32 %v4537_v10, %v5363_v56  ;;  %v1413_v7 = vpop.f32.mrb[21].mxu1  ;;  %v5803_v56 = vadd.f32 %v4530_v24, %v5368_v58 }
 0x3b4   : > { %v4538_v49 = vpop.f32.mrb[22].mxu1 }
 0x3b5   : > { %v1416_v60 = vpop.f32.mrb[23].mxu1  ;;  %v1470_v35 = vsel %vm331_vm0, %v5787_v37, -inf  ;;  %v5806_v8 = vadd.f32 %v4538_v49, %v5368_v58  ;;  %v1461_v10 = vsel %vm331_vm0, %v5803_v56, -inf }
 0x3b6   : > { %1459 = vmax.xlane.f32.xlu0 %v1458_v43  ;;  %v5811_v43 = vadd.f32 %v1333_v28, %v5402_v18 }
 0x3ba   : > { %1471 = vmax.xlane.f32.xlu0 %v1470_v35  ;;  %v5828_v35 = vadd.f32 %v1416_v60, %v5402_v18 }
 0x3bd   : > { %1673 = vrot.lane.b32.xlu1 %v5538_v12, %s5195_s25  ;;  %v1473_v12 = vsel %vm331_vm0, %v5806_v8, -inf }
 0x3be   : > { %1453 = vmax.xlane.f32.xlu0 %v1452_v19 }
 0x3c1   : > { %1614 = vrot.lane.b32.xlu1 %v5535_v2, %s5195_s25  ;;  %v5818_v2 = vadd.f32 %v1413_v7, %v5376_v62  ;;  %v1467_v62 = vsel %vm331_vm0, %v5828_v35, -inf }
 0x3c3   : > { %v1464_v58 = vsel %vm331_vm0, %v5818_v2, -inf }
 0x3d4   : > { %1612 = vrot.lane.b32.xlu0 %v5528_v0, %s5195_s25  ;;  %v1455_v0 = vsel %vm331_vm0, %v5811_v43, -inf }
 0x3e5   : > { %1462 = vmax.xlane.f32.xlu1 %v1461_v10 }
 0x3e9   : > { %1474 = vmax.xlane.f32.xlu1 %v1473_v12 }
 0x3ed   : > { %1456 = vmax.xlane.f32.xlu1 %v1455_v0 }
 0x3f3   : > { %1465 = vmax.xlane.f32.xlu0 %v1464_v58 }
 0x3fe   : > { %1675 = vrot.lane.b32.xlu1 %v5545_v17, %s5195_s25 }
 0x409   : > { %1734 = vrot.lane.b32.xlu0 %v5548_v16, %s5195_s25 }
 0x417   : > { %v1436_v24 = vpop.xlane.xlu0 %1435 }
 0x418   : > { %v1478_v28 = vsub.f32 %v5730_v33, %v1436_v24 }
 0x419   : > { %v1439_v19 = vpop.xlane.xlu1 %1438 }
 0x41a   : > { %v1496_v49 = vmul.f32 1.442695, %v1478_v28 }
 0x41c   : > { %4963 = vpow2.f32 %v1496_v49 }
 0x422   : > { %1468 = vmax.xlane.f32.xlu1 %v1467_v62 }
 0x426   : > { %v5832_v7 = vpop.eup %4963 }
 0x427   : > { %v1530_v17 = vsel %vm331_vm0, %v5832_v7, 0.0 }
 0x428   : > { %1531 = vadd.xlane.f32.xlu0 %v1530_v17 }
 0x433   : > { %1736 = vrot.lane.b32.xlu1 %v5622_v22, %s5195_s25  ;;  %v1448_v16 = vpop.xlane.xlu0 %1447 }
 0x434   : > { %v1482_v33 = vsub.f32 %v5752_v23, %v1448_v16  ;;  %v1479_v23 = vsub.f32 %v5733_v13, %v1439_v19 }
 0x435   : > { %v1451_v10 = vpop.xlane.xlu1 %1450 }
 0x436   : > { %v1504_v18 = vmul.f32 1.442695, %v1482_v33 }
 0x437   : > { %v1430_v60 = vpop.xlane.xlu0 %1429 }
 0x438   : > { %4965 = vpow2.f32 %v1504_v18  ;;  %v1476_v12 = vsub.f32 %v5755_v46, %v1430_v60  ;;  %v1498_v18 = vmul.f32 1.442695, %v1479_v23 }
 0x439   : > { %v1433_v0 = vpop.xlane.xlu1 %1432 }
 0x43a   : > { %v1492_v58 = vmul.f32 1.442695, %v1476_v12 }
 0x43b   : > { %v1442_v24 = vpop.xlane.xlu0 %1441 }
 0x43c   : > { %4967 = vpow2.f32 %v1492_v58  ;;  %v1480_v28 = vsub.f32 %v5768_v26, %v1442_v24  ;;  %v1483_v26 = vsub.f32 %v5758_v27, %v1451_v10 }
 0x43d   : > { %v1674_v49 = vpop.permute.xlu1 %1673 }
 0x43e   : > { %v1500_v62 = vmul.f32 1.442695, %v1480_v28  ;;  %4547 = vmatprep.subr.bf16.mxu1 %v1674_v49  ;;  %v1506_v19 = vmul.f32 1.442695, %v1483_v26  ;;  %v1477_v28 = vsub.f32 %v5763_v41, %v1433_v0 }
 0x43f   : > { %4548 = vmatpush3.bf16.msra.mxu1 %v1674_v49  ;;  %v1445_v22 = vpop.xlane.xlu0 %1444 }
 0x440   : > { %4969 = vpow2.f32 %v1500_v62  ;;  %v1494_v23 = vmul.f32 1.442695, %v1477_v28 }
 0x441   : > { %v1615_v0 = vpop.permute.xlu1 %1614 }
 0x442   : > { %v5842_v17 = vpop.eup %4965 }
 0x443   : > { %v1460_v16 = vpop.xlane.xlu0 %1459  ;;  %v1542_v46 = vsel %vm331_vm0, %v5842_v17, 0.0 }
 0x444   : > { %v1486_v33 = vsub.f32 %v5780_v4, %v1460_v16  ;;  %1543 = vadd.xlane.f32.xlu0 %v1542_v46 }
 0x446   : > { %v5848_v60 = vpop.eup %4967  ;;  %v1512_v12 = vmul.f32 1.442695, %v1486_v33 }
 0x447   : > { %v1472_v58 = vpop.xlane.xlu0 %1471  ;;  %v1524_v24 = vsel %vm331_vm0, %v5848_v60, 0.0 }
 0x448   : > { %4971 = vpow2.f32 %v1512_v12  ;;  %v1490_v13 = vsub.f32 %v5787_v37, %v1472_v58  ;;  %1525 = vadd.xlane.f32.xlu0 %v1524_v24  ;;  %v1481_v37 = vsub.f32 %v5775_v39, %v1445_v22 }
 0x449   : > { %4973 = vpow2.f32 %v1498_v18 }
 0x44a   : > { %v5854_v4 = vpop.eup %4969  ;;  %v1520_v49 = vmul.f32 1.442695, %v1490_v13  ;;  %v1502_v41 = vmul.f32 1.442695, %v1481_v37 }
 0x44b   : > { %v1454_v62 = vpop.xlane.xlu0 %1453  ;;  %v1536_v27 = vsel %vm331_vm0, %v5854_v4, 0.0 }
 0x44c   : > { %4975 = vpow2.f32 %v1520_v49  ;;  %v1484_v10 = vsub.f32 %v5790_v57, %v1454_v62  ;;  %1537 = vadd.xlane.f32.xlu0 %v1536_v27 }
 0x44d   : > { %4977 = vpow2.f32 %v1506_v19 }
 0x44e   : > { %v1508_v16 = vmul.f32 1.442695, %v1484_v10 }
 0x44f   : > { %v1613_v46 = vpop.permute.xlu0 %1612 }
 0x450   : > { %4979 = vpow2.f32 %v1508_v16  ;;  %4539 = vmatprep.subr.bf16.mxu0 %v1613_v46 }
 0x451   : > { %4981 = vpow2.f32 %v1494_v23  ;;  %4540 = vmatpush3.bf16.msra.mxu0 %v1613_v46 }
 0x452   : > { %v5860_v33 = vpop.eup %4971  ;;  %4541 = vmatprep.subr.bf16.mxu0 %v1615_v0  ;;  %4983 = vpow2.f32 %v1502_v41 }
 0x453   : > { %v5862_v18 = vpop.eup %4973  ;;  %v1554_v57 = vsel %vm331_vm0, %v5860_v33, 0.0 }
 0x454   : > { %1555 = vadd.xlane.f32.xlu0 %v1554_v57  ;;  %v1533_v22 = vsel %vm331_vm0, %v5862_v18, 0.0 }
 0x455   : > { %4542 = vmatpush3.bf16.msra.mxu0 %v1615_v0 }
 0x456   : > { %v5866_v39 = vpop.eup %4975 }
 0x457   : > { %v5870_v26 = vpop.eup %4977  ;;  %1534 = vadd.xlane.f32.xlu1 %v1533_v22  ;;  %v1566_v12 = vsel %vm331_vm0, %v5866_v39, 0.0 }
 0x458   : > { %1567 = vadd.xlane.f32.xlu0 %v1566_v12  ;;  %v1545_v24 = vsel %vm331_vm0, %v5870_v26, 0.0 }
 0x45a   : > { %v5874_v58 = vpop.eup %4979 }
 0x45b   : > { %v5878_v13 = vpop.eup %4981  ;;  %1546 = vadd.xlane.f32.xlu1 %v1545_v24  ;;  %v1548_v19 = vsel %vm331_vm0, %v5874_v58, 0.0 }
 0x45c   : > { %1549 = vadd.xlane.f32.xlu0 %v1548_v19  ;;  %v1527_v28 = vsel %vm331_vm0, %v5878_v13, 0.0  ;;  %v5884_v49 = vpop.eup %4983 }
 0x45d   : > { %v1539_v62 = vsel %vm331_vm0, %v5884_v49, 0.0 }
 0x45f   : > { %1528 = vadd.xlane.f32.xlu1 %v1527_v28 }
 0x463   : > { %1540 = vadd.xlane.f32.xlu1 %v1539_v62 }
 0x472   : > { %v1463_v27 = vpop.xlane.xlu1 %1462 }
 0x473   : > { %v1487_v10 = vsub.f32 %v5803_v56, %v1463_v27 }
 0x475   : > { %v1514_v23 = vmul.f32 1.442695, %v1487_v10 }
 0x476   : > { %v1475_v37 = vpop.xlane.xlu1 %1474 }
 0x477   : > { %4985 = vpow2.f32 %v1514_v23  ;;  %v1491_v16 = vsub.f32 %v5806_v8, %v1475_v37 }
 0x479   : > { %v1522_v46 = vmul.f32 1.442695, %v1491_v16 }
 0x47a   : > { %v1457_v41 = vpop.xlane.xlu1 %1456 }
 0x47b   : > { %4987 = vpow2.f32 %v1522_v46  ;;  %v1485_v0 = vsub.f32 %v5811_v43, %v1457_v41 }
 0x47d   : > { %v1510_v57 = vmul.f32 1.442695, %v1485_v0 }
 0x47e   : > { %v1676_v22 = vpop.permute.xlu1 %1675 }
 0x47f   : > { %4989 = vpow2.f32 %v1510_v57  ;;  %4549 = vmatprep.subr.bf16.mxu1 %v1676_v22 }
 0x480   : > { %4550 = vmatpush3.bf16.msra.mxu1 %v1676_v22  ;;  %v1466_v12 = vpop.xlane.xlu0 %1465  ;;  %v5923_v22 = vld [vmem:[%s5242_s24 + $0xc] sm:$0xff] }
 0x481   : > { %v5891_v24 = vpop.eup %4985  ;;  %v1488_v56 = vsub.f32 %v5818_v2, %v1466_v12 }
 0x482   : > { %v1557_v19 = vsel %vm331_vm0, %v5891_v24, 0.0 }
 0x483   : > { %v1516_v28 = vmul.f32 1.442695, %v1488_v56  ;;  %1558 = vadd.xlane.f32.xlu1 %v1557_v19  ;;  %v5933_v56 = vld [vmem:[%s5242_s24 + $0x24] sm:$0xff] }
 0x484   : > { %v5896_v8 = vpop.permute.xlu0 %1734 }
 0x485   : > { %v5898_v62 = vpop.eup %4987  ;;  %4991 = vpow2.f32 %v1516_v28  ;;  %4555 = vmatprep.subr.bf16.mxu0 %v5896_v8 }
 0x486   : > { %v1569_v43 = vsel %vm331_vm0, %v5898_v62, 0.0 }
 0x487   : > { %1570 = vadd.xlane.f32.xlu1 %v1569_v43  ;;  %v5943_v43 = vld [vmem:[%s5242_s24 + $0x3c] sm:$0xff] }
 0x489   : > { %v5903_v27 = vpop.eup %4989 }
 0x48a   : > { %v1551_v2 = vsel %vm331_vm0, %v5903_v27, 0.0 }
 0x48b   : > { %1552 = vadd.xlane.f32.xlu1 %v1551_v2  ;;  %v5948_v2 = vld [vmem:[%s5242_s24 + $0x30] sm:$0xff] }
 0x48f   : > { %v5907_v10 = vpop.eup %4991 }
 0x490   : > { %v1560_v23 = vsel %vm331_vm0, %v5907_v10, 0.0 }
 0x491   : > { %1561 = vadd.xlane.f32.xlu0 %v1560_v23 }
 0x4a7   : > { %1795 = vrot.lane.b32.xlu0 %v5556_v20, %s5195_s25 }
 0x4af   : > { %v1469_v37 = vpop.xlane.xlu1 %1468 }
 0x4b0   : > { %v1489_v16 = vsub.f32 %v5828_v35, %v1469_v37  ;;  %v5928_v35 = vld [vmem:[%s5242_s24] sm:$0xff] }
 0x4b1   : > { %2130 = vrot.lane.b32.xlu0 %v5928_v35, %s5196_s9 }
 0x4b2   : > { %v1518_v46 = vmul.f32 1.442695, %v1489_v16 }
 0x4b3   : > { %v5920_v20 = vpop.permute.xlu1 %1736 }
 0x4b4   : > { %4993 = vpow2.f32 %v1518_v46  ;;  %v5957_v46 = vld [vmem:[%s5242_s24 + $0x54] sm:$0xff] }
 0x4b5   : > { %v1532_v57 = vpop.xlane.xlu0 %1531  ;;  %6761 = vst [vmem:[#allocation3_spill] sm:$0xff] %v5957_v46 }
 0x4be   : > { %v5914_v41 = vpop.eup %4993 }
 0x4bf   : > { %v1563_v0 = vsel %vm331_vm0, %v5914_v41, 0.0 }
 0x4c0   : > { %1564 = vadd.xlane.f32.xlu1 %v1563_v0  ;;  %v5962_v0 = vld [vmem:[%s5242_s24 + $0x48] sm:$0xff] }
 0x4d1   : > { %1797 = vrot.lane.b32.xlu1 %v5636_v38, %s5195_s25  ;;  %v1544_v12 = vpop.xlane.xlu0 %1543  ;;  %v5938_v38 = vld [vmem:[%s5242_s24 + $0x18] sm:$0xff] }
 0x4d2   : > { %2134 = vrot.lane.b32.xlu0 %v5938_v38, %s5196_s9 }
 0x4d5   : > { %2132 = vrot.lane.b32.xlu1 %v5923_v22, %s5196_s9  ;;  %v1526_v28 = vpop.xlane.xlu0 %1525 }
 0x4d6   : > { %2213 = vrot.lane.b32.xlu0 %v5948_v2, %s5196_s9 }
 0x4d9   : > { %2136 = vrot.lane.b32.xlu1 %v5933_v56, %s5196_s9  ;;  %v1538_v37 = vpop.xlane.xlu0 %1537 }
 0x4da   : > { %2142 = vrot.lane.b32.xlu0 %v5255_v9, %s5196_s9 }
 0x4dd   : > { %2215 = vrot.lane.b32.xlu1 %v5943_v43, %s5196_s9 }
 0x4de   : > { %2217 = vrot.lane.b32.xlu0 %v5962_v0, %s5196_s9 }
 0x4e1   : > { %2144 = vrot.lane.b32.xlu1 %v5320_v44, %s5196_s9 }
 0x4e4   : > { %v1535_v19 = vpop.xlane.xlu1 %1534 }
 0x4e5   : > { %4995 = vrcp.f32 %v1535_v19  ;;  %2219 = vrot.lane.b32.xlu1 %v5957_v46, %s5196_s9 }
 0x4e6   : > { %4997 = vrcp.f32 %v1526_v28  ;;  %v5967_v28 = vld [vmem:[%s5242_s24 + $0x60] sm:$0xff] }
 0x4e7   : > { %4999 = vrcp.f32 %v1532_v57  ;;  %2296 = vrot.lane.b32.xlu0 %v5967_v28, %s5196_s9  ;;  %v5972_v57 = vld [vmem:[%s5242_s24 + $0x6c] sm:$0xff] }
 0x4e8   : > { %v1547_v23 = vpop.xlane.xlu1 %1546  ;;  %6762 = vst [vmem:[#allocation4_spill] sm:$0xff] %v5972_v57 }
 0x4e9   : > { %2298 = vrot.lane.b32.xlu1 %v5972_v57, %s5196_s9 }
 0x4eb   : > { %2225 = vrot.lane.b32.xlu0 %v5267_v15, %s5196_s9 }
 0x4ec   : > { %v1529_v16 = vpop.xlane.xlu1 %1528 }
 0x4ed   : > { %5001 = vrcp.f32 %v1529_v16  ;;  %2227 = vrot.lane.b32.xlu1 %v5324_v45, %s5196_s9  ;;  %v5991_v45 = vld [vmem:[%s5242_s24 + $0x78] sm:$0xff] }
 0x4ee   : > { %5003 = vrcp.f32 %v1547_v23 }
 0x4ef   : > { %5005 = vrcp.f32 %v1538_v37  ;;  %v4996_v23 = vpop.eup %4995  ;;  %2300 = vrot.lane.b32.xlu0 %v5991_v45, %s5196_s9 }
 0x4f0   : > { %5007 = vrcp.f32 %v1544_v12  ;;  %v1541_v19 = vpop.xlane.xlu1 %1540  ;;  %v4998_v37 = vpop.eup %4997  ;;  %v1591_v12 = vmul.f32 %v4996_v23, %v5862_v18  ;;  %v5986_v23 = vld [vmem:[%s5242_s24 + $0x84] sm:$0xff] }
 0x4f1   : > { %5009 = vrcp.f32 %v1541_v19  ;;  %v5000_v16 = vpop.eup %4999  ;;  %v1588_v34 = vmul.f32 %v4998_v37, %v5848_v60  ;;  %2302 = vrot.lane.b32.xlu1 %v5986_v23, %s5196_s9  ;;  %v1556_v60 = vpop.xlane.xlu0 %1555 }
 0x4f2   : > { %v1590_v25 = vmul.f32 %v5000_v16, %v5832_v7 }
 0x4f4   : > { %v1605_v18 = vpack.c.bf16 %v1591_v12, %v1590_v25 }
 0x4f7   : > { %v5002_v21 = vpop.eup %5001 }
 0x4f8   : > { %v5004_v19 = vpop.eup %5003  ;;  %v1589_v36 = vmul.f32 %v5002_v21, %v5878_v13  ;;  %v5171_v13 = vld [vmem:[%s5242_s24 + $0x8] ss:$12 sps:$4 sm:$0xff]  }
 0x4f9   : > { %v5006_v59 = vpop.eup %5005  ;;  %v1595_v46 = vmul.f32 %v5004_v19, %v5870_v26  ;;  %v1568_v26 = vpop.xlane.xlu0 %1567 }
 0x4fa   : > { %v5008_v61 = vpop.eup %5007  ;;  %v1604_v32 = vpack.c.bf16 %v1589_v36, %v1588_v34  ;;  %v1592_v34 = vmul.f32 %v5006_v59, %v5854_v4  ;;  %v6008_v59 = vld [vmem:[%s5242_s24 + $0x90] sm:$0xff] }
 0x4fb   : > { %v5010_v57 = vpop.eup %5009  ;;  %v1594_v21 = vmul.f32 %v5008_v61, %v5842_v17  ;;  %2379 = vrot.lane.b32.xlu0 %v6008_v59, %s5196_s9  ;;  %v6014_v61 = vld [vmem:[%s5242_s24 + $0x9c] sm:$0xff]  ;;  %v6026_v17 = vld [vmem:[%s5242_s24 + $0xa8] sm:$0xff]  ;;  %v6031_v4 = vld [vmem:[%s5242_s24 + $0xb4] sm:$0xff] }
 0x4fc   : > { %4543 = vmatprep.mubr.msk.bf16.mxu0 %vm331_vm0, %v1604_v32  ;;  %v1593_v36 = vmul.f32 %v5010_v57, %v5884_v49  ;;  %v6005_v32 = vld [vmem:[%s6754_s3 + $0x10] sm:$0xff]   ;;  %2381 = vrot.lane.b32.xlu1 %v6014_v61, %s5196_s9 }
 0x4fd   : > { %4544 = vmatmul.mubr.msk.bf16.vlgmr.msra.gmra.mrb[24].mxu0 %vm331_vm0, %v1605_v18  ;;  %v1607_v7 = vpack.c.bf16 %v1595_v46, %v1594_v21 }
 0x4fe   : > { %4556 = vmatpush3.bf16.msra.mxu0 %v5896_v8  ;;  %v1606_v25 = vpack.c.bf16 %v1593_v36, %v1592_v34  ;;  %v5172_v8 = vld [vmem:[%s5242_s24 + $0x20] ss:$12 sps:$4 sm:$0xff]  }
 0x4ff   : > { %4557 = vmatprep.subr.bf16.mxu0 %v5920_v20  ;;  %2308 = vrot.lane.b32.xlu0 %v5330_v50, %s5196_s9 }
 0x500   : > { %4551 = vmatprep.mubr.msk.bf16.mxu1 %vm331_vm0, %v1606_v25  ;;  %2310 = vrot.lane.b32.xlu1 %v5350_v54, %s5196_s9 }
 0x501   : > { %4552 = vmatmul.mubr.msk.bf16.vlgmr.msra.gmra.mrb[24].mxu1 %vm331_vm0, %v1607_v7 }
 0x502   : > { %4558 = vmatpush3.bf16.msra.mxu0 %v5920_v20  ;;  %v1550_v20 = vpop.xlane.xlu0 %1549 }
 0x503   : > { %4571 = vmatprep.subr.bf16.mxu0 %v6005_v32  ;;  %2383 = vrot.lane.b32.xlu0 %v6026_v17, %s5196_s9 }
 0x504   : > { %2385 = vrot.lane.b32.xlu1 %v6031_v4, %s5196_s9 }
 0x507   : > { %2391 = vrot.lane.b32.xlu0 %v5336_v51, %s5196_s9 }
 0x508   : > { %2393 = vrot.lane.b32.xlu1 %v5354_v55, %s5196_s9 }
 0x50b   : > { %2646 = vrot.lane.b32.xlu0 %v5171_v13, %s5196_s9 }
 0x50c   : > { %2648 = vrot.lane.b32.xlu1 %v5172_v8, %s5196_s9 }
 0x510   : > { %v1559_v49 = vpop.xlane.xlu1 %1558 }
 0x511   : > { %5011 = vrcp.f32 %v1559_v49 }
 0x512   : > { %5013 = vrcp.f32 %v1550_v20 }
 0x513   : > { %5015 = vrcp.f32 %v1556_v60 }
 0x514   : > { %v1571_v46 = vpop.xlane.xlu1 %1570 }
 0x518   : > { %v1553_v57 = vpop.xlane.xlu1 %1552 }
 0x519   : > { %5017 = vrcp.f32 %v1553_v57 }
 0x51a   : > { %5019 = vrcp.f32 %v1571_v46 }
 0x51b   : > { %v5012_v16 = vpop.eup %5011 }
 0x51c   : > { %v5014_v12 = vpop.eup %5013  ;;  %v1599_v36 = vmul.f32 %v5012_v16, %v5891_v24  ;;  %v4893_v16 = vld [vmem:[%s6754_s3] sm:$0xff]  }
 0x51d   : > { %v5016_v19 = vpop.eup %5015  ;;  %v1596_v21 = vmul.f32 %v5014_v12, %v5874_v58  ;;  %v4892_v58 = vld [vmem:[%s6754_s3 + $0x18] sm:$0xff]  }
 0x51e   : > { %v1562_v37 = vpop.xlane.xlu0 %1561  ;;  %v1598_v7 = vmul.f32 %v5016_v19, %v5860_v33 }
 0x51f   : > { %5021 = vrcp.f32 %v1562_v37 }
 0x520   : > { %v1609_v60 = vpack.c.bf16 %v1599_v36, %v1598_v7  ;;  %5023 = vrcp.f32 %v1568_v26 }
 0x522   : > { %v1796_v18 = vpop.permute.xlu0 %1795 }
 0x523   : > { %v5018_v34 = vpop.eup %5017  ;;  %4563 = vmatprep.subr.bf16.mxu1 %v1796_v18 }
 0x524   : > { %v1597_v25 = vmul.f32 %v5018_v34, %v5903_v27  ;;  %4564 = vmatpush3.bf16.msra.mxu1 %v1796_v18  ;;  %v5020_v33 = vpop.eup %5019 }
 0x525   : > { %v1603_v46 = vmul.f32 %v5020_v33, %v5898_v62 }
 0x526   : > { %v1608_v13 = vpack.c.bf16 %v1597_v25, %v1596_v21 }
 0x528   : > { %4559 = vmatprep.mubr.msk.bf16.mxu0 %vm331_vm0, %v1608_v13 }
 0x529   : > { %4560 = vmatmul.mubr.msk.bf16.vlgmr.msra.gmra.mrb[28].mxu0 %vm331_vm0, %v1609_v60  ;;  %v5022_v27 = vpop.eup %5021 }
 0x52a   : > { %4572 = vmatpush3.bf16.msra.mxu0 %v6005_v32  ;;  %v5024_v8 = vpop.eup %5023  ;;  %v1600_v26 = vmul.f32 %v5022_v27, %v5907_v10  ;;  %v2131_v10 = vpop.permute.xlu0 %2130 }
 0x52b   : > { %4573 = vmatprep.subr.bf16.mxu0 %v4892_v58  ;;  %v1602_v37 = vmul.f32 %v5024_v8, %v5866_v39  ;;  %v2138_v18 = vrot.slane %v2131_v10, 4 }
 0x52d   : > { %v1611_v19 = vpack.c.bf16 %v1603_v46, %v1602_v37 }
 0x52e   : > { %4574 = vmatpush3.bf16.msra.mxu0 %v4892_v58 }
 0x52f   : > { %4591 = vmatprep.subr.bf16.mxu0 %v4893_v16 }
 0x544   : > { %v2135_v7 = vpop.permute.xlu0 %2134 }
 0x545   : > { %v2140_v27 = vrot.slane %v2135_v7, 4 }
 0x54d   : > { %v1565_v24 = vpop.xlane.xlu1 %1564 }
 0x54e   : > { %5025 = vrcp.f32 %v1565_v24 }
 0x551   : > { %v1798_v49 = vpop.permute.xlu1 %1797 }
 0x552   : > { %4565 = vmatprep.subr.bf16.mxu1 %v1798_v49 }
 0x553   : > { %4566 = vmatpush3.bf16.msra.mxu1 %v1798_v49 }
 0x554   : > { %4779 = vmatprep.subr.bf16.mxu1 %v6005_v32 }
 0x555   : > { %v2133_v62 = vpop.permute.xlu1 %2132 }
 0x558   : > { %v5026_v20 = vpop.eup %5025 }
 0x559   : > { %v1601_v57 = vmul.f32 %v5026_v20, %v5914_v41  ;;  %v2139_v41 = vrot.slane %v2133_v62, 4  ;;  %v2137_v21 = vpop.permute.xlu1 %2136  ;;  %v2214_v62 = vpop.permute.xlu0 %2213 }
 0x55b   : > { %v1610_v12 = vpack.c.bf16 %v1601_v57, %v1600_v26  ;;  %v4202_v39 = vcombine.low %v2138_v18, %v2139_v41  ;;  %v6763_v57 = vpack.c.bf16 %v5701_v42, %v5695_v63  ;;  %v2221_v41 = vrot.slane %v2214_v62, 4 }
 0x55c   : > { %v6765_v18 = vpack.c.bf16 %v5713_v11, %v5707_v5 }
 0x55d   : > { %4567 = vmatprep.mubr.msk.bf16.mxu1 %vm331_vm0, %v1610_v12  ;;  %v2159_v37 = vsel %vm331_vm0, %v4202_v39, 0 }
 0x55e   : > { %4568 = vmatmul.mubr.msk.bf16.vlgmr.msra.gmra.mrb[28].mxu1 %vm331_vm0, %v1611_v19  ;;  %v2216_v19 = vpop.permute.xlu1 %2215 }
 0x55f   : > { %4781 = vmatpush3.bf16.msra.mxu1 %v6005_v32  ;;  %v4894_v32 = vld [vmem:[%s6754_s3 + $0x8] sm:$0xff]   ;;  %v2222_v10 = vrot.slane %v2216_v19, 4 }
 0x560   : > { %4780 = vmatprep.subr.bf16.mxu1 %v4892_v58 }
 0x561   : > { %v4206_v42 = vcombine.low %v2221_v41, %v2222_v10 }
 0x563   : > { %4782 = vmatpush3.bf16.msra.mxu1 %v4892_v58  ;;  %v2141_v58 = vrot.slane %v2137_v21, 4 }
 0x564   : > { %4847 = vmatprep.subr.msk.bf16.mxu1 %vm331_vm0, %v4202_v39  ;;  %v6766_v39 = vpack.c.bf16 %v5709_v6, %v5705_v30  ;;  %v6770_v30 = vpack.c.bf16 %v5743_v47, %v5739_v1 }
 0x565   : > { %v4203_v12 = vcombine.low %v2140_v27, %v2141_v58 }
 0x567   : > { %v2162_v63 = vsel %vm331_vm0, %v4203_v12, 0 }
 0x5d0   : > { %v4545_v34 = vpop.f32.mrb[24].mxu0 }
 0x5d1   : > { %v1658_v36 = vpop.f32.mrb[25].mxu0 }
 0x5d2   : > { %v4546_v25 = vpop.f32.mrb[26].mxu0 }
 0x5d3   : > { %v1857_v13 = vpack.c.bf16 %v4546_v25, %v4545_v34  ;;  %v1661_v60 = vpop.f32.mrb[27].mxu0  ;;  %v6767_v34 = vpack.c.bf16 %v5725_v40, %v5719_v31 }
 0x5d4   : > { %v1856_v24 = vpack.c.bf16 %v1661_v60, %v1658_v36  ;;  %v4553_v49 = vpop.f32.mrb[24].mxu1 }
 0x5d5   : > { %v1719_v33 = vpop.f32.mrb[25].mxu1 }
 0x5d6   : > { %v4554_v8 = vpop.f32.mrb[26].mxu1  ;;  %4575 = vmatprep.mubr.msk.bf16.mxu0 %vm331_vm0, %v1856_v24 }
 0x5d7   : > { %v1859_v20 = vpack.c.bf16 %v4554_v8, %v4553_v49  ;;  %v1722_v46 = vpop.f32.mrb[27].mxu1  ;;  %4576 = vmatmul.mubr.msk.bf16.vlgmr.msra.gmra.mrb[32].mxu0 %vm331_vm0, %v1857_v13 }
 0x5d8   : > { %v1858_v26 = vpack.c.bf16 %v1722_v46, %v1719_v33  ;;  %4595 = vmatprep.mubr.msk.bf16.mxu0 %vm331_vm0, %v6763_v57  ;;  %4592 = vmatpush3.bf16.msra.mxu0 %v4893_v16  ;;  %v6764_v16 = vpack.c.bf16 %v5697_v48, %v5693_v53  ;;  %v6768_v53 = vpack.c.bf16 %v5721_v14, %v5717_v29  ;;  %v2143_v29 = vpop.permute.xlu0 %2142 }
 0x5d9   : > { %4593 = vmatprep.subr.bf16.mxu0 %v4894_v32  ;;  %v6769_v48 = vpack.c.bf16 %v5747_v52, %v5741_v3  ;;  %v2145_v3 = vpop.permute.xlu1 %2144 }
 0x5da   : > { %4579 = vmatprep.mubr.msk.bf16.mxu1 %vm331_vm0, %v1858_v26 }
 0x5db   : > { %4580 = vmatmul.mubr.msk.bf16.vlgmr.msra.gmra.mrb[32].mxu1 %vm331_vm0, %v1859_v20 }
 0x5dc   : > { %4594 = vmatpush3.bf16.msra.mxu0 %v4894_v32  ;;  %4612 = vmatpush3.bf16.xpose.msra.mxu1 %v2159_v37  ;;  %v2218_v1 = vpop.permute.xlu0 %2217  ;;  %v2242_v32 = vsel %vm331_vm0, %v4206_v42, 0 }
 0x5dd   : > { %4848 = vmatprep.subr.msk.bf16.mxu1 %vm331_vm0, %v4203_v12  ;;  %v2220_v13 = vpop.permute.xlu1 %2219  ;;  %v2223_v49 = vrot.slane %v2218_v1, 4 }
 0x5de   : > { %v2224_v24 = vrot.slane %v2220_v13, 4 }
 0x5e0   : > { %v2297_v60 = vpop.permute.xlu0 %2296  ;;  %v4207_v58 = vcombine.low %v2223_v49, %v2224_v24 }
 0x5e1   : > { %v2299_v33 = vpop.permute.xlu1 %2298  ;;  %v2304_v20 = vrot.slane %v2297_v60, 4 }
 0x5e2   : > { %v2305_v46 = vrot.slane %v2299_v33, 4  ;;  %v2245_v57 = vsel %vm331_vm0, %v4207_v58, 0 }
 0x5e3   : > { %4596 = vmatmul.mubr.msk.bf16.vlgmr.msra.gmra.mrb[32].mxu0 %vm331_vm0, %v6764_v16 }
 0x5e4   : > { %4599 = vmatprep.mubr.msk.bf16.mxu0 %vm331_vm0, %v6765_v18  ;;  %4614 = vmatpush3.bf16.xpose.msra.mxu1 %v2162_v63  ;;  %v2226_v27 = vpop.permute.xlu0 %2225  ;;  %v4210_v37 = vcombine.low %v2304_v20, %v2305_v46 }
 0x5e5   : > { %4849 = vmatprep.subr.msk.bf16.mxu1 %vm331_vm0, %v4206_v42  ;;  %v2228_v8 = vpop.permute.xlu1 %2227 }
 0x5e6   : > { %v2325_v63 = vsel %vm331_vm0, %v4210_v37, 0 }
 0x5e8   : > { %v2301_v26 = vpop.permute.xlu0 %2300 }
 0x5e9   : > { %v2303_v12 = vpop.permute.xlu1 %2302  ;;  %v2306_v10 = vrot.slane %v2301_v26, 4 }
 0x5ea   : > { %v2307_v62 = vrot.slane %v2303_v12, 4 }
 0x5eb   : > { %4600 = vmatmul.mubr.msk.bf16.gmra.mrb[36].mxu0 %vm331_vm0, %v6766_v39 }
 0x5ec   : > { %4603 = vmatprep.mubr.msk.bf16.mxu0 %vm331_vm0, %v6767_v34  ;;  %v2380_v19 = vpop.permute.xlu0 %2379  ;;  %v4211_v42 = vcombine.low %v2306_v10, %v2307_v62  ;;  %v6176_v62 = vld [vmem:[%s6753_s2 + $0x8] sm:$0xff] }
 0x5ed   : > { %v2382_v41 = vpop.permute.xlu1 %2381  ;;  %v2387_v39 = vrot.slane %v2380_v19, 4 }
 0x5ee   : > { %v2388_v34 = vrot.slane %v2382_v41, 4 }
 0x5f0   : > { %v2309_v16 = vpop.permute.xlu0 %2308 }
 0x5f1   : > { %v2311_v18 = vpop.permute.xlu1 %2310 }
 0x5f3   : > { %4604 = vmatmul.mubr.msk.bf16.gmra.mrb[40].mxu0 %vm331_vm0, %v6768_v53  ;;  %v2328_v53 = vsel %vm331_vm0, %v4211_v42, 0 }
 0x5f4   : > { %4607 = vmatprep.mubr.msk.bf16.mxu0 %vm331_vm0, %v6769_v48  ;;  %v4214_v48 = vcombine.low %v2387_v39, %v2388_v34 }
 0x5fb   : > { %4608 = vmatmul.mubr.msk.bf16.gmra.mrb[44].mxu0 %vm331_vm0, %v6770_v30  ;;  %v2386_v30 = vpop.permute.xlu1 %2385 }
 0x5fc   : > { %v4561_v5 = vpop.f32.mrb[28].mxu0 }
 0x5fd   : > { %v1780_v6 = vpop.f32.mrb[29].mxu0 }
 0x5fe   : > { %v4562_v11 = vpop.f32.mrb[30].mxu0 }
 0x5ff   : > { %v1861_v31 = vpack.c.bf16 %v4562_v11, %v4561_v5  ;;  %v1783_v40 = vpop.f32.mrb[31].mxu0  ;;  %v2384_v5 = vpop.permute.xlu0 %2383 }
 0x600   : > { %v1860_v36 = vpack.c.bf16 %v1783_v40, %v1780_v6  ;;  %v2390_v6 = vrot.slane %v2386_v30, 4  ;;  %v2389_v11 = vrot.slane %v2384_v5, 4 }
 0x602   : > { %4583 = vmatprep.mubr.msk.bf16.mxu1 %vm331_vm0, %v1860_v36  ;;  %v4215_v40 = vcombine.low %v2389_v11, %v2390_v6 }
 0x603   : > { %4584 = vmatmul.mubr.msk.bf16.gmra.mrb[36].mxu1 %vm331_vm0, %v1861_v31  ;;  %v2408_v31 = vsel %vm331_vm0, %v4214_v48, 0  ;;  %v2392_v36 = vpop.permute.xlu0 %2391 }
 0x631   : > { %v4569_v14 = vpop.f32.mrb[28].mxu1 }
 0x632   : > { %v1841_v52 = vpop.f32.mrb[29].mxu1 }
 0x633   : > { %v4570_v21 = vpop.f32.mrb[30].mxu1 }
 0x634   : > { %v1863_v25 = vpack.c.bf16 %v4570_v21, %v4569_v14  ;;  %v1844_v7 = vpop.f32.mrb[31].mxu1  ;;  %v2394_v14 = vpop.permute.xlu1 %2393 }
 0x635   : > { %v1862_v47 = vpack.c.bf16 %v1844_v7, %v1841_v52  ;;  %v2647_v7 = vpop.permute.xlu0 %2646 }
 0x636   : > { %4643 = vmatprep.subr.bf16.mxu0 %v2647_v7 }
 0x637   : > { %4587 = vmatprep.mubr.msk.bf16.mxu1 %vm331_vm0, %v1862_v47  ;;  %4644 = vmatpush3.bf16.msra.mxu0 %v2647_v7 }
 0x638   : > { %4588 = vmatmul.mubr.msk.bf16.gmra.mrb[40].mxu1 %vm331_vm0, %v1863_v25  ;;  %v2649_v1 = vpop.permute.xlu1 %2648 }
 0x639   : > { %4615 = vmatprep.mubr.msk.bf16.mxu1 %vm331_vm0, %v2143_v29  ;;  %v2411_v29 = vsel %vm331_vm0, %v4215_v40, 0  ;;  %4645 = vmatprep.subr.bf16.mxu0 %v2649_v1 }
 0x63b   : > { %4646 = vmatpush3.bf16.msra.mxu0 %v2649_v1 }
 0x640   : > { %4616 = vmatmul.mubr.msk.bf16.vlgmr.msra.gmra.mrb[44].mxu1 %vm331_vm0, %v2145_v3 }
 0x641   : > { %4620 = vmatpush3.bf16.xpose.msra.mxu1 %v2242_v32  ;;  %4623 = vmatprep.mubr.msk.bf16.mxu1 %vm331_vm0, %v2226_v27 }
 0x642   : > { %4850 = vmatprep.subr.msk.bf16.mxu1 %vm331_vm0, %v4207_v58 }
 0x649   : > { %4622 = vmatpush3.bf16.xpose.msra.mxu1 %v2245_v57  ;;  %v6166_v57 = vld [vmem:[%s6753_s2] sm:$0xff] }
 0x64a   : > { %4851 = vmatprep.subr.msk.bf16.mxu1 %vm331_vm0, %v4210_v37 }
 0x650   : > { %4624 = vmatmul.mubr.msk.bf16.vlgmr.msra.gmra.mrb[48].mxu1 %vm331_vm0, %v2228_v8  ;;  %v6158_v8 = vld [vmem:[%s6753_s2 + $0x10] sm:$0xff] }
 0x651   : > { %4628 = vmatpush3.bf16.xpose.msra.mxu1 %v2325_v63  ;;  %4631 = vmatprep.mubr.msk.bf16.mxu1 %vm331_vm0, %v2309_v16  ;;  %v6186_v63 = vld [vmem:[%s6753_s2 + $0x18] sm:$0xff] }
 0x652   : > { %4852 = vmatprep.subr.msk.bf16.mxu1 %vm331_vm0, %v4211_v42 }
 0x659   : > { %4630 = vmatpush3.bf16.xpose.msra.mxu1 %v2328_v53 }
 0x65a   : > { %4853 = vmatprep.subr.msk.bf16.mxu1 %vm331_vm0, %v4214_v48 }
 0x660   : > { %4632 = vmatmul.mubr.msk.bf16.vlgmr.msra.gmra.mrb[52].mxu1 %vm331_vm0, %v2311_v18 }
 0x661   : > { %4636 = vmatpush3.bf16.xpose.msra.mxu1 %v2408_v31  ;;  %4639 = vmatprep.mubr.msk.bf16.mxu1 %vm331_vm0, %v2392_v36 }
 0x662   : > { %4854 = vmatprep.subr.msk.bf16.mxu1 %vm331_vm0, %v4215_v40 }
 0x669   : > { %4638 = vmatpush3.bf16.xpose.msra.mxu1 %v2411_v29 }
 0x670   : > { %4640 = vmatmul.mubr.msk.bf16.vlgmr.msra.gmra.mrb[56].mxu1 %vm331_vm0, %v2394_v14 }
 0x6ae   : > { %v6131_v3 = vpop.f32.mrb[32].mxu1 }
 0x6af   : > { %v6133_v52 = vpop.f32.mrb[33].mxu1 }
 0x6b0   : > { %v6135_v21 = vpop.f32.mrb[34].mxu1 }
 0x6b1   : > { %v6137_v25 = vpop.f32.mrb[35].mxu1 }
 0x6d6   : > { %v6139_v47 = vpop.f32.mrb[36].mxu1 }
 0x6d7   : > { %v6141_v13 = vpop.f32.mrb[37].mxu1 }
 0x6d8   : > { %v6143_v60 = vpop.f32.mrb[38].mxu1 }
 0x6d9   : > { %v6145_v24 = vpop.f32.mrb[39].mxu1 }
 0x6da   : > { %6771 = vst [vmem:[#allocation5_spill] sm:$0xff] %v6145_v24 }
 0x70b   : > { %v6147_v49 = vpop.f32.mrb[40].mxu1 }
 0x70c   : > { %6772 = vst [vmem:[#allocation6_spill] sm:$0xff] %v6147_v49  ;;  %v6149_v33 = vpop.f32.mrb[41].mxu1 }
 0x70d   : > { %6773 = vst [vmem:[#allocation7_spill] sm:$0xff] %v6149_v33  ;;  %v6151_v32 = vpop.f32.mrb[42].mxu1 }
 0x70e   : > { %6774 = vst [vmem:[#allocation8_spill] sm:$0xff] %v6151_v32  ;;  %v6153_v58 = vpop.f32.mrb[43].mxu1 }
 0x70f   : > { %6775 = vst [vmem:[#allocation9_spill] sm:$0xff] %v6153_v58 }
 0x713   : > { %v4617_v27 = vpop.f32.mrb[44].mxu1 }
 0x714   : > { %v6161_v20 = vadd.f32 %v6158_v8, %v4617_v27  ;;  %v2198_v46 = vpop.f32.mrb[45].mxu1 }
 0x715   : > { %v4618_v26 = vpop.f32.mrb[46].mxu1  ;;  %v6169_v37 = vadd.f32 %v6166_v57, %v2198_v46 }
 0x716   : > { %v2201_v12 = vpop.f32.mrb[47].mxu1  ;;  %v2468_v19 = vsel %vm331_vm0, %v6161_v20, -inf  ;;  %v6189_v42 = vadd.f32 %v6186_v63, %v4618_v26 }
 0x717   : > { %v6179_v10 = vadd.f32 %v6176_v62, %v2201_v12  ;;  %2469 = vmax.xlane.f32.xlu0 %v2468_v19  ;;  %v2462_v16 = vsel %vm331_vm0, %v6169_v37, -inf }
 0x718   : > { %v2471_v18 = vsel %vm331_vm0, %v6189_v42, -inf }
 0x719   : > { %v2465_v41 = vsel %vm331_vm0, %v6179_v10, -inf }
 0x71a   : > { %2466 = vmax.xlane.f32.xlu1 %v2465_v41 }
 0x71b   : > { %2463 = vmax.xlane.f32.xlu0 %v2462_v16 }
 0x71f   : > { %2472 = vmax.xlane.f32.xlu0 %v2471_v18 }
 0x723   : > { %v4625_v39 = vpop.f32.mrb[48].mxu1 }
 0x724   : > { %v6196_v34 = vadd.f32 %v6158_v8, %v4625_v39  ;;  %v2281_v53 = vpop.f32.mrb[49].mxu1 }
 0x725   : > { %v4626_v48 = vpop.f32.mrb[50].mxu1  ;;  %v6199_v30 = vadd.f32 %v6166_v57, %v2281_v53 }
 0x726   : > { %v6202_v5 = vadd.f32 %v6186_v63, %v4626_v48  ;;  %v2284_v6 = vpop.f32.mrb[51].mxu1  ;;  %v2480_v11 = vsel %vm331_vm0, %v6196_v34, -inf }
 0x727   : > { %2481 = vmax.xlane.f32.xlu0 %v2480_v11  ;;  %v6207_v31 = vadd.f32 %v6176_v62, %v2284_v6  ;;  %v2474_v36 = vsel %vm331_vm0, %v6199_v30, -inf }
 0x728   : > { %v2483_v40 = vsel %vm331_vm0, %v6202_v5, -inf }
 0x729   : > { %2484 = vmax.xlane.f32.xlu1 %v2483_v40  ;;  %v2477_v29 = vsel %vm331_vm0, %v6207_v31, -inf }
 0x72b   : > { %2475 = vmax.xlane.f32.xlu0 %v2474_v36 }
 0x72d   : > { %2478 = vmax.xlane.f32.xlu1 %v2477_v29 }
 0x733   : > { %v4633_v14 = vpop.f32.mrb[52].mxu1 }
 0x734   : > { %v6216_v7 = vadd.f32 %v6158_v8, %v4633_v14  ;;  %v2364_v1 = vpop.f32.mrb[53].mxu1 }
 0x735   : > { %v4634_v27 = vpop.f32.mrb[54].mxu1  ;;  %v6219_v46 = vadd.f32 %v6166_v57, %v2364_v1 }
 0x736   : > { %v6222_v26 = vadd.f32 %v6186_v63, %v4634_v27  ;;  %v2367_v12 = vpop.f32.mrb[55].mxu1  ;;  %v2492_v19 = vsel %vm331_vm0, %v6216_v7, -inf }
 0x737   : > { %2493 = vmax.xlane.f32.xlu0 %v2492_v19  ;;  %v6227_v41 = vadd.f32 %v6176_v62, %v2367_v12  ;;  %v2486_v18 = vsel %vm331_vm0, %v6219_v46, -inf }
 0x738   : > { %v2495_v16 = vsel %vm331_vm0, %v6222_v26, -inf }
 0x739   : > { %2496 = vmax.xlane.f32.xlu1 %v2495_v16  ;;  %v2489_v39 = vsel %vm331_vm0, %v6227_v41, -inf  ;;  %v5177_v16 = vld [vmem:[%s5242_s24 + $0x80] ss:$12 sps:$4 sm:$0xff]  }
 0x73b   : > { %2487 = vmax.xlane.f32.xlu0 %v2486_v18  ;;  %v6258_v18 = vld [vmem:[%s5242_s24 + $0x38] ss:$12 sps:$4 sm:$0xff]  }
 0x73d   : > { %2490 = vmax.xlane.f32.xlu1 %v2489_v39  ;;  %v6263_v39 = vld [vmem:[%s5242_s24 + $0x50] ss:$12 sps:$4 sm:$0xff]  }
 0x743   : > { %v4641_v53 = vpop.f32.mrb[56].mxu1 }
 0x744   : > { %v6236_v48 = vadd.f32 %v6158_v8, %v4641_v53  ;;  %v2447_v6 = vpop.f32.mrb[57].mxu1  ;;  %v6268_v53 = vld [vmem:[%s5242_s24 + $0x68] ss:$12 sps:$4 sm:$0xff]  }
 0x745   : > { %v4642_v11 = vpop.f32.mrb[58].mxu1  ;;  %v6239_v40 = vadd.f32 %v6166_v57, %v2447_v6 }
 0x746   : > { %v6242_v36 = vadd.f32 %v6186_v63, %v4642_v11  ;;  %v2450_v29 = vpop.f32.mrb[59].mxu1  ;;  %v2504_v14 = vsel %vm331_vm0, %v6236_v48, -inf }
 0x747   : > { %2505 = vmax.xlane.f32.xlu0 %v2504_v14  ;;  %v6247_v1 = vadd.f32 %v6176_v62, %v2450_v29  ;;  %v2498_v12 = vsel %vm331_vm0, %v6239_v40, -inf }
 0x748   : > { %v2507_v27 = vsel %vm331_vm0, %v6242_v36, -inf }
 0x749   : > { %2508 = vmax.xlane.f32.xlu1 %v2507_v27  ;;  %v2501_v19 = vsel %vm331_vm0, %v6247_v1, -inf }
 0x74b   : > { %2499 = vmax.xlane.f32.xlu0 %v2498_v12 }
 0x74d   : > { %2502 = vmax.xlane.f32.xlu1 %v2501_v19 }
 0x75e   : > { %2770 = vrot.lane.b32.xlu1 %v5177_v16, %s5196_s9 }
 0x761   : > { %2707 = vrot.lane.b32.xlu0 %v6258_v18, %s5196_s9 }
 0x765   : > { %2709 = vrot.lane.b32.xlu0 %v6263_v39, %s5196_s9 }
 0x769   : > { %2768 = vrot.lane.b32.xlu0 %v6268_v53, %s5196_s9 }
 0x7a4   : > { %v2470_v6 = vpop.xlane.xlu0 %2469 }
 0x7a5   : > { %v2512_v11 = vsub.f32 %v6161_v20, %v2470_v6 }
 0x7a7   : > { %v2530_v29 = vmul.f32 1.442695, %v2512_v11  ;;  %v2467_v14 = vpop.xlane.xlu1 %2466 }
 0x7a8   : > { %v2464_v27 = vpop.xlane.xlu0 %2463  ;;  %v2511_v19 = vsub.f32 %v6179_v10, %v2467_v14 }
 0x7a9   : > { %5027 = vpow2.f32 %v2530_v29  ;;  %v2510_v12 = vsub.f32 %v6169_v37, %v2464_v27 }
 0x7aa   : > { %v2528_v33 = vmul.f32 1.442695, %v2511_v19 }
 0x7ab   : > { %v2526_v16 = vmul.f32 1.442695, %v2510_v12 }
 0x7ac   : > { %v2473_v58 = vpop.xlane.xlu0 %2472 }
 0x7ad   : > { %5029 = vpow2.f32 %v2526_v16  ;;  %v2513_v32 = vsub.f32 %v6189_v42, %v2473_v58 }
 0x7af   : > { %v2532_v49 = vmul.f32 1.442695, %v2513_v32 }
 0x7b1   : > { %5031 = vpow2.f32 %v2532_v49 }
 0x7b2   : > { %5033 = vpow2.f32 %v2528_v33 }
 0x7b3   : > { %v6276_v24 = vpop.eup %5027 }
 0x7b4   : > { %v2482_v20 = vpop.xlane.xlu0 %2481  ;;  %v2564_v6 = vsel %vm331_vm0, %v6276_v24, 0.0 }
 0x7b5   : > { %v2516_v11 = vsub.f32 %v6196_v34, %v2482_v20  ;;  %2565 = vadd.xlane.f32.xlu0 %v2564_v6 }
 0x7b6   : > { %v2485_v37 = vpop.xlane.xlu1 %2484 }
 0x7b7   : > { %v6281_v10 = vpop.eup %5029  ;;  %v2538_v29 = vmul.f32 1.442695, %v2516_v11  ;;  %v2517_v14 = vsub.f32 %v6202_v5, %v2485_v37 }
 0x7b8   : > { %v2476_v58 = vpop.xlane.xlu0 %2475  ;;  %v2558_v49 = vsel %vm331_vm0, %v6281_v10, 0.0 }
 0x7b9   : > { %5035 = vpow2.f32 %v2538_v29  ;;  %v2540_v32 = vmul.f32 1.442695, %v2517_v14  ;;  %v2514_v33 = vsub.f32 %v6199_v30, %v2476_v58  ;;  %2559 = vadd.xlane.f32.xlu0 %v2558_v49 }
 0x7ba   : > { %v2479_v42 = vpop.xlane.xlu1 %2478 }
 0x7bb   : > { %v6287_v27 = vpop.eup %5031  ;;  %5037 = vpow2.f32 %v2540_v32  ;;  %v2534_v34 = vmul.f32 1.442695, %v2514_v33  ;;  %v2515_v12 = vsub.f32 %v6207_v31, %v2479_v42 }
 0x7bc   : > { %v2567_v19 = vsel %vm331_vm0, %v6287_v27, 0.0  ;;  %v6292_v5 = vpop.eup %5033 }
 0x7bd   : > { %5039 = vpow2.f32 %v2534_v34  ;;  %v2536_v16 = vmul.f32 1.442695, %v2515_v12  ;;  %2568 = vadd.xlane.f32.xlu1 %v2567_v19  ;;  %v2561_v30 = vsel %vm331_vm0, %v6292_v5, 0.0 }
 0x7bf   : > { %5041 = vpow2.f32 %v2536_v16 }
 0x7c1   : > { %2562 = vadd.xlane.f32.xlu1 %v2561_v30 }
 0x7c3   : > { %v6296_v20 = vpop.eup %5035 }
 0x7c4   : > { %v2494_v6 = vpop.xlane.xlu0 %2493  ;;  %v2576_v11 = vsel %vm331_vm0, %v6296_v20, 0.0 }
 0x7c5   : > { %v6300_v31 = vpop.eup %5037  ;;  %v2520_v37 = vsub.f32 %v6216_v7, %v2494_v6  ;;  %2577 = vadd.xlane.f32.xlu0 %v2576_v11 }
 0x7c6   : > { %v2497_v29 = vpop.xlane.xlu1 %2496  ;;  %v2579_v14 = vsel %vm331_vm0, %v6300_v31, 0.0 }
 0x7c7   : > { %v6305_v58 = vpop.eup %5039  ;;  %v2546_v49 = vmul.f32 1.442695, %v2520_v37  ;;  %v2521_v32 = vsub.f32 %v6222_v26, %v2497_v29  ;;  %2580 = vadd.xlane.f32.xlu1 %v2579_v14 }
 0x7c8   : > { %v2488_v33 = vpop.xlane.xlu0 %2487  ;;  %v2570_v42 = vsel %vm331_vm0, %v6305_v58, 0.0 }
 0x7c9   : > { %v6310_v34 = vpop.eup %5041  ;;  %5043 = vpow2.f32 %v2546_v49  ;;  %v2548_v12 = vmul.f32 1.442695, %v2521_v32  ;;  %v2518_v7 = vsub.f32 %v6219_v46, %v2488_v33  ;;  %2571 = vadd.xlane.f32.xlu0 %v2570_v42 }
 0x7ca   : > { %v2491_v19 = vpop.xlane.xlu1 %2490  ;;  %v2573_v16 = vsel %vm331_vm0, %v6310_v34, 0.0 }
 0x7cb   : > { %5045 = vpow2.f32 %v2548_v12  ;;  %v2542_v30 = vmul.f32 1.442695, %v2518_v7  ;;  %v2519_v26 = vsub.f32 %v6227_v41, %v2491_v19  ;;  %2574 = vadd.xlane.f32.xlu1 %v2573_v16 }
 0x7cd   : > { %5047 = vpow2.f32 %v2542_v30  ;;  %v2544_v6 = vmul.f32 1.442695, %v2519_v26 }
 0x7cf   : > { %5049 = vpow2.f32 %v2544_v6 }
 0x7d3   : > { %v6316_v11 = vpop.eup %5043 }
 0x7d4   : > { %v2506_v37 = vpop.xlane.xlu0 %2505  ;;  %v2588_v29 = vsel %vm331_vm0, %v6316_v11, 0.0 }
 0x7d5   : > { %v6320_v46 = vpop.eup %5045  ;;  %v2524_v14 = vsub.f32 %v6236_v48, %v2506_v37  ;;  %2589 = vadd.xlane.f32.xlu0 %v2588_v29 }
 0x7d6   : > { %v2509_v49 = vpop.xlane.xlu1 %2508  ;;  %v2591_v32 = vsel %vm331_vm0, %v6320_v46, 0.0 }
 0x7d7   : > { %v6325_v41 = vpop.eup %5047  ;;  %v2554_v33 = vmul.f32 1.442695, %v2524_v14  ;;  %v2525_v42 = vsub.f32 %v6242_v36, %v2509_v49  ;;  %2592 = vadd.xlane.f32.xlu1 %v2591_v32 }
 0x7d8   : > { %v2500_v12 = vpop.xlane.xlu0 %2499  ;;  %v2582_v7 = vsel %vm331_vm0, %v6325_v41, 0.0 }
 0x7d9   : > { %v6330_v19 = vpop.eup %5049  ;;  %5051 = vpow2.f32 %v2554_v33  ;;  %v2522_v48 = vsub.f32 %v6239_v40, %v2500_v12  ;;  %2583 = vadd.xlane.f32.xlu0 %v2582_v7  ;;  %v2556_v26 = vmul.f32 1.442695, %v2525_v42 }
 0x7da   : > { %v2503_v16 = vpop.xlane.xlu1 %2502  ;;  %v2585_v30 = vsel %vm331_vm0, %v6330_v19, 0.0 }
 0x7db   : > { %v2550_v6 = vmul.f32 1.442695, %v2522_v48  ;;  %v2523_v37 = vsub.f32 %v6247_v1, %v2503_v16  ;;  %2586 = vadd.xlane.f32.xlu1 %v2585_v30  ;;  %v6354_v48 = vld [vmem:[%s5242_s24 + $0x98] ss:$12 sps:$4 sm:$0xff]   ;;  %v6369_v30 = vld [vmem:[%s5242_s24 + $0xb0] ss:$12 sps:$4 sm:$0xff]  }
 0x7dc   : > { %v2708_v36 = vpop.permute.xlu0 %2707 }
 0x7dd   : > { %5053 = vpow2.f32 %v2550_v6  ;;  %4651 = vmatprep.subr.bf16.mxu1 %v2708_v36  ;;  %v2552_v29 = vmul.f32 1.442695, %v2523_v37 }
 0x7de   : > { %4652 = vmatpush3.bf16.msra.mxu1 %v2708_v36  ;;  %5055 = vpow2.f32 %v2556_v26 }
 0x7df   : > { %5057 = vpow2.f32 %v2552_v29 }
 0x7e0   : > { %v2710_v14 = vpop.permute.xlu0 %2709 }
 0x7e1   : > { %4653 = vmatprep.subr.bf16.mxu1 %v2710_v14 }
 0x7e2   : > { %4654 = vmatpush3.bf16.msra.mxu1 %v2710_v14 }
 0x7e3   : > { %v6336_v40 = vpop.eup %5051 }
 0x7e4   : > { %v2600_v49 = vsel %vm331_vm0, %v6336_v40, 0.0  ;;  %v6340_v32 = vpop.permute.xlu0 %2768 }
 0x7e5   : > { %2601 = vadd.xlane.f32.xlu1 %v2600_v49  ;;  %4659 = vmatprep.subr.bf16.mxu0 %v6340_v32 }
 0x7e7   : > { %v6343_v1 = vpop.eup %5053 }
 0x7e8   : > { %v2594_v33 = vsel %vm331_vm0, %v6343_v1, 0.0  ;;  %v6347_v42 = vpop.eup %5055 }
 0x7e9   : > { %2595 = vadd.xlane.f32.xlu1 %v2594_v33  ;;  %v2603_v12 = vsel %vm331_vm0, %v6347_v42, 0.0  ;;  %v6351_v7 = vpop.eup %5057 }
 0x7ea   : > { %v2597_v16 = vsel %vm331_vm0, %v6351_v7, 0.0 }
 0x7ed   : > { %2604 = vadd.xlane.f32.xlu1 %v2603_v12 }
 0x7ef   : > { %2829 = vrot.lane.b32.xlu0 %v6354_v48, %s5196_s9 }
 0x7f1   : > { %2598 = vadd.xlane.f32.xlu1 %v2597_v16 }
 0x7f3   : > { %3047 = vrot.lane.b32.xlu0 %v5928_v35, %s5197_s29 }
 0x7f7   : > { %3051 = vrot.lane.b32.xlu0 %v5938_v38, %s5197_s29 }
 0x7fb   : > { %3130 = vrot.lane.b32.xlu0 %v5948_v2, %s5197_s29 }
 0x7ff   : > { %3059 = vrot.lane.b32.xlu0 %v5255_v9, %s5197_s29  ;;  %v6776_v9 = vld [vmem:[#allocation3_spill] sm:$0xff] }
 0x802   : > { %2831 = vrot.lane.b32.xlu1 %v6369_v30, %s5196_s9 }
 0x803   : > { %3134 = vrot.lane.b32.xlu0 %v5962_v0, %s5197_s29 }
 0x806   : > { %3049 = vrot.lane.b32.xlu1 %v5923_v22, %s5197_s29 }
 0x807   : > { %3213 = vrot.lane.b32.xlu0 %v5967_v28, %s5197_s29 }
 0x80a   : > { %3053 = vrot.lane.b32.xlu1 %v5933_v56, %s5197_s29 }
 0x80b   : > { %3217 = vrot.lane.b32.xlu0 %v5991_v45, %s5197_s29  ;;  %v6777_v45 = vld [vmem:[#allocation4_spill] sm:$0xff] }
 0x80e   : > { %3132 = vrot.lane.b32.xlu1 %v5943_v43, %s5197_s29 }
 0x80f   : > { %3296 = vrot.lane.b32.xlu0 %v6008_v59, %s5197_s29 }
 0x812   : > { %3061 = vrot.lane.b32.xlu1 %v5320_v44, %s5197_s29 }
 0x813   : > { %3142 = vrot.lane.b32.xlu0 %v5267_v15, %s5197_s29  ;;  %v6778_v15 = vld [vmem:[#allocation2_spill] sm:$0xff] }
 0x816   : > { %3136 = vrot.lane.b32.xlu1 %v6776_v9, %s5197_s29 }
 0x817   : > { %3300 = vrot.lane.b32.xlu0 %v6026_v17, %s5197_s29 }
 0x81a   : > { %3215 = vrot.lane.b32.xlu1 %v6777_v45, %s5197_s29 }
 0x81b   : > { %3225 = vrot.lane.b32.xlu0 %v5330_v50, %s5197_s29  ;;  %v2771_v50 = vpop.permute.xlu1 %2770 }
 0x81e   : > { %3219 = vrot.lane.b32.xlu1 %v5986_v23, %s5197_s29 }
 0x81f   : > { %3308 = vrot.lane.b32.xlu0 %v5336_v51, %s5197_s29 }
 0x822   : > { %3298 = vrot.lane.b32.xlu1 %v6014_v61, %s5197_s29 }
 0x826   : > { %3144 = vrot.lane.b32.xlu1 %v6778_v15, %s5197_s29 }
 0x82a   : > { %3302 = vrot.lane.b32.xlu1 %v6031_v4, %s5197_s29 }
 0x82e   : > { %3227 = vrot.lane.b32.xlu1 %v5350_v54, %s5197_s29 }
 0x832   : > { %3310 = vrot.lane.b32.xlu1 %v5354_v55, %s5197_s29 }
 0x842   : > { %v2566_v44 = vpop.xlane.xlu0 %2565 }
 0x846   : > { %v2560_v22 = vpop.xlane.xlu0 %2559 }
 0x84a   : > { %v2569_v35 = vpop.xlane.xlu1 %2568 }
 0x84b   : > { %5059 = vrcp.f32 %v2569_v35 }
 0x84c   : > { %5061 = vrcp.f32 %v2560_v22 }
 0x84d   : > { %5063 = vrcp.f32 %v2566_v44 }
 0x84e   : > { %v2563_v51 = vpop.xlane.xlu1 %2562 }
 0x84f   : > { %5065 = vrcp.f32 %v2563_v51 }
 0x852   : > { %v2578_v56 = vpop.xlane.xlu0 %2577 }
 0x854   : > { %v2581_v38 = vpop.xlane.xlu1 %2580 }
 0x855   : > { %v5060_v43 = vpop.eup %5059  ;;  %5067 = vrcp.f32 %v2581_v38 }
 0x856   : > { %v2572_v2 = vpop.xlane.xlu0 %2571  ;;  %v5062_v0 = vpop.eup %5061  ;;  %v2625_v23 = vmul.f32 %v5060_v43, %v6287_v27  ;;  %v4895_v27 = vld [vmem:[%s6754_s3 + $0x20] sm:$0xff]  }
 0x857   : > { %5069 = vrcp.f32 %v2572_v2  ;;  %v5064_v54 = vpop.eup %5063  ;;  %v2622_v59 = vmul.f32 %v5062_v0, %v6281_v10 }
 0x858   : > { %5071 = vrcp.f32 %v2578_v56  ;;  %v2575_v28 = vpop.xlane.xlu1 %2574  ;;  %v2624_v17 = vmul.f32 %v5064_v54, %v6276_v24 }
 0x859   : > { %v5066_v55 = vpop.eup %5065  ;;  %5073 = vrcp.f32 %v2575_v28 }
 0x85a   : > { %v2623_v61 = vmul.f32 %v5066_v55, %v6292_v5  ;;  %v2639_v26 = vpack.c.bf16 %v2625_v23, %v2624_v17 }
 0x85c   : > { %v2638_v4 = vpack.c.bf16 %v2623_v61, %v2622_v59 }
 0x85e   : > { %4647 = vmatprep.mubr.msk.bf16.mxu0 %vm331_vm0, %v2638_v4 }
 0x85f   : > { %4648 = vmatmul.mubr.msk.bf16.vlgmr.msra.gmra.mrb[48].mxu0 %vm331_vm0, %v2639_v26  ;;  %v5068_v6 = vpop.eup %5067 }
 0x860   : > { %4660 = vmatpush3.bf16.msra.mxu0 %v6340_v32  ;;  %v2629_v24 = vmul.f32 %v5068_v6, %v6300_v31 }
 0x861   : > { %v5070_v37 = vpop.eup %5069  ;;  %4661 = vmatprep.subr.bf16.mxu0 %v2771_v50 }
 0x862   : > { %v5072_v10 = vpop.eup %5071  ;;  %v2590_v36 = vpop.xlane.xlu0 %2589  ;;  %v2626_v14 = vmul.f32 %v5070_v37, %v6305_v58 }
 0x863   : > { %v5074_v5 = vpop.eup %5073  ;;  %v2628_v33 = vmul.f32 %v5072_v10, %v6296_v20 }
 0x864   : > { %v2593_v29 = vpop.xlane.xlu1 %2592  ;;  %4662 = vmatpush3.bf16.msra.mxu0 %v2771_v50  ;;  %v2627_v49 = vmul.f32 %v5074_v5, %v6310_v34 }
 0x865   : > { %4675 = vmatprep.subr.bf16.mxu0 %v4895_v27  ;;  %5075 = vrcp.f32 %v2593_v29  ;;  %v2641_v16 = vpack.c.bf16 %v2629_v24, %v2628_v33 }
 0x866   : > { %v2584_v32 = vpop.xlane.xlu0 %2583  ;;  %v2640_v12 = vpack.c.bf16 %v2627_v49, %v2626_v14 }
 0x867   : > { %5077 = vrcp.f32 %v2584_v32 }
 0x868   : > { %5079 = vrcp.f32 %v2590_v36  ;;  %v2587_v9 = vpop.xlane.xlu1 %2586  ;;  %4655 = vmatprep.mubr.msk.bf16.mxu1 %vm331_vm0, %v2640_v12 }
 0x869   : > { %5081 = vrcp.f32 %v2587_v9  ;;  %4656 = vmatmul.mubr.msk.bf16.vlgmr.msra.gmra.mrb[60].mxu1 %vm331_vm0, %v2641_v16 }
 0x86a   : > { %v2830_v31 = vpop.permute.xlu0 %2829 }
 0x86b   : > { %4667 = vmatprep.subr.bf16.mxu1 %v2830_v31 }
 0x86c   : > { %4668 = vmatpush3.bf16.msra.mxu1 %v2830_v31 }
 0x86e   : > { %v3048_v50 = vpop.permute.xlu0 %3047 }
 0x86f   : > { %v5076_v58 = vpop.eup %5075 }
 0x870   : > { %v2633_v44 = vmul.f32 %v5076_v58, %v6320_v46 }
 0x871   : > { %v5078_v34 = vpop.eup %5077 }
 0x872   : > { %v5080_v45 = vpop.eup %5079  ;;  %v2602_v20 = vpop.xlane.xlu1 %2601  ;;  %v2630_v22 = vmul.f32 %v5078_v34, %v6325_v41 }
 0x873   : > { %v5082_v15 = vpop.eup %5081  ;;  %v2632_v51 = vmul.f32 %v5080_v45, %v6316_v11  ;;  %v3052_v2 = vpop.permute.xlu0 %3051  ;;  %v3055_v11 = vrot.slane %v3048_v50, 4 }
 0x874   : > { %v2631_v35 = vmul.f32 %v5082_v15, %v6330_v19  ;;  %v3057_v37 = vrot.slane %v3052_v2, 4 }
 0x875   : > { %v2643_v43 = vpack.c.bf16 %v2633_v44, %v2632_v51 }
 0x876   : > { %v2596_v56 = vpop.xlane.xlu1 %2595  ;;  %v2642_v38 = vpack.c.bf16 %v2631_v35, %v2630_v22 }
 0x877   : > { %v3131_v54 = vpop.permute.xlu0 %3130 }
 0x878   : > { %4663 = vmatprep.mubr.msk.bf16.mxu0 %vm331_vm0, %v2642_v38 }
 0x879   : > { %4664 = vmatmul.mubr.msk.bf16.vlgmr.msra.gmra.mrb[52].mxu0 %vm331_vm0, %v2643_v43 }
 0x87a   : > { %v2605_v0 = vpop.xlane.xlu1 %2604  ;;  %4676 = vmatpush3.bf16.msra.mxu0 %v4895_v27 }
 0x87b   : > { %5083 = vrcp.f32 %v2605_v0  ;;  %v3060_v41 = vpop.permute.xlu0 %3059 }
 0x87c   : > { %5085 = vrcp.f32 %v2596_v56 }
 0x87d   : > { %5087 = vrcp.f32 %v2602_v20 }
 0x87e   : > { %v2599_v46 = vpop.xlane.xlu1 %2598 }
 0x87f   : > { %5089 = vrcp.f32 %v2599_v46  ;;  %v3135_v28 = vpop.permute.xlu0 %3134 }
 0x880   : > { %v3140_v45 = vrot.slane %v3135_v28, 4 }
 0x882   : > { %v2832_v19 = vpop.permute.xlu1 %2831 }
 0x883   : > { %4669 = vmatprep.subr.bf16.mxu1 %v2832_v19  ;;  %v3214_v29 = vpop.permute.xlu0 %3213 }
 0x884   : > { %4670 = vmatpush3.bf16.msra.mxu1 %v2832_v19 }
 0x885   : > { %v5084_v55 = vpop.eup %5083 }
 0x886   : > { %v3050_v23 = vpop.permute.xlu1 %3049  ;;  %v5086_v59 = vpop.eup %5085  ;;  %v2637_v26 = vmul.f32 %v5084_v55, %v6347_v42 }
 0x887   : > { %v3056_v61 = vrot.slane %v3050_v23, 4  ;;  %v5088_v17 = vpop.eup %5087  ;;  %v2634_v27 = vmul.f32 %v5086_v59, %v6343_v1 }
 0x888   : > { %v2636_v5 = vmul.f32 %v5088_v17, %v6336_v40  ;;  %v3138_v40 = vrot.slane %v3131_v54, 4 }
 0x889   : > { %v5090_v4 = vpop.eup %5089  ;;  %v4236_v6 = vcombine.low %v3055_v11, %v3056_v61 }
 0x88a   : > { %v2635_v10 = vmul.f32 %v5090_v4, %v6351_v7  ;;  %v3054_v36 = vpop.permute.xlu1 %3053  ;;  %v2645_v49 = vpack.c.bf16 %v2637_v26, %v2636_v5  ;;  %v3218_v7 = vpop.permute.xlu0 %3217  ;;  %v3221_v4 = vrot.slane %v3214_v29, 4 }
 0x88b   : > { %4855 = vmatprep.subr.msk.bf16.mxu1 %vm331_vm0, %v4236_v6  ;;  %v3058_v24 = vrot.slane %v3054_v36, 4  ;;  %v3076_v33 = vsel %vm331_vm0, %v4236_v6, 0  ;;  %v3223_v50 = vrot.slane %v3218_v7, 4 }
 0x88c   : > { %v2644_v14 = vpack.c.bf16 %v2635_v10, %v2634_v27 }
 0x88d   : > { %v4237_v32 = vcombine.low %v3057_v37, %v3058_v24  ;;  %v4896_v37 = vld [vmem:[%s6754_s3 + $0x28] sm:$0xff]  }
 0x88e   : > { %4671 = vmatprep.mubr.msk.bf16.mxu1 %vm331_vm0, %v2644_v14  ;;  %v3133_v42 = vpop.permute.xlu1 %3132  ;;  %v3297_v58 = vpop.permute.xlu0 %3296  ;;  %4677 = vmatprep.subr.bf16.mxu0 %v4896_v37 }
 0x88f   : > { %4672 = vmatmul.mubr.msk.bf16.vlgmr.msra.gmra.mrb[64].mxu1 %vm331_vm0, %v2645_v49  ;;  %v3139_v1 = vrot.slane %v3133_v42, 4  ;;  %v3079_v16 = vsel %vm331_vm0, %v4237_v32, 0  ;;  %v3304_v38 = vrot.slane %v3297_v58, 4  ;;  %4678 = vmatpush3.bf16.msra.mxu0 %v4896_v37 }
 0x890   : > { %4696 = vmatpush3.bf16.xpose.msra.mxu1 %v3076_v33  ;;  %4699 = vmatprep.mubr.msk.bf16.mxu1 %vm331_vm0, %v3060_v41 }
 0x891   : > { %4856 = vmatprep.subr.msk.bf16.mxu1 %vm331_vm0, %v4237_v32  ;;  %v4240_v9 = vcombine.low %v3138_v40, %v3139_v1 }
 0x892   : > { %v3062_v12 = vpop.permute.xlu1 %3061  ;;  %v3143_v22 = vpop.permute.xlu0 %3142 }
 0x893   : > { %v3159_v44 = vsel %vm331_vm0, %v4240_v9, 0 }
 0x896   : > { %v3137_v31 = vpop.permute.xlu1 %3136  ;;  %v3301_v0 = vpop.permute.xlu0 %3300 }
 0x897   : > { %v3141_v34 = vrot.slane %v3137_v31, 4  ;;  %v3306_v11 = vrot.slane %v3301_v0, 4 }
 0x898   : > { %4698 = vmatpush3.bf16.xpose.msra.mxu1 %v3079_v16 }
 0x899   : > { %4857 = vmatprep.subr.msk.bf16.mxu1 %vm331_vm0, %v4240_v9  ;;  %v4241_v15 = vcombine.low %v3140_v45, %v3141_v34 }
 0x89a   : > { %v3216_v20 = vpop.permute.xlu1 %3215  ;;  %v3226_v19 = vpop.permute.xlu0 %3225 }
 0x89b   : > { %v3162_v54 = vsel %vm331_vm0, %v4241_v15, 0  ;;  %v3222_v17 = vrot.slane %v3216_v20, 4 }
 0x89d   : > { %v4244_v26 = vcombine.low %v3221_v4, %v3222_v17 }
 0x89e   : > { %v3220_v35 = vpop.permute.xlu1 %3219  ;;  %v3309_v61 = vpop.permute.xlu0 %3308 }
 0x89f   : > { %4700 = vmatmul.mubr.msk.bf16.vlgmr.msra.gmra.mrb[68].mxu1 %vm331_vm0, %v3062_v12  ;;  %v3224_v51 = vrot.slane %v3220_v35, 4  ;;  %4859 = vmatprep.subr.msk.bf16.mxu0 %vm331_vm0, %v4244_v26  ;;  %v3242_v33 = vsel %vm331_vm0, %v4244_v26, 0 }
 0x8a0   : > { %4704 = vmatpush3.bf16.xpose.msra.mxu1 %v3159_v44  ;;  %4707 = vmatprep.mubr.msk.bf16.mxu1 %vm331_vm0, %v3143_v22 }
 0x8a1   : > { %v4245_v56 = vcombine.low %v3223_v50, %v3224_v51  ;;  %4858 = vmatprep.subr.msk.bf16.mxu1 %vm331_vm0, %v4241_v15 }
 0x8a2   : > { %v3299_v43 = vpop.permute.xlu1 %3298 }
 0x8a3   : > { %v3305_v2 = vrot.slane %v3299_v43, 4  ;;  %v3245_v12 = vsel %vm331_vm0, %v4245_v56, 0 }
 0x8a5   : > { %v4248_v46 = vcombine.low %v3304_v38, %v3305_v2 }
 0x8a6   : > { %v3145_v41 = vpop.permute.xlu1 %3144 }
 0x8a7   : > { %v3325_v23 = vsel %vm331_vm0, %v4248_v46, 0 }
 0x8a8   : > { %4706 = vmatpush3.bf16.xpose.msra.mxu1 %v3162_v54 }
 0x8a9   : > { %4861 = vmatprep.subr.msk.bf16.mxu1 %vm331_vm0, %v4248_v46 }
 0x8aa   : > { %v3303_v28 = vpop.permute.xlu1 %3302 }
 0x8ab   : > { %v3307_v55 = vrot.slane %v3303_v28, 4 }
 0x8ad   : > { %v4249_v59 = vcombine.low %v3306_v11, %v3307_v55 }
 0x8ae   : > { %v3228_v27 = vpop.permute.xlu1 %3227 }
 0x8af   : > { %4708 = vmatmul.mubr.msk.bf16.vlgmr.msra.gmra.mrb[72].mxu1 %vm331_vm0, %v3145_v41  ;;  %v3328_v6 = vsel %vm331_vm0, %v4249_v59, 0 }
 0x8b0   : > { %4720 = vmatpush3.bf16.xpose.msra.mxu1 %v3325_v23  ;;  %4723 = vmatprep.mubr.msk.bf16.mxu1 %vm331_vm0, %v3309_v61 }
 0x8b1   : > { %4862 = vmatprep.subr.msk.bf16.mxu1 %vm331_vm0, %v4249_v59 }
 0x8b2   : > { %v3311_v10 = vpop.permute.xlu1 %3310 }
 0x8b8   : > { %4722 = vmatpush3.bf16.xpose.msra.mxu1 %v3328_v6 }
 0x8bf   : > { %4724 = vmatmul.mubr.msk.bf16.vlgmr.msra.gmra.mrb[76].mxu1 %vm331_vm0, %v3311_v10 }
 0x932   : > { %v4649_v36 = vpop.f32.mrb[48].mxu0 }
 0x933   : > { %v2692_v5 = vpop.f32.mrb[49].mxu0 }
 0x934   : > { %v4650_v24 = vpop.f32.mrb[50].mxu0 }
 0x935   : > { %v2891_v29 = vpack.c.bf16 %v4650_v24, %v4649_v36  ;;  %v2695_v14 = vpop.f32.mrb[51].mxu0 }
 0x936   : > { %v2890_v49 = vpack.c.bf16 %v2695_v14, %v2692_v5 }
 0x938   : > { %4679 = vmatprep.mubr.msk.bf16.mxu0 %vm331_vm0, %v2890_v49 }
 0x939   : > { %4680 = vmatmul.mubr.msk.bf16.vlgmr.msra.gmra.mrb[32].mxu0 %vm331_vm0, %v2891_v29 }
 0x93a   : > { %4712 = vmatpush3.bf16.xpose.msra.mxu0 %v3242_v33 }
 0x93b   : > { %4860 = vmatprep.subr.msk.bf16.mxu0 %vm331_vm0, %v4245_v56 }
 0x93c   : > { %v4657_v32 = vpop.f32.mrb[60].mxu1 }
 0x93d   : > { %v2753_v42 = vpop.f32.mrb[61].mxu1 }
 0x93e   : > { %v4658_v40 = vpop.f32.mrb[62].mxu1 }
 0x93f   : > { %v2893_v1 = vpack.c.bf16 %v4658_v40, %v4657_v32  ;;  %v2756_v7 = vpop.f32.mrb[63].mxu1 }
 0x940   : > { %v2892_v16 = vpack.c.bf16 %v2756_v7, %v2753_v42 }
 0x942   : > { %4683 = vmatprep.mubr.msk.bf16.mxu0 %vm331_vm0, %v2892_v16  ;;  %4714 = vmatpush3.bf16.xpose.msra.mxu0 %v3245_v12 }
 0x943   : > { %4684 = vmatmul.mubr.msk.bf16.gmra.mrb[36].mxu0 %vm331_vm0, %v2893_v1 }
 0x94c   : > { %v4665_v9 = vpop.f32.mrb[52].mxu0 }
 0x94d   : > { %v2814_v31 = vpop.f32.mrb[53].mxu0 }
 0x94e   : > { %v4666_v58 = vpop.f32.mrb[54].mxu0 }
 0x94f   : > { %v2895_v34 = vpack.c.bf16 %v4666_v58, %v4665_v9  ;;  %v2817_v45 = vpop.f32.mrb[55].mxu0 }
 0x950   : > { %v2894_v20 = vpack.c.bf16 %v2817_v45, %v2814_v31 }
 0x952   : > { %4687 = vmatprep.mubr.msk.bf16.mxu0 %vm331_vm0, %v2894_v20 }
 0x953   : > { %4688 = vmatmul.mubr.msk.bf16.gmra.mrb[40].mxu0 %vm331_vm0, %v2895_v34 }
 0x962   : > { %v4673_v15 = vpop.f32.mrb[64].mxu1 }
 0x963   : > { %v2875_v44 = vpop.f32.mrb[65].mxu1 }
 0x964   : > { %v4674_v50 = vpop.f32.mrb[66].mxu1 }
 0x965   : > { %v2897_v22 = vpack.c.bf16 %v4674_v50, %v4673_v15  ;;  %v2878_v35 = vpop.f32.mrb[67].mxu1 }
 0x966   : > { %v2896_v51 = vpack.c.bf16 %v2878_v35, %v2875_v44 }
 0x968   : > { %4691 = vmatprep.mubr.msk.bf16.mxu0 %vm331_vm0, %v2896_v51 }
 0x969   : > { %4692 = vmatmul.mubr.msk.bf16.gmra.mrb[44].mxu0 %vm331_vm0, %v2897_v22 }
 0x96a   : > { %4715 = vmatprep.mubr.msk.bf16.mxu0 %vm331_vm0, %v3226_v19 }
 0x971   : > { %4716 = vmatmul.mubr.msk.bf16.vlgmr.msra.gmra.mrb[56].mxu0 %vm331_vm0, %v3228_v27 }
 0x972   : > { %v4701_v56 = vpop.f32.mrb[68].mxu1 }
 0x973   : > { %v6477_v38 = vadd.f32 %v6158_v8, %v4701_v56  ;;  %v3115_v43 = vpop.f32.mrb[69].mxu1 }
 0x974   : > { %v3116_v2 = vadd.f32 %v6166_v57, %v3115_v43  ;;  %v4702_v0 = vpop.f32.mrb[70].mxu1 }
 0x975   : > { %v3118_v54 = vpop.f32.mrb[71].mxu1  ;;  %v3385_v46 = vsel %vm331_vm0, %v6477_v38, -inf  ;;  %v3127_v11 = vadd.f32 %v6186_v63, %v4702_v0 }
 0x976   : > { %v3119_v41 = vadd.f32 %v6176_v62, %v3118_v54  ;;  %3386 = vmax.xlane.f32.xlu0 %v3385_v46  ;;  %v3379_v19 = vsel %vm331_vm0, %v3116_v2, -inf }
 0x977   : > { %v3388_v55 = vsel %vm331_vm0, %v3127_v11, -inf }
 0x978   : > { %v3382_v28 = vsel %vm331_vm0, %v3119_v41, -inf }
 0x979   : > { %3383 = vmax.xlane.f32.xlu1 %v3382_v28 }
 0x97a   : > { %3380 = vmax.xlane.f32.xlu0 %v3379_v19 }
 0x97e   : > { %3389 = vmax.xlane.f32.xlu0 %v3388_v55 }
 0x982   : > { %v4709_v23 = vpop.f32.mrb[72].mxu1 }
 0x983   : > { %v6488_v59 = vadd.f32 %v6158_v8, %v4709_v23  ;;  %v3198_v61 = vpop.f32.mrb[73].mxu1 }
 0x984   : > { %v6491_v17 = vadd.f32 %v6166_v57, %v3198_v61  ;;  %v4710_v4 = vpop.f32.mrb[74].mxu1 }
 0x985   : > { %v3210_v26 = vadd.f32 %v6186_v63, %v4710_v4  ;;  %v3397_v6 = vsel %vm331_vm0, %v6488_v59, -inf  ;;  %v3201_v37 = vpop.f32.mrb[75].mxu1 }
 0x986   : > { %3398 = vmax.xlane.f32.xlu0 %v3397_v6  ;;  %v3202_v27 = vadd.f32 %v6176_v62, %v3201_v37  ;;  %v3391_v36 = vsel %vm331_vm0, %v6491_v17, -inf }
 0x987   : > { %v3400_v10 = vsel %vm331_vm0, %v3210_v26, -inf }
 0x988   : > { %3401 = vmax.xlane.f32.xlu1 %v3400_v10  ;;  %v3394_v5 = vsel %vm331_vm0, %v3202_v27, -inf }
 0x98a   : > { %3392 = vmax.xlane.f32.xlu0 %v3391_v36 }
 0x98c   : > { %3395 = vmax.xlane.f32.xlu1 %v3394_v5 }
 0x992   : > { %v4725_v24 = vpop.f32.mrb[76].mxu1 }
 0x993   : > { %v3364_v29 = vpop.f32.mrb[77].mxu1 }
 0x994   : > { %v3365_v14 = vadd.f32 %v6166_v57, %v3364_v29  ;;  %v4726_v49 = vpop.f32.mrb[78].mxu1 }
 0x995   : > { %v3367_v33 = vpop.f32.mrb[79].mxu1  ;;  %v6503_v32 = vadd.f32 %v6186_v63, %v4726_v49 }
 0x996   : > { %v6506_v42 = vadd.f32 %v6176_v62, %v3367_v33  ;;  %v3415_v40 = vsel %vm331_vm0, %v3365_v14, -inf }
 0x997   : > { %3416 = vmax.xlane.f32.xlu0 %v3415_v40  ;;  %v3424_v7 = vsel %vm331_vm0, %v6503_v32, -inf }
 0x998   : > { %v3418_v1 = vsel %vm331_vm0, %v6506_v42, -inf }
 0x999   : > { %3419 = vmax.xlane.f32.xlu1 %v3418_v1 }
 0x99d   : > { %3425 = vmax.xlane.f32.xlu1 %v3424_v7 }
 0xa03   : > { %v3387_v34 = vpop.xlane.xlu0 %3386 }
 0xa04   : > { %v3429_v0 = vsub.f32 %v6477_v38, %v3387_v34 }
 0xa06   : > { %v3384_v12 = vpop.xlane.xlu1 %3383  ;;  %v3447_v61 = vmul.f32 1.442695, %v3429_v0 }
 0xa07   : > { %v3428_v16 = vsub.f32 %v3119_v41, %v3384_v12  ;;  %v3381_v45 = vpop.xlane.xlu0 %3380 }
 0xa08   : > { %v3427_v35 = vsub.f32 %v3116_v2, %v3381_v45 }
 0xa09   : > { %v3445_v9 = vmul.f32 1.442695, %v3428_v16 }
 0xa0a   : > { %v3443_v54 = vmul.f32 1.442695, %v3427_v35 }
 0xa0b   : > { %5091 = vpow2.f32 %v3445_v9  ;;  %v3390_v20 = vpop.xlane.xlu0 %3389 }
 0xa0c   : > { %v3430_v50 = vsub.f32 %v3127_v11, %v3390_v20 }
 0xa0e   : > { %v3449_v51 = vmul.f32 1.442695, %v3430_v50 }
 0xa10   : > { %5093 = vpow2.f32 %v3449_v51 }
 0xa11   : > { %5095 = vpow2.f32 %v3443_v54 }
 0xa13   : > { %v3399_v44 = vpop.xlane.xlu0 %3398 }
 0xa15   : > { %v6513_v31 = vpop.eup %5091  ;;  %v3402_v15 = vpop.xlane.xlu1 %3401 }
 0xa16   : > { %v3478_v58 = vsel %vm331_vm0, %v6513_v31, 0.0  ;;  %v3434_v46 = vsub.f32 %v3210_v26, %v3402_v15 }
 0xa17   : > { %3479 = vadd.xlane.f32.xlu1 %v3478_v58  ;;  %v3393_v43 = vpop.xlane.xlu0 %3392 }
 0xa18   : > { %v3431_v11 = vsub.f32 %v6491_v17, %v3393_v43  ;;  %v3457_v37 = vmul.f32 1.442695, %v3434_v46  ;;  %v5184_v43 = vld [vmem:[%s5242_s24 + $0x8] ss:$12 sps:$4 sm:$0xff]  }
 0xa19   : > { %v3396_v22 = vpop.xlane.xlu1 %3395 }
 0xa1a   : > { %v3432_v56 = vsub.f32 %v3202_v27, %v3396_v22  ;;  %v3451_v10 = vmul.f32 1.442695, %v3431_v11  ;;  %v6546_v49 = vpop.eup %5093 }
 0xa1b   : > { %v6550_v40 = vpop.eup %5095 }
 0xa1c   : > { %v3453_v41 = vmul.f32 1.442695, %v3432_v56  ;;  %v3475_v12 = vsel %vm331_vm0, %v6550_v40, 0.0 }
 0xa1e   : > { %5097 = vpow2.f32 %v3453_v41 }
 0xa1f   : > { %5099 = vpow2.f32 %v3447_v61 }
 0xa20   : > { %5101 = vpow2.f32 %v3457_v37 }
 0xa21   : > { %5103 = vpow2.f32 %v3451_v10 }
 0xa24   : > { %v3417_v28 = vpop.xlane.xlu0 %3416 }
 0xa26   : > { %v3420_v5 = vpop.xlane.xlu1 %3419 }
 0xa28   : > { %v6554_v7 = vpop.eup %5097 }
 0xa29   : > { %v6558_v16 = vpop.eup %5099  ;;  %v3490_v9 = vsel %vm331_vm0, %v6554_v7, 0.0 }
 0xa2a   : > { %v6562_v58 = vpop.eup %5101  ;;  %v3481_v34 = vsel %vm331_vm0, %v6558_v16, 0.0  ;;  %v3426_v41 = vpop.xlane.xlu1 %3425 }
 0xa2b   : > { %v6566_v45 = vpop.eup %5103  ;;  %v3496_v20 = vsel %vm331_vm0, %v6562_v58, 0.0 }
 0xa44   : > { %v4717_v19 = vpop.f32.mrb[56].mxu0 }
 0xa45   : > { %v6519_v55 = vadd.f32 %v6158_v8, %v4717_v19  ;;  %v3281_v23 = vpop.f32.mrb[57].mxu0  ;;  %v3439_v8 = vsub.f32 %v3365_v14, %v3417_v28 }
 0xa46   : > { %v4718_v2 = vpop.f32.mrb[58].mxu0  ;;  %v6523_v4 = vadd.f32 %v6166_v57, %v3281_v23  ;;  %v3433_v57 = vsub.f32 %v6488_v59, %v3399_v44  ;;  %v3487_v44 = vsel %vm331_vm0, %v6566_v45, 0.0  ;;  %v3442_v23 = vsub.f32 %v6503_v32, %v3426_v41 }
 0xa47   : > { %v6526_v38 = vadd.f32 %v6186_v63, %v4718_v2  ;;  %v3284_v6 = vpop.f32.mrb[59].mxu0  ;;  %v3409_v26 = vsel %vm331_vm0, %v6519_v55, -inf  ;;  %v5183_v63 = vld [vmem:[%s6753_s2 + $0x10] sm:$0xff]  ;;  %v3467_v14 = vmul.f32 1.442695, %v3439_v8 }
 0xa48   : > { %3410 = vmax.xlane.f32.xlu0 %v3409_v26  ;;  %v6531_v27 = vadd.f32 %v6176_v62, %v3284_v6  ;;  %v6539_v36 = vadd.f32 %v5183_v63, %v4725_v24  ;;  %v3403_v29 = vsel %vm331_vm0, %v6523_v4, -inf  ;;  %v3440_v62 = vsub.f32 %v6506_v42, %v3420_v5 }
 0xa49   : > { %v3412_v17 = vsel %vm331_vm0, %v6526_v38, -inf  ;;  %v3455_v33 = vmul.f32 1.442695, %v3433_v57  ;;  %5105 = vpow2.f32 %v3467_v14  ;;  %v3484_v42 = vsel %vm331_vm0, %v6546_v49, 0.0 }
 0xa4a   : > { %3413 = vmax.xlane.f32.xlu1 %v3412_v17  ;;  %v3406_v59 = vsel %vm331_vm0, %v6531_v27, -inf  ;;  %v3421_v24 = vsel %vm331_vm0, %v6539_v36, -inf  ;;  %v3469_v1 = vmul.f32 1.442695, %v3440_v62  ;;  %v3473_v2 = vmul.f32 1.442695, %v3442_v23 }
 0xa4b   : > { %5107 = vpow2.f32 %v3455_v33 }
 0xa4c   : > { %3404 = vmax.xlane.f32.xlu0 %v3403_v29  ;;  %5109 = vpow2.f32 %v3469_v1 }
 0xa4e   : > { %3407 = vmax.xlane.f32.xlu1 %v3406_v59 }
 0xa50   : > { %3422 = vmax.xlane.f32.xlu0 %v3421_v24 }
 0xa52   : > { %3485 = vadd.xlane.f32.xlu1 %v3484_v42 }
 0xa53   : > { %v6570_v15 = vpop.eup %5105 }
 0xa54   : > { %3476 = vadd.xlane.f32.xlu0 %v3475_v12  ;;  %v3511_v22 = vsel %vm331_vm0, %v6570_v15, 0.0 }
 0xa55   : > { %v6574_v50 = vpop.eup %5107 }
 0xa56   : > { %3491 = vadd.xlane.f32.xlu1 %v3490_v9  ;;  %v6578_v35 = vpop.eup %5109  ;;  %v3493_v51 = vsel %vm331_vm0, %v6574_v50, 0.0 }
 0xa57   : > { %v3514_v56 = vsel %vm331_vm0, %v6578_v35, 0.0 }
 0xa58   : > { %3482 = vadd.xlane.f32.xlu0 %v3481_v34 }
 0xa5a   : > { %3497 = vadd.xlane.f32.xlu1 %v3496_v20 }
 0xa5c   : > { %3488 = vadd.xlane.f32.xlu0 %v3487_v44 }
 0xa5e   : > { %3512 = vadd.xlane.f32.xlu1 %v3511_v22 }
 0xa60   : > { %3494 = vadd.xlane.f32.xlu0 %v3493_v51 }
 0xa62   : > { %3515 = vadd.xlane.f32.xlu1 %v3514_v56 }
 0xa76   : > { %3563 = vrot.lane.b32.xlu0 %v5184_v43, %s5197_s29 }
 0xa7a   : > { %3624 = vrot.lane.b32.xlu0 %v6258_v18, %s5197_s29 }
 0xa7e   : > { %3626 = vrot.lane.b32.xlu0 %v6263_v39, %s5197_s29 }
 0xa82   : > { %3685 = vrot.lane.b32.xlu0 %v6268_v53, %s5197_s29 }
 0xaa4   : > { %v3480_v18 = vpop.xlane.xlu1 %3479 }
 0xad5   : > { %v3411_v0 = vpop.xlane.xlu0 %3410 }
 0xad6   : > { %v3437_v54 = vsub.f32 %v6519_v55, %v3411_v0 }
 0xad7   : > { %v3414_v12 = vpop.xlane.xlu1 %3413 }
 0xad8   : > { %v3463_v46 = vmul.f32 1.442695, %v3437_v54  ;;  %v3438_v9 = vsub.f32 %v6526_v38, %v3414_v12 }
 0xad9   : > { %v3405_v19 = vpop.xlane.xlu0 %3404 }
 0xada   : > { %5111 = vpow2.f32 %v3463_v46  ;;  %v3435_v28 = vsub.f32 %v6523_v4, %v3405_v19  ;;  %v3465_v20 = vmul.f32 1.442695, %v3438_v9 }
 0xadb   : > { %v3408_v34 = vpop.xlane.xlu1 %3407 }
 0xadc   : > { %v3459_v61 = vmul.f32 1.442695, %v3435_v28  ;;  %v3436_v44 = vsub.f32 %v6531_v27, %v3408_v34 }
 0xadd   : > { %v3423_v11 = vpop.xlane.xlu0 %3422 }
 0xade   : > { %5113 = vpow2.f32 %v3459_v61  ;;  %v3441_v39 = vsub.f32 %v6539_v36, %v3423_v11  ;;  %v3461_v22 = vmul.f32 1.442695, %v3436_v44 }
 0xadf   : > { %5115 = vrcp.f32 %v3480_v18  ;;  %v3486_v38 = vpop.xlane.xlu1 %3485 }
 0xae0   : > { %v3471_v6 = vmul.f32 1.442695, %v3441_v39 }
 0xae1   : > { %v3477_v53 = vpop.xlane.xlu0 %3476 }
 0xae2   : > { %5117 = vpow2.f32 %v3471_v6 }
 0xae3   : > { %5119 = vrcp.f32 %v3477_v53  ;;  %v3492_v27 = vpop.xlane.xlu1 %3491 }
 0xae4   : > { %v6596_v55 = vpop.eup %5111  ;;  %5121 = vpow2.f32 %v3473_v2 }
 0xae5   : > { %v3483_v26 = vpop.xlane.xlu0 %3482  ;;  %v3505_v4 = vsel %vm331_vm0, %v6596_v55, 0.0  ;;  %5123 = vpow2.f32 %v3465_v20 }
 0xae6   : > { %3506 = vadd.xlane.f32.xlu0 %v3505_v4  ;;  %5125 = vpow2.f32 %v3461_v22 }
 0xae7   : > { %v3498_v0 = vpop.xlane.xlu1 %3497  ;;  %5127 = vrcp.f32 %v3483_v26 }
 0xae8   : > { %v6600_v32 = vpop.eup %5113 }
 0xae9   : > { %v3489_v37 = vpop.xlane.xlu0 %3488  ;;  %v3499_v8 = vsel %vm331_vm0, %v6600_v32, 0.0  ;;  %v5116_v17 = vpop.eup %5115 }
 0xaea   : > { %3500 = vadd.xlane.f32.xlu0 %v3499_v8  ;;  %v3540_v62 = vmul.f32 %v5116_v17, %v6513_v31  ;;  %v5185_v31 = vld [vmem:[%s5242_s24 + $0x20] ss:$12 sps:$4 sm:$0xff]   ;;  %5129 = vrcp.f32 %v3489_v37 }
 0xaeb   : > { %v3513_v54 = vpop.xlane.xlu1 %3512  ;;  %5131 = vrcp.f32 %v3486_v38 }
 0xaec   : > { %v6604_v57 = vpop.eup %5117  ;;  %5133 = vrcp.f32 %v3492_v27 }
 0xaed   : > { %v5120_v10 = vpop.eup %5119  ;;  %v3495_v63 = vpop.xlane.xlu0 %3494  ;;  %v3517_v36 = vsel %vm331_vm0, %v6604_v57, 0.0 }
 0xaee   : > { %v6608_v5 = vpop.eup %5121  ;;  %3518 = vadd.xlane.f32.xlu1 %v3517_v36  ;;  %v3539_v29 = vmul.f32 %v5120_v10, %v6550_v40  ;;  %v5186_v40 = vld [vmem:[%s5242_s24 + $0x80] ss:$12 sps:$4 sm:$0xff]   ;;  %5135 = vrcp.f32 %v3495_v63 }
 0xaef   : > { %v3520_v59 = vsel %vm331_vm0, %v6608_v5, 0.0  ;;  %v6625_v51 = vpop.eup %5123  ;;  %v3516_v46 = vpop.xlane.xlu1 %3515 }
 0xaf0   : > { %v3555_v14 = vpack.c.bf16 %v3540_v62, %v3539_v29  ;;  %v6629_v56 = vpop.eup %5125  ;;  %5137 = vrcp.f32 %v3516_v46 }
 0xaf1   : > { %v3564_v33 = vpop.permute.xlu0 %3563  ;;  %v3502_v43 = vsel %vm331_vm0, %v6629_v56, 0.0  ;;  %v5128_v19 = vpop.eup %5127  ;;  %5139 = vrcp.f32 %v3498_v0 }
 0xaf2   : > { %4731 = vmatprep.mubr.msk.bf16.mxu0 %vm331_vm0, %v3555_v14  ;;  %3521 = vadd.xlane.f32.xlu1 %v3520_v59  ;;  %5141 = vrcp.f32 %v3513_v54  ;;  %v3541_v18 = vmul.f32 %v5128_v19, %v6558_v16 }
 0xaf3   : > { %4727 = vmatprep.subr.bf16.mxu0 %v3564_v33 }
 0xaf4   : > { %4728 = vmatpush3.bf16.msra.mxu0 %v3564_v33  ;;  %v5130_v23 = vpop.eup %5129  ;;  %v4897_v33 = vld [vmem:[%s6754_s3 + $0x30] sm:$0xff]  }
 0xaf5   : > { %v3625_v24 = vpop.permute.xlu0 %3624  ;;  %v5132_v61 = vpop.eup %5131  ;;  %v3543_v2 = vmul.f32 %v5130_v23, %v6566_v45 }
 0xaf6   : > { %v3542_v6 = vmul.f32 %v5132_v61, %v6546_v49 }
 0xaf8   : > { %v3556_v26 = vpack.c.bf16 %v3542_v6, %v3541_v18 }
 0xaf9   : > { %v6615_v1 = vpop.permute.xlu0 %3626 }
 0xafd   : > { %v3686_v42 = vpop.permute.xlu0 %3685 }
 0xafe   : > { %4743 = vmatprep.subr.bf16.mxu1 %v3686_v42 }
 0xaff   : > { %4744 = vmatpush3.bf16.msra.mxu1 %v3686_v42 }
 0xb00   : > { %3746 = vrot.lane.b32.xlu0 %v6354_v48, %s5197_s29  ;;  %v3508_v48 = vsel %vm331_vm0, %v6625_v51, 0.0 }
 0xb03   : > { %3565 = vrot.lane.b32.xlu1 %v5185_v31, %s5197_s29 }
 0xb07   : > { %3687 = vrot.lane.b32.xlu1 %v5186_v40, %s5197_s29 }
 0xb2b   : > { %3509 = vadd.xlane.f32.xlu1 %v3508_v48  ;;  %v4898_v48 = vld [vmem:[%s6754_s3 + $0x38] sm:$0xff]  }
 0xb2f   : > { %3503 = vadd.xlane.f32.xlu1 %v3502_v43 }
 0xb40   : > { %3748 = vrot.lane.b32.xlu1 %v6369_v30, %s5197_s29  ;;  %v5134_v30 = vpop.eup %5133 }
 0xb41   : > { %v3544_v53 = vmul.f32 %v5134_v30, %v6554_v7  ;;  %v5136_v4 = vpop.eup %5135 }
 0xb42   : > { %v5138_v10 = vpop.eup %5137  ;;  %v3545_v49 = vmul.f32 %v5136_v4, %v6574_v50 }
 0xb43   : > { %v3557_v17 = vpack.c.bf16 %v3544_v53, %v3543_v2  ;;  %v5140_v16 = vpop.eup %5139  ;;  %v3552_v7 = vmul.f32 %v5138_v10, %v6578_v35 }
 0xb44   : > { %v5142_v45 = vpop.eup %5141  ;;  %v3546_v36 = vmul.f32 %v5140_v16, %v6562_v58 }
 0xb45   : > { %v3551_v29 = vmul.f32 %v5142_v45, %v6570_v15  ;;  %v3987_v45 = vld [vmem:[%s6676_s17] sm:$0xff] }
 0xb46   : > { %v3558_v62 = vpack.c.bf16 %v3546_v36, %v3545_v49 }
 0xb47   : > { %v3561_v14 = vpack.c.bf16 %v3552_v7, %v3551_v29 }
 0xb73   : > { %v3507_v11 = vpop.xlane.xlu0 %3506 }
 0xb77   : > { %v3501_v37 = vpop.xlane.xlu0 %3500 }
 0xb7b   : > { %v3519_v41 = vpop.xlane.xlu1 %3518  ;;  %v3747_v63 = vpop.permute.xlu0 %3746 }
 0xb7f   : > { %v3522_v28 = vpop.xlane.xlu1 %3521 }
 0xb80   : > { %5143 = vrcp.f32 %v3522_v28 }
 0xb81   : > { %5145 = vrcp.f32 %v3519_v41 }
 0xb83   : > { %v3566_v39 = vpop.permute.xlu1 %3565 }
 0xb84   : > { %4729 = vmatprep.subr.bf16.mxu0 %v3566_v39 }
 0xb85   : > { %4730 = vmatpush3.bf16.msra.mxu0 %v3566_v39 }
 0xb86   : > { %4735 = vmatprep.subr.bf16.mxu0 %v3625_v24 }
 0xb87   : > { %v3688_v8 = vpop.permute.xlu1 %3687 }
 0xb88   : > { %4732 = vmatmul.mubr.msk.bf16.vlgmr.msra.gmra.mrb[60].mxu0 %vm331_vm0, %v3556_v26  ;;  %4745 = vmatprep.subr.bf16.mxu1 %v3688_v8 }
 0xb89   : > { %4736 = vmatpush3.bf16.msra.mxu0 %v3625_v24  ;;  %4739 = vmatprep.mubr.msk.bf16.mxu0 %vm331_vm0, %v3557_v17  ;;  %v3989_v17 = vld [vmem:[%s6676_s17 + $0x10] sm:$0xff] }
 0xb8a   : > { %4746 = vmatpush3.bf16.msra.mxu1 %v3688_v8  ;;  %4737 = vmatprep.subr.bf16.mxu0 %v6615_v1  ;;  %v5144_v35 = vpop.eup %5143 }
 0xb8b   : > { %v5146_v59 = vpop.eup %5145  ;;  %v3554_v15 = vmul.f32 %v5144_v35, %v6608_v5 }
 0xb8d   : > { %4738 = vmatpush3.bf16.msra.mxu0 %v6615_v1  ;;  %v3553_v1 = vmul.f32 %v5146_v59, %v6604_v57 }
 0xb8e   : > { %4751 = vmatprep.subr.bf16.mxu0 %v3747_v63 }
 0xb8f   : > { %v3562_v42 = vpack.c.bf16 %v3554_v15, %v3553_v1  ;;  %v3993_v1 = vld [vmem:[%s6676_s17 + $0x30] sm:$0xff] }
 0xb90   : > { %4740 = vmatmul.mubr.msk.bf16.vlgmr.msra.gmra.mrb[64].mxu0 %vm331_vm0, %v3558_v62 }
 0xb91   : > { %4755 = vmatprep.mubr.msk.bf16.mxu0 %vm331_vm0, %v3561_v14  ;;  %4752 = vmatpush3.bf16.msra.mxu0 %v3747_v63  ;;  %v3990_v63 = vld [vmem:[%s6676_s17 + $0x18] sm:$0xff]  ;;  %v3988_v14 = vld [vmem:[%s6676_s17 + $0x8] sm:$0xff] }
 0xbb8   : > { %v3510_v50 = vpop.xlane.xlu1 %3509 }
 0xbb9   : > { %5147 = vrcp.f32 %v3510_v50 }
 0xbba   : > { %5149 = vrcp.f32 %v3501_v37  ;;  %v6681_v37 = vld [vmem:[%s6755_s4] ss:$0 sm:$0xff] }
 0xbbb   : > { %5151 = vrcp.f32 %v3507_v11 }
 0xbbc   : > { %v3504_v58 = vpop.xlane.xlu1 %3503 }
 0xbbd   : > { %5153 = vrcp.f32 %v3504_v58 }
 0xbc0   : > { %v3749_v24 = vpop.permute.xlu1 %3748 }
 0xbc1   : > { %4753 = vmatprep.subr.bf16.mxu0 %v3749_v24 }
 0xbc2   : > { %4754 = vmatpush3.bf16.msra.mxu0 %v3749_v24 }
 0xbc3   : > { %4759 = vmatprep.subr.bf16.mxu0 %v4897_v33  ;;  %v5148_v31 = vpop.eup %5147 }
 0xbc4   : > { %v5150_v40 = vpop.eup %5149  ;;  %v3550_v5 = vmul.f32 %v5148_v31, %v6625_v51 }
 0xbc5   : > { %4756 = vmatmul.mubr.msk.bf16.vlgmr.msra.gmra.mrb[68].mxu0 %vm331_vm0, %v3562_v42  ;;  %v5152_v12 = vpop.eup %5151  ;;  %v3547_v34 = vmul.f32 %v5150_v40, %v6600_v32 }
 0xbc6   : > { %4760 = vmatpush3.bf16.msra.mxu0 %v4897_v33  ;;  %v3549_v44 = vmul.f32 %v5152_v12, %v6596_v55  ;;  %v3991_v12 = vld [vmem:[%s6676_s17 + $0x20] sm:$0xff] }
 0xbc7   : > { %v5154_v9 = vpop.eup %5153  ;;  %4761 = vmatprep.subr.bf16.mxu0 %v4898_v48 }
 0xbc8   : > { %v3548_v20 = vmul.f32 %v5154_v9, %v6629_v56  ;;  %v3560_v22 = vpack.c.bf16 %v3550_v5, %v3549_v44 }
 0xbca   : > { %v3559_v57 = vpack.c.bf16 %v3548_v20, %v3547_v34  ;;  %4762 = vmatpush3.bf16.msra.mxu0 %v4898_v48  ;;  %v3994_v20 = vld [vmem:[%s6676_s17 + $0x38] sm:$0xff] }
 0xbcc   : > { %4747 = vmatprep.mubr.msk.bf16.mxu1 %vm331_vm0, %v3559_v57 }
 0xbcd   : > { %4748 = vmatmul.mubr.msk.bf16.vlgmr.msra.gmra.mrb[80].mxu1 %vm331_vm0, %v3560_v22 }
 0xc5b   : > { %v4733_v43 = vpop.f32.mrb[60].mxu0 }
 0xc5c   : > { %v3609_v51 = vpop.f32.mrb[61].mxu0 }
 0xc5d   : > { %v4734_v38 = vpop.f32.mrb[62].mxu0 }
 0xc5e   : > { %v3808_v32 = vpack.c.bf16 %v4734_v38, %v4733_v43  ;;  %v3612_v27 = vpop.f32.mrb[63].mxu0 }
 0xc5f   : > { %v3807_v56 = vpack.c.bf16 %v3612_v27, %v3609_v51 }
 0xc61   : > { %4763 = vmatprep.mubr.msk.bf16.mxu0 %vm331_vm0, %v3807_v56 }
 0xc62   : > { %4764 = vmatmul.mubr.msk.bf16.vlgmr.msra.gmra.mrb[32].mxu0 %vm331_vm0, %v3808_v32  ;;  %v3997_v32 = vld [vmem:[%s6676_s17 + $0x50] sm:$0xff] }
 0xc63   : > { %v4741_v55 = vpop.f32.mrb[64].mxu0 }
 0xc64   : > { %v3670_v0 = vpop.f32.mrb[65].mxu0 }
 0xc65   : > { %v4742_v54 = vpop.f32.mrb[66].mxu0 }
 0xc66   : > { %v3810_v46 = vpack.c.bf16 %v4742_v54, %v4741_v55  ;;  %v3673_v41 = vpop.f32.mrb[67].mxu0 }
 0xc67   : > { %v3809_v19 = vpack.c.bf16 %v3673_v41, %v3670_v0  ;;  %v3995_v0 = vld [vmem:[%s6676_s17 + $0x40] sm:$0xff] }
 0xc69   : > { %4767 = vmatprep.mubr.msk.bf16.mxu0 %vm331_vm0, %v3809_v19  ;;  %v3998_v19 = vld [vmem:[%s6676_s17 + $0x58] sm:$0xff] }
 0xc6a   : > { %4768 = vmatmul.mubr.msk.bf16.gmra.mrb[36].mxu0 %vm331_vm0, %v3810_v46 }
 0xc98   : > { %v4757_v28 = vpop.f32.mrb[68].mxu0 }
 0xc99   : > { %v3792_v23 = vpop.f32.mrb[69].mxu0 }
 0xc9a   : > { %v4758_v61 = vpop.f32.mrb[70].mxu0 }
 0xc9b   : > { %v3814_v11 = vpack.c.bf16 %v4758_v61, %v4757_v28  ;;  %v3795_v30 = vpop.f32.mrb[71].mxu0  ;;  %v6779_v28 = vld [vmem:[#allocation5_spill] sm:$0xff] }
 0xc9c   : > { %v3813_v18 = vpack.c.bf16 %v3795_v30, %v3792_v23 }
 0xca0   : > { %v4749_v39 = vpop.f32.mrb[80].mxu1 }
 0xca1   : > { %v3731_v2 = vpop.f32.mrb[81].mxu1 }
 0xca2   : > { %v4750_v6 = vpop.f32.mrb[82].mxu1 }
 0xca3   : > { %v3812_v53 = vpack.c.bf16 %v4750_v6, %v4749_v39  ;;  %v3734_v26 = vpop.f32.mrb[83].mxu1 }
 0xca4   : > { %v3811_v4 = vpack.c.bf16 %v3734_v26, %v3731_v2  ;;  %v6780_v2 = vld [vmem:[#allocation6_spill] sm:$0xff]  ;;  %v4001_v26 = vld [vmem:[%s6676_s17 + $0x70] sm:$0xff] }
 0xca6   : > { %4771 = vmatprep.mubr.msk.bf16.mxu0 %vm331_vm0, %v3811_v4  ;;  %v6781_v4 = vld [vmem:[#allocation7_spill] sm:$0xff] }
 0xca7   : > { %4772 = vmatmul.mubr.msk.bf16.gmra.mrb[40].mxu0 %vm331_vm0, %v3812_v53 }
 0xca8   : > { %4775 = vmatprep.mubr.msk.bf16.mxu0 %vm331_vm0, %v3813_v18 }
 0xcaf   : > { %4776 = vmatmul.mubr.msk.bf16.gmra.mrb[44].mxu0 %vm331_vm0, %v3814_v11 }
 0xd35   : > { %v4765_v8 = vpop.f32.mrb[32].mxu0 }
 0xd36   : > { %v3973_v10 = vadd.f32 %v4765_v8, %v6681_v37  ;;  %v3885_v16 = vpop.f32.mrb[33].mxu0 }
 0xd37   : > { %v3971_v49 = vadd.f32 %v6681_v37, %v3885_v16  ;;  %v4766_v7 = vpop.f32.mrb[34].mxu0  ;;  %v3999_v16 = vld [vmem:[%s6676_s17 + $0x60] sm:$0xff] }
 0xd38   : > { %v4005_v36 = vadd.f32 %v3989_v17, %v3973_v10  ;;  %v3974_v29 = vadd.f32 %v4766_v7, %v6681_v37  ;;  %v3888_v62 = vpop.f32.mrb[35].mxu0 }
 0xd39   : > { %v4003_v50 = vadd.f32 %v3987_v45, %v3971_v49  ;;  %v3972_v35 = vadd.f32 %v6681_v37, %v3888_v62  ;;  %v6782_v45 = vld [vmem:[#allocation8_spill] sm:$0xff] }
 0xd3a   : > { %4021 = vst [vmem:[%s6689_s23 + $0x10] sm:$0xff] %v4005_v36  ;;  %v4006_v58 = vadd.f32 %v3990_v63, %v3974_v29  ;;  %v4002_v36 = vld [vmem:[%s6676_s17 + $0x78] sm:$0xff] }
 0xd3b   : > { %4019 = vst [vmem:[%s6689_s23] sm:$0xff] %v4003_v50  ;;  %v4004_v59 = vadd.f32 %v3988_v14, %v3972_v35  ;;  %v6783_v29 = vld [vmem:[#allocation9_spill] sm:$0xff]  ;;  %v4000_v35 = vld [vmem:[%s6676_s17 + $0x68] sm:$0xff] }
 0xd3c   : > { %4022 = vst [vmem:[%s6689_s23 + $0x18] sm:$0xff] %v4006_v58 }
 0xd3d   : > { %4020 = vst [vmem:[%s6689_s23 + $0x8] sm:$0xff] %v4004_v59  ;;  %v4769_v15 = vpop.f32.mrb[36].mxu0 }
 0xd3e   : > { %v4783_v33 = vadd.f32 %v4769_v15, %v6131_v3  ;;  %v3901_v24 = vpop.f32.mrb[37].mxu0 }
 0xd3f   : > { %v4784_v42 = vadd.f32 %v3901_v24, %v6133_v52  ;;  %v4770_v31 = vpop.f32.mrb[38].mxu0  ;;  %v3992_v52 = vld [vmem:[%s6676_s17 + $0x28] sm:$0xff] }
 0xd40   : > { %v3977_v40 = vadd.f32 %v4783_v33, %v6681_v37  ;;  %v4785_v9 = vadd.f32 %v4770_v31, %v6135_v21  ;;  %v3904_v5 = vpop.f32.mrb[39].mxu0 }
 0xd41   : > { %v3975_v34 = vadd.f32 %v4784_v42, %v6681_v37  ;;  %v4786_v3 = vadd.f32 %v3904_v5, %v6137_v25 }
 0xd42   : > { %v4009_v44 = vadd.f32 %v3993_v1, %v3977_v40  ;;  %v3978_v57 = vadd.f32 %v4785_v9, %v6681_v37 }
 0xd43   : > { %v4007_v22 = vadd.f32 %v3991_v12, %v3975_v34  ;;  %v3976_v48 = vadd.f32 %v4786_v3, %v6681_v37 }
 0xd44   : > { %4025 = vst [vmem:[%s6689_s23 + $0x30] sm:$0xff] %v4009_v44  ;;  %v4010_v43 = vadd.f32 %v3994_v20, %v3978_v57 }
 0xd45   : > { %4023 = vst [vmem:[%s6689_s23 + $0x20] sm:$0xff] %v4007_v22  ;;  %v4008_v21 = vadd.f32 %v3992_v52, %v3976_v48 }
 0xd46   : > { %4026 = vst [vmem:[%s6689_s23 + $0x38] sm:$0xff] %v4010_v43 }
 0xd47   : > { %4024 = vst [vmem:[%s6689_s23 + $0x28] sm:$0xff] %v4008_v21 }
 0xd7a   : > { %v4773_v51 = vpop.f32.mrb[40].mxu0 }
 0xd7b   : > { %v4787_v38 = vadd.f32 %v4773_v51, %v6139_v47  ;;  %v3917_v25 = vpop.f32.mrb[41].mxu0 }
 0xd7c   : > { %v4788_v27 = vadd.f32 %v3917_v25, %v6141_v13  ;;  %v4774_v56 = vpop.f32.mrb[42].mxu0  ;;  %v3996_v13 = vld [vmem:[%s6676_s17 + $0x48] sm:$0xff] }
 0xd7d   : > { %v3981_v55 = vadd.f32 %v4787_v38, %v6681_v37  ;;  %v4789_v54 = vadd.f32 %v4774_v56, %v6143_v60  ;;  %v3920_v46 = vpop.f32.mrb[43].mxu0 }
 0xd7e   : > { %v3979_v41 = vadd.f32 %v4788_v27, %v6681_v37  ;;  %v4790_v47 = vadd.f32 %v3920_v46, %v6779_v28 }
 0xd7f   : > { %v4013_v23 = vadd.f32 %v3997_v32, %v3981_v55  ;;  %v3982_v61 = vadd.f32 %v4789_v54, %v6681_v37 }
 0xd80   : > { %v4011_v11 = vadd.f32 %v3995_v0, %v3979_v41  ;;  %v3980_v30 = vadd.f32 %v4790_v47, %v6681_v37 }
 0xd81   : > { %4029 = vst [vmem:[%s6689_s23 + $0x50] sm:$0xff] %v4013_v23  ;;  %v4014_v18 = vadd.f32 %v3998_v19, %v3982_v61 }
 0xd82   : > { %4027 = vst [vmem:[%s6689_s23 + $0x40] sm:$0xff] %v4011_v11  ;;  %v4012_v60 = vadd.f32 %v3996_v13, %v3980_v30  ;;  %v4777_v39 = vpop.f32.mrb[44].mxu0 }
 0xd83   : > { %4030 = vst [vmem:[%s6689_s23 + $0x58] sm:$0xff] %v4014_v18  ;;  %v4791_v6 = vadd.f32 %v4777_v39, %v6780_v2  ;;  %v3933_v53 = vpop.f32.mrb[45].mxu0 }
 0xd84   : > { %4028 = vst [vmem:[%s6689_s23 + $0x48] sm:$0xff] %v4012_v60  ;;  %v4792_v8 = vadd.f32 %v3933_v53, %v6781_v4  ;;  %v4778_v17 = vpop.f32.mrb[46].mxu0 }
 0xd85   : > { %v3985_v10 = vadd.f32 %v4791_v6, %v6681_v37  ;;  %v4793_v49 = vadd.f32 %v4778_v17, %v6782_v45  ;;  %v3936_v7 = vpop.f32.mrb[47].mxu0 }
 0xd86   : > { %v3983_v63 = vadd.f32 %v4792_v8, %v6681_v37  ;;  %v4794_v62 = vadd.f32 %v3936_v7, %v6783_v29 }
 0xd87   : > { %v4017_v14 = vadd.f32 %v4001_v26, %v3985_v10  ;;  %v3986_v50 = vadd.f32 %v4793_v49, %v6681_v37 }
 0xd88   : > { %v4015_v58 = vadd.f32 %v3999_v16, %v3983_v63  ;;  %v3984_v59 = vadd.f32 %v4794_v62, %v6681_v37 }
 0xd89   : > { %4033 = vst [vmem:[%s6689_s23 + $0x70] sm:$0xff] %v4017_v14  ;;  %v4018_v15 = vadd.f32 %v4002_v36, %v3986_v50 }
 0xd8a   : > { %4031 = vst [vmem:[%s6689_s23 + $0x60] sm:$0xff] %v4015_v58  ;;  %v4016_v33 = vadd.f32 %v4000_v35, %v3984_v59 }
 0xd8b   : > { %4034 = vst [vmem:[%s6689_s23 + $0x78] sm:$0xff] %v4018_v15 }
 0xd8c   : > { %4032 = vst [vmem:[%s6689_s23 + $0x68] sm:$0xff] %v4016_v33 }
 0xd8d PF: > { %s15_s18 = sadd.s32 1, %s5193_s18  }
 0xd8e   : > { %p12_p4 = scmp.ge.s32.totalorder %s15_s18, 4  }
 0xd90   :  { %14 = sbr.rel (!%p12_p4) target bundleno = 1 (0x1), region = 73 }

</bundles_post_ra>
